<compile_context>
chip_gen: v7x
topology: tpu7x:2x2x1
jax: 0.10.0
libtpu: 0.0.40
codegen_flags: <defaults>
</compile_context>

<pallas_src>
import functools

import jax
import jax.numpy as jnp
from jax.experimental import pallas as pl
from jax.experimental.pallas import tpu as pltpu

C_FEAT = 2048          # backbone output channels (fixed by the module)
C_RED = C_FEAT // 16   # SE reduction -> 128
NUM_CLASSES = 100


# --------------------------------------------------------------------------- #
# Kernel
# --------------------------------------------------------------------------- #
def head_kernel(feats_ref, w1_ref, b1_ref, w2_ref, b2_ref, wc_ref, bc_ref,
                out_ref, acc_ref, *, hw_total):
    """Streamed pooling + SE attention + classifier.

    feats_ref: (TB, THW, C)  channels-last spatial tile (C=2048 on lanes)
    w1_ref:    (C, C//16)    b1_ref: (1, C//16)     [weights bf16 or f32]
    w2_ref:    (C//16, C)    b2_ref: (1, C)
    wc_ref:    (C, N_PAD)    bc_ref: (1, N_PAD)
    out_ref:   (TB, N_PAD)   f32
    acc_ref:   (TB, C)       f32 scratch -- spatial-sum accumulator
    """
    s = pl.program_id(1)

    @pl.when(s == 0)
    def _init():
        acc_ref[...] = jnp.zeros_like(acc_ref)

    # Partial global-average-pool: sum this spatial tile over the sublane axis
    # (VPU adds + a 3-step sublane collapse), accumulate in f32.  No per-element
    # cross-lane XLU work -> the kernel stays DMA-bound on the feats stream.
    acc_ref[...] += jnp.sum(feats_ref[...].astype(jnp.float32), axis=1)

    @pl.when(s == pl.num_programs(1) - 1)
    def _finalize():
        pooled_f32 = acc_ref[...] * (1.0 / hw_total)           # (TB, C) mean
        pooled = pooled_f32.astype(w1_ref.dtype)

        # channel_attention: Linear -> ReLU -> Linear -> Sigmoid (f32 accum)
        h = jnp.dot(pooled, w1_ref[...],
                    preferred_element_type=jnp.float32) + b1_ref[...]
        h = jnp.maximum(h, 0.0)
        z = jnp.dot(h.astype(w2_ref.dtype), w2_ref[...],
                    preferred_element_type=jnp.float32) + b2_ref[...]
        # numerically safe sigmoid: exp of a non-positive argument only
        e = jnp.exp(-jnp.abs(z))
        att = jnp.where(z >= 0, 1.0 / (1.0 + e), e / (1.0 + e))

        gated = (pooled_f32 * att).astype(wc_ref.dtype)        # channel gate

        # classifier: Dropout (identity, eval) -> Linear (lane-padded to 128)
        out = jnp.dot(gated, wc_ref[...],
                      preferred_element_type=jnp.float32) + bc_ref[...]
        out_ref[...] = out.astype(out_ref.dtype)


# --------------------------------------------------------------------------- #
# Tiling / VMEM budgeting helpers (all trace-time Python)
# --------------------------------------------------------------------------- #
def _round_up(x, m):
    return ((x + m - 1) // m) * m


def _vmem_limit_bytes():
    """Per-generation VMEM limit with headroom (v5e/v6e 128 MiB, v7x 64 MiB)."""
    try:
        cap = int(pltpu.get_tpu_info().vmem_capacity_bytes)
    except Exception:
        cap = 64 * 1024 * 1024      # conservative fallback (v7x physical)
    return (cap * 3) // 4


def _choose_tiles(batch, hw, c, feat_itemsize, n_pad, vmem_limit, weight_bytes):
    """Jointly pick (TB, THW, HW_eff) so that the double-buffered feats stream,
    the accumulator scratch, the output buffers and the (double-buffered)
    weights all fit the per-generation VMEM budget."""
    budget = vmem_limit - 2 * weight_bytes - (4 << 20)          # headroom
    b_pad8 = _round_up(batch, 8)
    tb_cands = [tb for tb in (64, 32, 16, 8) if tb <= b_pad8]
    if b_pad8 >= 16:
        # keep >= 2 batch tiles so v7x's two TensorCores both get work
        two = [tb for tb in tb_cands if _round_up(batch, tb) // tb >= 2]
        if two:
            tb_cands = two
    if not tb_cands:
        tb_cands = [8]

    def fits(tb, thw):
        feats_bytes = 2 * tb * thw * c * feat_itemsize          # double-buffered
        fixed_bytes = tb * c * 4 + 2 * tb * n_pad * 4           # acc + out bufs
        return feats_bytes + fixed_bytes <= budget

    # 1) full spatial extent (single reduction step), largest batch tile first
    for tb in tb_cands:
        if fits(tb, hw):
            return tb, hw, hw
    # 2) stream spatial tiles: multiple-of-8 divisors of HW, largest first
    for tb in tb_cands:
        for thw in range((hw // 8) * 8, 0, -8):
            if hw % thw == 0 and fits(tb, thw):
                return tb, thw, hw
    # 3) last resort: TB=8, largest multiple-of-8 spatial tile that fits; pad
    #    HW up to a multiple of it (zero rows do not change the sum).
    tb = 8
    max_thw = (budget // (2 * tb * c * feat_itemsize)) // 8 * 8
    thw = max(8, int(max_thw))
    return tb, thw, _round_up(hw, thw)


# --------------------------------------------------------------------------- #
# One-time parameter preparation (hoisted out of the inference path)
# --------------------------------------------------------------------------- #
def prepare_head_params(w1, b1, w2, b2, wc, bc, dtype=jnp.bfloat16):
    """Transpose PyTorch (out,in) Linear weights, pad classifier to 128 lanes,
    cast matmul operands to `dtype` (biases stay f32).  Call once and reuse."""
    num_classes, c = wc.shape
    n_pad = _round_up(num_classes, 128)
    w1_t = jnp.asarray(w1).T.astype(dtype)                       # (C, C//16)
    w2_t = jnp.asarray(w2).T.astype(dtype)                       # (C//16, C)
    wc_p = jnp.zeros((c, n_pad), dtype).at[:, :num_classes].set(
        jnp.asarray(wc).T.astype(dtype))                         # (C, N_PAD)
    b1_2d = jnp.asarray(b1).reshape(1, -1).astype(jnp.float32)
    b2_2d = jnp.asarray(b2).reshape(1, -1).astype(jnp.float32)
    bc_p = jnp.zeros((1, n_pad), jnp.float32).at[:, :num_classes].set(
        jnp.asarray(bc).reshape(1, -1).astype(jnp.float32))
    return (w1_t, b1_2d, w2_t, b2_2d, wc_p, bc_p)


# --------------------------------------------------------------------------- #
# Jitted head
# --------------------------------------------------------------------------- #
@functools.partial(jax.jit, static_argnames=("num_classes",))
def enhanced_resnext_head(feats_nchw, params, *, num_classes=NUM_CLASSES):
    """feats_nchw: (B, 2048, H, W) backbone output (PyTorch NCHW layout)."""
    w1_t, b1_2d, w2_t, b2_2d, wc_p, bc_p = params
    b, c, h, w = feats_nchw.shape
    hw = h * w
    c_red = w1_t.shape[1]
    n_pad = wc_p.shape[1]

    # NCHW -> channels-last (B, HW, C): HW on sublanes, C dense on lanes.
    # TODO(synk): with a JAX/NHWC backbone this transpose disappears; it is kept
    #             so the public interface matches the PyTorch NCHW feature map.
    feats = jnp.transpose(feats_nchw.reshape(b, c, hw), (0, 2, 1))

    vmem_limit = _vmem_limit_bytes()
    weight_bytes = sum(int(p.size) * p.dtype.itemsize for p in params)
    tb, thw, hw_eff = _choose_tiles(b, hw, c, feats.dtype.itemsize,
                                    n_pad, vmem_limit, weight_bytes)

    if hw_eff != hw:                       # spatial zero-pad (sum unaffected)
        feats = jnp.pad(feats, ((0, 0), (0, hw_eff - hw), (0, 0)))
    b_pad = _round_up(b, tb)               # batch pad to the batch-tile granule
    if b_pad != b:
        feats = jnp.pad(feats, ((0, b_pad - b), (0, 0), (0, 0)))

    n_b = b_pad // tb
    n_s = hw_eff // thw

    kernel = functools.partial(head_kernel, hw_total=float(hw))

    cost = pl.CostEstimate(
        flops=int(b_pad * hw_eff * c                       # pooling adds
                  + 2 * b_pad * (c * c_red                 # SE fc1
                                 + c_red * c               # SE fc2
                                 + c * n_pad)),            # classifier
        transcendentals=int(b_pad * c),                    # sigmoid exp
        # constant-index weight blocks are DMA'd once by the pipeline
        bytes_accessed=int(feats.size * feats.dtype.itemsize
                           + weight_bytes
                           + b_pad * n_pad * 4),
    )

    out = pl.pallas_call(
        kernel,
        out_shape=jax.ShapeDtypeStruct((b_pad, n_pad), jnp.float32),
        grid_spec=pltpu.PrefetchScalarGridSpec(
            num_scalar_prefetch=0,
            grid=(n_b, n_s),                               # batch outer, HW inner
            in_specs=[
                pl.BlockSpec((tb, thw, c), lambda bi, si: (bi, si, 0)),  # stream
                pl.BlockSpec((c, c_red), lambda bi, si: (0, 0)),
                pl.BlockSpec((1, c_red), lambda bi, si: (0, 0)),
                pl.BlockSpec((c_red, c), lambda bi, si: (0, 0)),
                pl.BlockSpec((1, c), lambda bi, si: (0, 0)),
                pl.BlockSpec((c, n_pad), lambda bi, si: (0, 0)),
                pl.BlockSpec((1, n_pad), lambda bi, si: (0, 0)),
            ],
            out_specs=pl.BlockSpec((tb, n_pad), lambda bi, si: (bi, 0)),
            scratch_shapes=[pltpu.VMEM((tb, c), jnp.float32)],
        ),
        compiler_params=pltpu.CompilerParams(
            dimension_semantics=("parallel", "arbitrary"),
            vmem_limit_bytes=int(vmem_limit)),
        cost_estimate=cost,
    )(feats, w1_t, b1_2d, w2_t, b2_2d, wc_p, bc_p)

    return out[:b, :num_classes]


# --------------------------------------------------------------------------- #
# Reference / init helpers
# --------------------------------------------------------------------------- #
def kaiming_normal_fan_out(key, out_f, in_f):
    # nn.init.kaiming_normal_(mode='fan_out', nonlinearity='relu')
    std = (2.0 / out_f) ** 0.5
    return std * jax.random.normal(key, (out_f, in_f), dtype=jnp.float32)


def reference(feats_nchw, w1, b1, w2, b2, wc, bc):
    """Pure-JAX f32 reference of the PyTorch forward (head part, eval mode)."""
    pooled = jnp.mean(feats_nchw.astype(jnp.float32), axis=(2, 3))   # (B, C)
    hidden = jnp.maximum(pooled @ w1.T + b1, 0.0)
    att = jax.nn.sigmoid(hidden @ w2.T + b2)
    return (pooled * att) @ wc.T + bc


# --------------------------------------------------------------------------- #
# Demo
# --------------------------------------------------------------------------- #
if __name__ == "__main__":
    key = jax.random.PRNGKey(0)
    k_feat, k_w1, k_w2, k_wc = jax.random.split(key, 4)

    # Small, module-consistent shapes: backbone output feature map.
    B, H, W = 2, 4, 4
    feats = jax.random.normal(k_feat, (B, C_FEAT, H, W), dtype=jnp.float32)

    # Deterministic parameter init (shapes from __init__).
    w1 = kaiming_normal_fan_out(k_w1, C_RED, C_FEAT)          # (128, 2048)
    b1 = jnp.zeros((C_RED,), jnp.float32)
    w2 = kaiming_normal_fan_out(k_w2, C_FEAT, C_RED)          # (2048, 128)
    b2 = jnp.zeros((C_FEAT,), jnp.float32)
    wc = kaiming_normal_fan_out(k_wc, NUM_CLASSES, C_FEAT)    # (100, 2048)
    bc = jnp.zeros((NUM_CLASSES,), jnp.float32)

    ref = reference(feats, w1, b1, w2, b2, wc, bc)

    # f32 path: tight numerical check against the f32 reference.
    params_f32 = prepare_head_params(w1, b1, w2, b2, wc, bc, dtype=jnp.float32)
    out_f32 = enhanced_resnext_head(feats, params_f32, num_classes=NUM_CLASSES)
    out_f32 = jax.block_until_ready(out_f32)
    assert out_f32.shape == (B, NUM_CLASSES), out_f32.shape
    assert jnp.allclose(out_f32, ref, atol=2e-4, rtol=2e-4), (
        float(jnp.max(jnp.abs(out_f32 - ref))))

    # bf16 production path (half the HBM bytes on the dominant feats stream).
    params_bf16 = prepare_head_params(w1, b1, w2, b2, wc, bc, dtype=jnp.bfloat16)
    out_bf16 = enhanced_resnext_head(feats.astype(jnp.bfloat16), params_bf16,
                                     num_classes=NUM_CLASSES)
    out_bf16 = jax.block_until_ready(out_bf16)
    assert out_bf16.shape == (B, NUM_CLASSES), out_bf16.shape
    assert jnp.allclose(out_bf16, ref, atol=3e-2, rtol=3e-2), (
        float(jnp.max(jnp.abs(out_bf16 - ref))))

    print("KERNEL_OK")
</pallas_src>

<mosaic_0001>
module attributes {stable_mosaic.version = 11 : i64} {
  func.func @head_kernel(%arg0: i32, %arg1: i32, %arg2: memref<8x16x2048xf32, #tpu.memory_space<vmem>>, %arg3: memref<2048x128xf32, #tpu.memory_space<vmem>>, %arg4: memref<1x128xf32, #tpu.memory_space<vmem>>, %arg5: memref<128x2048xf32, #tpu.memory_space<vmem>>, %arg6: memref<1x2048xf32, #tpu.memory_space<vmem>>, %arg7: memref<2048x128xf32, #tpu.memory_space<vmem>>, %arg8: memref<1x128xf32, #tpu.memory_space<vmem>>, %arg9: memref<8x128xf32, #tpu.memory_space<vmem>>, %arg10: memref<8x2048xf32, #tpu.memory_space<vmem>>) attributes {dimension_semantics = [#tpu.dimension_semantics<parallel>, #tpu.dimension_semantics<arbitrary>], iteration_bounds = array<i64: 1, 1>, scalar_prefetch = 0 : i64, scratch_operands = 1 : i64, tpu.core_type = #tpu.core_type<tc>, window_params = [{transform_indices = @transform_0, window_bounds = array<i64: 8, 16, 2048>}, {pipeline_mode = #tpu.pipeline_mode<synchronous>, transform_indices = @transform_1, window_bounds = array<i64: 2048, 128>}, {pipeline_mode = #tpu.pipeline_mode<synchronous>, transform_indices = @transform_2, window_bounds = array<i64: 1, 128>}, {pipeline_mode = #tpu.pipeline_mode<synchronous>, transform_indices = @transform_3, window_bounds = array<i64: 128, 2048>}, {pipeline_mode = #tpu.pipeline_mode<synchronous>, transform_indices = @transform_4, window_bounds = array<i64: 1, 2048>}, {pipeline_mode = #tpu.pipeline_mode<synchronous>, transform_indices = @transform_5, window_bounds = array<i64: 2048, 128>}, {pipeline_mode = #tpu.pipeline_mode<synchronous>, transform_indices = @transform_6, window_bounds = array<i64: 1, 128>}, {transform_indices = @transform_7, window_bounds = array<i64: 8, 128>}]} {
    %c0_i32 = arith.constant 0 : i32
    %0 = arith.cmpi eq, %arg1, %c0_i32 : i32
    %1 = arith.extui %0 : i1 to i32
    %c0_i32_0 = arith.constant 0 : i32
    %2 = arith.cmpi ne, %1, %c0_i32_0 : i32
    scf.if %2 {
      %cst_9 = arith.constant 0.000000e+00 : f32
      %11 = vector.broadcast %cst_9 : f32 to vector<8x2048xf32>
      %c0_10 = arith.constant 0 : index
      %c0_11 = arith.constant 0 : index
      %12 = vector.load %arg10[%c0_10, %c0_11] : memref<8x2048xf32, #tpu.memory_space<vmem>>, vector<8x2048xf32>
      tpu.vector_store %arg10[%c0_10, %c0_11], %11 {strides = array<i32>} : memref<8x2048xf32, #tpu.memory_space<vmem>>, vector<8x2048xf32>,
    } else {
    }
    %c0 = arith.constant 0 : index
    %c0_1 = arith.constant 0 : index
    %3 = vector.load %arg10[%c0, %c0_1] : memref<8x2048xf32, #tpu.memory_space<vmem>>, vector<8x2048xf32>
    %c0_2 = arith.constant 0 : index
    %c0_3 = arith.constant 0 : index
    %c0_4 = arith.constant 0 : index
    %4 = vector.load %arg2[%c0_2, %c0_3, %c0_4] : memref<8x16x2048xf32, #tpu.memory_space<vmem>>, vector<8x16x2048xf32>
    %cst = arith.constant dense<0.000000e+00> : vector<8x2048xf32>
    %5 = vector.multi_reduction <add>, %4, %cst [1] : vector<8x16x2048xf32> to vector<8x2048xf32>
    %6 = arith.addf %3, %5 : vector<8x2048xf32>
    %c0_5 = arith.constant 0 : index
    %c0_6 = arith.constant 0 : index
    %7 = vector.load %arg10[%c0_5, %c0_6] : memref<8x2048xf32, #tpu.memory_space<vmem>>, vector<8x2048xf32>
    tpu.vector_store %arg10[%c0_5, %c0_6], %6 {strides = array<i32>} : memref<8x2048xf32, #tpu.memory_space<vmem>>, vector<8x2048xf32>,
    %c0_i32_7 = arith.constant 0 : i32
    %8 = arith.cmpi eq, %arg1, %c0_i32_7 : i32
    %9 = arith.extui %8 : i1 to i32
    %c0_i32_8 = arith.constant 0 : i32
    %10 = arith.cmpi ne, %9, %c0_i32_8 : i32
    scf.if %10 {
      %c0_9 = arith.constant 0 : index
      %c0_10 = arith.constant 0 : index
      %11 = vector.load %arg10[%c0_9, %c0_10] : memref<8x2048xf32, #tpu.memory_space<vmem>>, vector<8x2048xf32>
      %cst_11 = arith.constant 6.250000e-02 : f32
      %12 = vector.broadcast %cst_11 : f32 to vector<8x2048xf32>
      %13 = arith.mulf %11, %12 : vector<8x2048xf32>
      %c0_12 = arith.constant 0 : index
      %c0_13 = arith.constant 0 : index
      %14 = vector.load %arg3[%c0_12, %c0_13] : memref<2048x128xf32, #tpu.memory_space<vmem>>, vector<2048x128xf32>
      %cst_14 = arith.constant dense<0.000000e+00> : vector<8x128xf32>
      %15 = tpu.matmul %13, %14, %cst_14 {dimension_numbers = #tpu.dot_dimension_numbers<[1], [0], [0], [1], [0, 0, 1, 1], [], []>} : vector<8x2048xf32>, vector<2048x128xf32>, vector<8x128xf32> -> vector<8x128xf32>
      %c0_15 = arith.constant 0 : index
      %c0_16 = arith.constant 0 : index
      %16 = vector.load %arg4[%c0_15, %c0_16] : memref<1x128xf32, #tpu.memory_space<vmem>>, vector<1x128xf32>
      %17 = vector.broadcast %16 : vector<1x128xf32> to vector<8x128xf32>
      %18 = arith.addf %15, %17 : vector<8x128xf32>
      %cst_17 = arith.constant 0.000000e+00 : f32
      %19 = vector.broadcast %cst_17 : f32 to vector<8x128xf32>
      %20 = arith.maximumf %18, %19 : vector<8x128xf32>
      %c0_18 = arith.constant 0 : index
      %c0_19 = arith.constant 0 : index
      %21 = vector.load %arg5[%c0_18, %c0_19] : memref<128x2048xf32, #tpu.memory_space<vmem>>, vector<128x2048xf32>
      %cst_20 = arith.constant dense<0.000000e+00> : vector<8x2048xf32>
      %22 = tpu.matmul %20, %21, %cst_20 {dimension_numbers = #tpu.dot_dimension_numbers<[1], [0], [0], [1], [0, 0, 1, 1], [], []>} : vector<8x128xf32>, vector<128x2048xf32>, vector<8x2048xf32> -> vector<8x2048xf32>
      %c0_21 = arith.constant 0 : index
      %c0_22 = arith.constant 0 : index
      %23 = vector.load %arg6[%c0_21, %c0_22] : memref<1x2048xf32, #tpu.memory_space<vmem>>, vector<1x2048xf32>
      %24 = vector.broadcast %23 : vector<1x2048xf32> to vector<8x2048xf32>
      %25 = arith.addf %22, %24 : vector<8x2048xf32>
      %26 = math.absf %25 : vector<8x2048xf32>
      %cst_23 = arith.constant 0.000000e+00 : f32
      %27 = vector.broadcast %cst_23 : f32 to vector<8x2048xf32>
      %28 = arith.subf %27, %26 : vector<8x2048xf32>
      %29 = math.exp %28 : vector<8x2048xf32>
      %cst_24 = arith.constant 0.000000e+00 : f32
      %30 = vector.broadcast %cst_24 : f32 to vector<8x2048xf32>
      %31 = arith.cmpf oge, %25, %30 : vector<8x2048xf32>
      %cst_25 = arith.constant 1.000000e+00 : f32
      %32 = vector.broadcast %cst_25 : f32 to vector<8x2048xf32>
      %33 = arith.addf %32, %29 : vector<8x2048xf32>
      %cst_26 = arith.constant 1.000000e+00 : f32
      %34 = vector.broadcast %cst_26 : f32 to vector<8x2048xf32>
      %35 = arith.divf %34, %33 : vector<8x2048xf32>
      %cst_27 = arith.constant 1.000000e+00 : f32
      %36 = vector.broadcast %cst_27 : f32 to vector<8x2048xf32>
      %37 = arith.addf %36, %29 : vector<8x2048xf32>
      %38 = arith.divf %29, %37 : vector<8x2048xf32>
      %39 = arith.select %31, %35, %38 : vector<8x2048xi1>, vector<8x2048xf32>
      %40 = arith.mulf %13, %39 : vector<8x2048xf32>
      %c0_28 = arith.constant 0 : index
      %c0_29 = arith.constant 0 : index
      %41 = vector.load %arg7[%c0_28, %c0_29] : memref<2048x128xf32, #tpu.memory_space<vmem>>, vector<2048x128xf32>
      %cst_30 = arith.constant dense<0.000000e+00> : vector<8x128xf32>
      %42 = tpu.matmul %40, %41, %cst_30 {dimension_numbers = #tpu.dot_dimension_numbers<[1], [0], [0], [1], [0, 0, 1, 1], [], []>} : vector<8x2048xf32>, vector<2048x128xf32>, vector<8x128xf32> -> vector<8x128xf32>
      %c0_31 = arith.constant 0 : index
      %c0_32 = arith.constant 0 : index
      %43 = vector.load %arg8[%c0_31, %c0_32] : memref<1x128xf32, #tpu.memory_space<vmem>>, vector<1x128xf32>
      %44 = vector.broadcast %43 : vector<1x128xf32> to vector<8x128xf32>
      %45 = arith.addf %42, %44 : vector<8x128xf32>
      %c0_33 = arith.constant 0 : index
      %c0_34 = arith.constant 0 : index
      %46 = vector.load %arg9[%c0_33, %c0_34] : memref<8x128xf32, #tpu.memory_space<vmem>>, vector<8x128xf32>
      tpu.vector_store %arg9[%c0_33, %c0_34], %45 {strides = array<i32>} : memref<8x128xf32, #tpu.memory_space<vmem>>, vector<8x128xf32>,
    } else {
    }
    return
  }
  func.func @transform_0(%arg0: i32, %arg1: i32) -> (i32, i32, i32) {
    %c0_i32 = arith.constant 0 : i32
    %c0_i32_0 = arith.constant 0 : i32
    return %arg0, %arg1, %c0_i32 : i32, i32, i32
  }
  func.func @transform_1(%arg0: i32, %arg1: i32) -> (i32, i32) {
    %c0_i32 = arith.constant 0 : i32
    %c0_i32_0 = arith.constant 0 : i32
    %c0_i32_1 = arith.constant 0 : i32
    return %c0_i32, %c0_i32_0 : i32, i32
  }
  func.func @transform_2(%arg0: i32, %arg1: i32) -> (i32, i32) {
    %c0_i32 = arith.constant 0 : i32
    %c0_i32_0 = arith.constant 0 : i32
    %c0_i32_1 = arith.constant 0 : i32
    return %c0_i32, %c0_i32_0 : i32, i32
  }
  func.func @transform_3(%arg0: i32, %arg1: i32) -> (i32, i32) {
    %c0_i32 = arith.constant 0 : i32
    %c0_i32_0 = arith.constant 0 : i32
    %c0_i32_1 = arith.constant 0 : i32
    return %c0_i32, %c0_i32_0 : i32, i32
  }
  func.func @transform_4(%arg0: i32, %arg1: i32) -> (i32, i32) {
    %c0_i32 = arith.constant 0 : i32
    %c0_i32_0 = arith.constant 0 : i32
    %c0_i32_1 = arith.constant 0 : i32
    return %c0_i32, %c0_i32_0 : i32, i32
  }
  func.func @transform_5(%arg0: i32, %arg1: i32) -> (i32, i32) {
    %c0_i32 = arith.constant 0 : i32
    %c0_i32_0 = arith.constant 0 : i32
    %c0_i32_1 = arith.constant 0 : i32
    return %c0_i32, %c0_i32_0 : i32, i32
  }
  func.func @transform_6(%arg0: i32, %arg1: i32) -> (i32, i32) {
    %c0_i32 = arith.constant 0 : i32
    %c0_i32_0 = arith.constant 0 : i32
    %c0_i32_1 = arith.constant 0 : i32
    return %c0_i32, %c0_i32_0 : i32, i32
  }
  func.func @transform_7(%arg0: i32, %arg1: i32) -> (i32, i32) {
    %c0_i32 = arith.constant 0 : i32
    %c0_i32_0 = arith.constant 0 : i32
    return %arg0, %c0_i32 : i32, i32
  }
}

</mosaic_0001>

<bundles_post_ra>
// kernel: enhanced_resnext_head.1
= control target key start
LH: loop header
LB: loop body
LE: loop exit
PB: predicated region body
PF: predicated region fallthrough
CT: control target
= control target key end

     0   :  { %12 = vsyncpa [#allocation4], 0  ;;  %s8553_s0 = inlined_call_operand.vmem [shape: f32[8,16,2048], index: 0, kind: input, shape index: {}]   ;;  %s8554_s1 = inlined_call_operand.vmem [shape: f32[2048,128], index: 1, kind: input, shape index: {}]   ;;  %s8555_s2 = inlined_call_operand.vmem [shape: f32[1,128], index: 2, kind: input, shape index: {}]   ;;  %s8556_s3 = inlined_call_operand.hbm [shape: f32[128,2048], index: 3, kind: input, shape index: {}]   ;;  %s8557_s4 = inlined_call_operand.vmem [shape: f32[1,2048], index: 4, kind: input, shape index: {}]   ;;  %s8558_s5 = inlined_call_operand.hbm [shape: f32[2048,128], index: 5, kind: input, shape index: {}]   ;;  %s8559_s6 = inlined_call_operand.vmem [shape: f32[1,128], index: 6, kind: input, shape index: {}]   ;;  %s8560_s7 = inlined_call_operand.vmem [shape: f32[8,128], index: 7, kind: output, shape index: {}]  }
   0x1   :  { %13 = vsyncpa [#allocation6], 0  ;;  %s5758_s24 = smov [#allocation3]   ;;  %s5710_s28 = scalar_lea.hbm %s8556_s3, 32768 }
   0x2   :  { %s25_s25 = sshll.u32 %s5758_s24, 4  ;;  %p5711_p0 = scmp.ne.s32.totalorder %s8556_s3, %s5710_s28  ;;  %s26_s25 = int_to_ptr.vmem [resolvable:$true] %s25_s25 }
   0x3   :  { %p5714_p1 = scmp.lt.u32.totalorder %s5710_s28, %s8556_s3 }
   0x5   :  { %p5716_p2 = pnand %p5714_p1, %p5711_p0 }
   0x7   :  { %5719 = shalt.err (!%p5716_p2)
}
   0x8   :  { %s5720_s10 = scalar_lea.vmem %s26_s25, 32768  ;;  %p5725_p4 = scmp.lt.s32.totalorder %s26_s25, %s26_s25 }
   0x9   :  { %p5721_p3 = scmp.ne.s32.totalorder %s26_s25, %s5720_s10  ;;  %p5726_p5 = scmp.lt.s32.totalorder %s5720_s10, %s5720_s10 }
   0xb   :  { %p5727_p6 = por %p5726_p5, %p5725_p4 }
   0xd   :  { %p5728_p7 = pnand %p5727_p6, %p5721_p3 }
   0xf   :  { %5731 = shalt.err (!%p5728_p7)
}
  0x10   :  { %s5759_s11 = smov 2048   ;;  %s5760_s12 = smov 128  }
  0x11   :  { %31 = dma.hbm_to_vmem [thread:$0]  %s8556_s3, 32768, %s26_s25, [#allocation4], %s5759_s11, %s5759_s11, %s5760_s12  }
  0x12   :  { %s5761_s15 = smov [#allocation5]   ;;  %s5732_s19 = scalar_lea.hbm %s8558_s5, 32768 }
  0x13   :  { %s39_s16 = sshll.u32 %s5761_s15, 4  ;;  %p5733_p8 = scmp.ne.s32.totalorder %s8558_s5, %s5732_s19  ;;  %s40_s16 = int_to_ptr.vmem [resolvable:$true] %s39_s16 }
  0x14   :  { %p5736_p9 = scmp.lt.u32.totalorder %s5732_s19, %s8558_s5 }
  0x16   :  { %p5738_p10 = pnand %p5736_p9, %p5733_p8 }
  0x18   :  { %5741 = shalt.err (!%p5738_p10)
}
  0x19   :  { %s5742_s24 = scalar_lea.vmem %s40_s16, 32768  ;;  %p5747_p12 = scmp.lt.s32.totalorder %s40_s16, %s40_s16 }
  0x1a   :  { %p5743_p11 = scmp.ne.s32.totalorder %s40_s16, %s5742_s24  ;;  %p5748_p13 = scmp.lt.s32.totalorder %s5742_s24, %s5742_s24 }
  0x1c   :  { %p5749_p0 = por %p5748_p13, %p5747_p12 }
  0x1e   :  { %p5750_p1 = pnand %p5749_p0, %p5743_p11 }
  0x20   :  { %5753 = shalt.err (!%p5750_p1)
}
  0x21   :  { %s5762_s3 = smov 8  }
  0x22   :  { %45 = dma.hbm_to_vmem [thread:$0]  %s8558_s5, 32768, %s40_s16, [#allocation6], %s5760_s12, %s5760_s12, %s5762_s3  }
  0x23   :  { %5754 = dma.done.wait [#allocation4], 32768  }
  0x24   :  { %5755 = vsyncadd [#allocation4], 4294934528 }
  0x25   :  { %5756 = dma.done.wait [#allocation6], 32768  }
  0x26   :  { %5757 = vsyncadd [#allocation6], 4294934528  ;;  %v1588_v0 = vld [vmem:[%s8554_s1 + $0x80] sm:$0xff]  ;;  %v1589_v1 = vld [vmem:[%s8554_s1 + $0x88] sm:$0xff]  ;;  %vm1370_vm0 = vcmask 1041409   ;;  %vm1372_vm1 = vcmask 1042434  }
  0x27   :  { %v1572_v2 = vld [vmem:[%s8554_s1] sm:$0xff]  ;;  %v4872_v3 = vpack.c.bf16 %v1589_v1, %v1588_v0  ;;  %v1573_v4 = vld [vmem:[%s8554_s1 + $0x8] sm:$0xff]  ;;  %v1590_v11 = vld [vmem:[%s8554_s1 + $0x90] sm:$0xff]  ;;  %vm1374_vm2 = vcmask 1043459   ;;  %vm1376_vm3 = vcmask 1044484   ;;  %vm1378_vm4 = vcmask 1045509  }
  0x28   :  { %v1620_v5 = vld [vmem:[%s8554_s1 + $0x180] sm:$0xff]  ;;  %v1621_v6 = vld [vmem:[%s8554_s1 + $0x188] sm:$0xff]  ;;  %v4874_v7 = vpack.c.bf16 %v1573_v4, %v1572_v2  ;;  %v1591_v13 = vld [vmem:[%s8554_s1 + $0x98] sm:$0xff]  ;;  %vm1380_vm5 = vcmask 1046534   ;;  %vm1382_vm6 = vcmask 1047559  }
  0x29   :  { %v4904_v8 = vpack.c.bf16 %v1621_v6, %v1620_v5  ;;  %v1604_v9 = vld [vmem:[%s8554_s1 + $0x100] sm:$0xff]  ;;  %v1605_v10 = vld [vmem:[%s8554_s1 + $0x108] sm:$0xff]  ;;  %4873 = vmatprep.subr.bf16.mxu0 %v4872_v3  ;;  %v1574_v14 = vld [vmem:[%s8554_s1 + $0x10] sm:$0xff]  ;;  %v4876_v16 = vpack.c.bf16 %v1591_v13, %v1590_v11 }
  0x2a   :  { %v4906_v12 = vpack.c.bf16 %v1605_v10, %v1604_v9  ;;  %v1575_v15 = vld [vmem:[%s8554_s1 + $0x18] sm:$0xff]  ;;  %4875 = vmatpush3.bf16.msra.mxu0 %v4874_v7  ;;  %v1622_v18 = vld [vmem:[%s8554_s1 + $0x190] sm:$0xff]  ;;  %v1592_v23 = vld [vmem:[%s8554_s1 + $0xa0] sm:$0xff] }
  0x2b   :  { %4905 = vmatprep.subr.bf16.mxu1 %v4904_v8  ;;  %v4878_v17 = vpack.c.bf16 %v1575_v15, %v1574_v14  ;;  %v1623_v19 = vld [vmem:[%s8554_s1 + $0x198] sm:$0xff]  ;;  %v1606_v20 = vld [vmem:[%s8554_s1 + $0x110] sm:$0xff]  ;;  %v1593_v24 = vld [vmem:[%s8554_s1 + $0xa8] sm:$0xff]  ;;  %4877 = vmatprep.subr.bf16.mxu0 %v4876_v16 }
  0x2c   :  { %4907 = vmatpush3.bf16.msra.mxu1 %v4906_v12  ;;  %v4908_v21 = vpack.c.bf16 %v1623_v19, %v1622_v18  ;;  %v1607_v22 = vld [vmem:[%s8554_s1 + $0x118] sm:$0xff]  ;;  %v4880_v26 = vpack.c.bf16 %v1593_v24, %v1592_v23  ;;  %v1576_v27 = vld [vmem:[%s8554_s1 + $0x20] sm:$0xff]  ;;  %v1577_v28 = vld [vmem:[%s8554_s1 + $0x28] sm:$0xff] }
  0x2d   :  { %v4910_v25 = vpack.c.bf16 %v1607_v22, %v1606_v20  ;;  %v1624_v29 = vld [vmem:[%s8554_s1 + $0x1a0] sm:$0xff]  ;;  %v1625_v30 = vld [vmem:[%s8554_s1 + $0x1a8] sm:$0xff]  ;;  %v4882_v33 = vpack.c.bf16 %v1577_v28, %v1576_v27  ;;  %v1594_v35 = vld [vmem:[%s8554_s1 + $0xb0] sm:$0xff] }
  0x2e   :  { %4909 = vmatprep.subr.bf16.mxu1 %v4908_v21  ;;  %v1608_v31 = vld [vmem:[%s8554_s1 + $0x120] sm:$0xff]  ;;  %v1609_v32 = vld [vmem:[%s8554_s1 + $0x128] sm:$0xff]  ;;  %4879 = vmatpush3.bf16.msra.mxu0 %v4878_v17  ;;  %v4912_v34 = vpack.c.bf16 %v1625_v30, %v1624_v29  ;;  %v1595_v36 = vld [vmem:[%s8554_s1 + $0xb8] sm:$0xff] }
  0x2f   :  { %v1578_v37 = vld [vmem:[%s8554_s1 + $0x30] sm:$0xff]  ;;  %4881 = vmatprep.subr.bf16.mxu0 %v4880_v26  ;;  %v4914_v38 = vpack.c.bf16 %v1609_v32, %v1608_v31  ;;  %v4884_v39 = vpack.c.bf16 %v1595_v36, %v1594_v35  ;;  %v1579_v40 = vld [vmem:[%s8554_s1 + $0x38] sm:$0xff]  ;;  %v1596_v46 = vld [vmem:[%s8554_s1 + $0xc0] sm:$0xff] }
  0x30   :  { %4911 = vmatpush3.bf16.msra.mxu1 %v4910_v25  ;;  %v1626_v41 = vld [vmem:[%s8554_s1 + $0x1b0] sm:$0xff]  ;;  %v1627_v42 = vld [vmem:[%s8554_s1 + $0x1b8] sm:$0xff]  ;;  %v1597_v47 = vld [vmem:[%s8554_s1 + $0xc8] sm:$0xff]  ;;  %v4886_v48 = vpack.c.bf16 %v1579_v40, %v1578_v37 }
  0x31   :  { %4913 = vmatprep.subr.bf16.mxu1 %v4912_v34  ;;  %v4916_v43 = vpack.c.bf16 %v1627_v42, %v1626_v41  ;;  %v1610_v44 = vld [vmem:[%s8554_s1 + $0x130] sm:$0xff]  ;;  %v1611_v45 = vld [vmem:[%s8554_s1 + $0x138] sm:$0xff]  ;;  %v1628_v49 = vld [vmem:[%s8554_s1 + $0x1c0] sm:$0xff]  ;;  %v4888_v52 = vpack.c.bf16 %v1597_v47, %v1596_v46 }
  0x32   :  { %4883 = vmatpush3.bf16.msra.mxu0 %v4882_v33  ;;  %v1629_v50 = vld [vmem:[%s8554_s1 + $0x1c8] sm:$0xff]  ;;  %v4918_v51 = vpack.c.bf16 %v1611_v45, %v1610_v44  ;;  %v1580_v53 = vld [vmem:[%s8554_s1 + $0x40] sm:$0xff]  ;;  %v1598_v58 = vld [vmem:[%s8554_s1 + $0xd0] sm:$0xff] }
  0x33   :  { %4885 = vmatprep.subr.bf16.mxu0 %v4884_v39  ;;  %v1581_v54 = vld [vmem:[%s8554_s1 + $0x48] sm:$0xff]  ;;  %v1612_v55 = vld [vmem:[%s8554_s1 + $0x140] sm:$0xff]  ;;  %v4920_v56 = vpack.c.bf16 %v1629_v50, %v1628_v49  ;;  %v1599_v59 = vld [vmem:[%s8554_s1 + $0xd8] sm:$0xff] }
  0x34   :  { %4915 = vmatpush3.bf16.msra.mxu1 %v4914_v38  ;;  %v1613_v57 = vld [vmem:[%s8554_s1 + $0x148] sm:$0xff]  ;;  %v1582_v60 = vld [vmem:[%s8554_s1 + $0x50] sm:$0xff]  ;;  %v1583_v61 = vld [vmem:[%s8554_s1 + $0x58] sm:$0xff]  ;;  %v4890_v0 = vpack.c.bf16 %v1581_v54, %v1580_v53  ;;  %v4892_v5 = vpack.c.bf16 %v1599_v59, %v1598_v58 }
  0x35   :  { %4917 = vmatprep.subr.bf16.mxu1 %v4916_v43  ;;  %v1630_v62 = vld [vmem:[%s8554_s1 + $0x1d0] sm:$0xff]  ;;  %v1631_v63 = vld [vmem:[%s8554_s1 + $0x1d8] sm:$0xff]  ;;  %v1600_v3 = vld [vmem:[%s8554_s1 + $0xe0] sm:$0xff]  ;;  %v4922_v4 = vpack.c.bf16 %v1613_v57, %v1612_v55  ;;  %v4894_v18 = vpack.c.bf16 %v1583_v61, %v1582_v60 }
  0x36   :  { %4887 = vmatpush3.bf16.msra.mxu0 %v4886_v48  ;;  %v1614_v1 = vld [vmem:[%s8554_s1 + $0x150] sm:$0xff]  ;;  %v1615_v2 = vld [vmem:[%s8554_s1 + $0x158] sm:$0xff]  ;;  %v1601_v6 = vld [vmem:[%s8554_s1 + $0xe8] sm:$0xff]  ;;  %v4924_v9 = vpack.c.bf16 %v1631_v63, %v1630_v62 }
  0x37   :  { %4889 = vmatprep.subr.bf16.mxu0 %v4888_v52  ;;  %v1632_v7 = vld [vmem:[%s8554_s1 + $0x1e0] sm:$0xff]  ;;  %v1633_v8 = vld [vmem:[%s8554_s1 + $0x1e8] sm:$0xff]  ;;  %v6005_v14 = vld [vmem:[%s8554_s1 + $0xf0] sm:$0xff]  ;;  %v4926_v22 = vpack.c.bf16 %v1615_v2, %v1614_v1  ;;  %v4896_v23 = vpack.c.bf16 %v1601_v6, %v1600_v3 }
  0x38   :  { %4919 = vmatpush3.bf16.msra.mxu1 %v4918_v51  ;;  %v5987_v10 = vld [vmem:[%s8554_s1 + $0x60] sm:$0xff]  ;;  %v1585_v11 = vld [vmem:[%s8554_s1 + $0x68] sm:$0xff]  ;;  %v6010_v15 = vld [vmem:[%s8554_s1 + $0xf8] sm:$0xff]  ;;  %v4928_v27 = vpack.c.bf16 %v1633_v8, %v1632_v7 }
  0x39   :  { %4921 = vmatprep.subr.bf16.mxu1 %v4920_v56  ;;  %v5995_v12 = vld [vmem:[%s8554_s1 + $0x160] sm:$0xff]  ;;  %v6000_v13 = vld [vmem:[%s8554_s1 + $0x168] sm:$0xff]  ;;  %v6015_v16 = vld [vmem:[%s8554_s1 + $0x70] sm:$0xff]  ;;  %v4898_v32 = vpack.c.bf16 %v1585_v11, %v5987_v10  ;;  %v4900_v34 = vpack.c.bf16 %v6010_v15, %v6005_v14 }
  0x3a   :  { %v6020_v17 = vld [vmem:[%s8554_s1 + $0x78] sm:$0xff]  ;;  %4891 = vmatpush3.bf16.msra.mxu0 %v4890_v0  ;;  %v6025_v19 = vld [vmem:[%s8554_s1 + $0x1f0] sm:$0xff]  ;;  %v91_v25 = vld [vmem:[%s8553_s0 + $0x8] sm:$0xff]  ;;  %v4930_v33 = vpack.c.bf16 %v6000_v13, %v5995_v12 }
  0x3b   :  { %v6030_v20 = vld [vmem:[%s8554_s1 + $0x1f8] sm:$0xff]  ;;  %v6035_v21 = vld [vmem:[%s8554_s1 + $0x170] sm:$0xff]  ;;  %4893 = vmatprep.subr.bf16.mxu0 %v4892_v5  ;;  %v107_v26 = vld [vmem:[%s8553_s0 + $0x88] sm:$0xff]  ;;  %v4902_v39 = vpack.c.bf16 %v6020_v17, %v6015_v16 }
  0x3c   :  { %4923 = vmatpush3.bf16.msra.mxu1 %v4922_v4  ;;  %v6040_v24 = vld [vmem:[%s8554_s1 + $0x178] sm:$0xff]  ;;  %v123_v28 = vld [vmem:[%s8553_s0 + $0x108] sm:$0xff]  ;;  %v353_v31 = vadd.f32 %v107_v26, %v91_v25  ;;  %v4932_v46 = vpack.c.bf16 %v6030_v20, %v6025_v19 }
  0x3d   :  { %4925 = vmatprep.subr.bf16.mxu1 %v4924_v9  ;;  %v139_v29 = vld [vmem:[%s8553_s0 + $0x188] sm:$0xff]  ;;  %v4934_v47 = vpack.c.bf16 %v6040_v24, %v6035_v21  ;;  %v106_v24 = vld [vmem:[%s8553_s0 + $0x80] sm:$0xff] }
  0x3e   :  { %v155_v30 = vld [vmem:[%s8553_s0 + $0x208] sm:$0xff]  ;;  %v465_v38 = vadd.f32 %v139_v29, %v123_v28  ;;  %4895 = vmatpush3.bf16.msra.mxu0 %v4894_v18  ;;  %v354_v43 = vrot.slane %v353_v31, 4 }
  0x3f   :  { %v171_v35 = vld [vmem:[%s8553_s0 + $0x288] sm:$0xff]  ;;  %4897 = vmatprep.subr.bf16.mxu0 %v4896_v23  ;;  %v90_v23 = vld [vmem:[%s8553_s0] sm:$0xff] }
  0x40   :  { %v187_v36 = vld [vmem:[%s8553_s0 + $0x308] sm:$0xff]  ;;  %v577_v44 = vadd.f32 %v171_v35, %v155_v30  ;;  %4927 = vmatpush3.bf16.msra.mxu1 %v4926_v22  ;;  %v466_v51 = vrot.slane %v465_v38, 4  ;;  %v355_v55 = vadd.f32 %v354_v43, %v353_v31 }
  0x41   :  { %v203_v37 = vld [vmem:[%s8553_s0 + $0x388] sm:$0xff]  ;;  %4929 = vmatprep.subr.bf16.mxu1 %v4928_v27 }
  0x42   :  { %v219_v40 = vld [vmem:[%s8553_s0 + $0x408] sm:$0xff]  ;;  %v689_v45 = vadd.f32 %v203_v37, %v187_v36  ;;  %v578_v56 = vrot.slane %v577_v44, 4  ;;  %v467_v59 = vadd.f32 %v466_v51, %v465_v38  ;;  %4899 = vmatpush3.bf16.msra.mxu0 %v4898_v32  ;;  %v356_v63 = vrot.slane %v355_v55, 2  ;;  %v154_v38 = vld [vmem:[%s8553_s0 + $0x200] sm:$0xff] }
  0x43   :  { %v235_v41 = vld [vmem:[%s8553_s0 + $0x488] sm:$0xff]  ;;  %4901 = vmatprep.subr.bf16.mxu0 %v4900_v34  ;;  %v138_v34 = vld [vmem:[%s8553_s0 + $0x180] sm:$0xff] }
  0x44   :  { %v251_v42 = vld [vmem:[%s8553_s0 + $0x508] sm:$0xff]  ;;  %v801_v52 = vadd.f32 %v235_v41, %v219_v40  ;;  %v690_v57 = vrot.slane %v689_v45, 4  ;;  %v579_v0 = vadd.f32 %v578_v56, %v577_v44  ;;  %4931 = vmatpush3.bf16.msra.mxu1 %v4930_v33  ;;  %v468_v3 = vrot.slane %v467_v59, 2  ;;  %v122_v33 = vld [vmem:[%s8553_s0 + $0x100] sm:$0xff] }
  0x45   :  { %v267_v48 = vld [vmem:[%s8553_s0 + $0x588] sm:$0xff]  ;;  %4933 = vmatprep.subr.bf16.mxu1 %v4932_v46  ;;  %v357_v7 = vadd.f32 %v356_v63, %v355_v55  ;;  %v346_v40 = vadd.f32 %v106_v24, %v90_v23  ;;  %v202_v46 = vld [vmem:[%s8553_s0 + $0x380] sm:$0xff] }
  0x46   :  { %v283_v49 = vld [vmem:[%s8553_s0 + $0x608] sm:$0xff]  ;;  %v913_v58 = vadd.f32 %v267_v48, %v251_v42  ;;  %v802_v60 = vrot.slane %v801_v52, 4  ;;  %v691_v1 = vadd.f32 %v690_v57, %v689_v45  ;;  %v580_v8 = vrot.slane %v579_v0, 2  ;;  %4903 = vmatpush3.bf16.msra.mxu0 %v4902_v39  ;;  %v170_v39 = vld [vmem:[%s8553_s0 + $0x280] sm:$0xff] }
  0x47   :  { %v299_v50 = vld [vmem:[%s8553_s0 + $0x688] sm:$0xff]  ;;  %v469_v11 = vadd.f32 %v468_v3, %v467_v59  ;;  %v358_v15 = vrot.slane %v357_v7, 1  ;;  %v186_v45 = vld [vmem:[%s8553_s0 + $0x300] sm:$0xff] }
  0x48   :  { %v315_v53 = vld [vmem:[%s8553_s0 + $0x708] sm:$0xff]  ;;  %v1025_v61 = vadd.f32 %v299_v50, %v283_v49  ;;  %v914_v2 = vrot.slane %v913_v58, 4  ;;  %v803_v4 = vadd.f32 %v802_v60, %v801_v52  ;;  %v692_v9 = vrot.slane %v691_v1, 2  ;;  %4935 = vmatpush3.bf16.msra.mxu1 %v4934_v47  ;;  %v218_v47 = vld [vmem:[%s8553_s0 + $0x400] sm:$0xff] }
  0x49   :  { %v331_v54 = vld [vmem:[%s8553_s0 + $0x788] sm:$0xff]  ;;  %v581_v16 = vadd.f32 %v580_v8, %v579_v0  ;;  %v470_v19 = vrot.slane %v469_v11, 1  ;;  %v359_v25 = vadd.f32 %v358_v15, %v357_v7  ;;  %v234_v50 = vld [vmem:[%s8553_s0 + $0x480] sm:$0xff] }
  0x4a   :  { %v1137_v62 = vadd.f32 %v331_v54, %v315_v53  ;;  %v1026_v5 = vrot.slane %v1025_v61, 4  ;;  %v915_v10 = vadd.f32 %v914_v2, %v913_v58  ;;  %v804_v12 = vrot.slane %v803_v4, 2  ;;  %v250_v51 = vld [vmem:[%s8553_s0 + $0x500] sm:$0xff] }
  0x4b   :  { %v693_v17 = vadd.f32 %v692_v9, %v691_v1  ;;  %v582_v26 = vrot.slane %v581_v16, 1  ;;  %v471_v29 = vadd.f32 %v470_v19, %v469_v11  ;;  %v266_v52 = vld [vmem:[%s8553_s0 + $0x580] sm:$0xff]  ;;  %v347_v53 = vrot.slane %v346_v40, 4 }
  0x4c   :  { %v1138_v6 = vrot.slane %v1137_v62, 4  ;;  %v1027_v13 = vadd.f32 %v1026_v5, %v1025_v61  ;;  %v916_v18 = vrot.slane %v915_v10, 2  ;;  %v805_v20 = vadd.f32 %v804_v12, %v803_v4  ;;  %v282_v4 = vld [vmem:[%s8553_s0 + $0x600] sm:$0xff] }
  0x4d   :  { %v694_v27 = vrot.slane %v693_v17, 1  ;;  %v583_v35 = vadd.f32 %v582_v26, %v581_v16  ;;  %v1384_v44 = vsel %vm1370_vm0, %v471_v29, %v359_v25  ;;  %v458_v54 = vadd.f32 %v138_v34, %v122_v33  ;;  %v298_v5 = vld [vmem:[%s8553_s0 + $0x680] sm:$0xff] }
  0x4e   :  { %v1139_v14 = vadd.f32 %v1138_v6, %v1137_v62  ;;  %v1028_v21 = vrot.slane %v1027_v13, 2  ;;  %v917_v28 = vadd.f32 %v916_v18, %v915_v10  ;;  %v806_v30 = vrot.slane %v805_v20, 1  ;;  %v314_v10 = vld [vmem:[%s8553_s0 + $0x700] sm:$0xff] }
  0x4f   :  { %v695_v36 = vadd.f32 %v694_v27, %v693_v17  ;;  %v1385_v49 = vsel %vm1372_vm1, %v583_v35, %v1384_v44  ;;  %v570_v58 = vadd.f32 %v170_v39, %v154_v38  ;;  %v348_v60 = vadd.f32 %v347_v53, %v346_v40  ;;  %v330_v11 = vld [vmem:[%s8553_s0 + $0x780] sm:$0xff]  ;;  %v157_v53 = vld [vmem:[%s8553_s0 + $0x218] sm:$0xff] }
  0x50   :  { %v1140_v22 = vrot.slane %v1139_v14, 2  ;;  %v1029_v31 = vadd.f32 %v1028_v21, %v1027_v13  ;;  %v918_v37 = vrot.slane %v917_v28, 1  ;;  %v807_v41 = vadd.f32 %v806_v30, %v805_v20 }
  0x51   :  { %v1386_v57 = vsel %vm1374_vm2, %v695_v36, %v1385_v49  ;;  %v459_v61 = vrot.slane %v458_v54, 4  ;;  %v682_v62 = vadd.f32 %v202_v46, %v186_v45  ;;  %v571_v0 = vrot.slane %v570_v58, 4 }
  0x52   :  { %v1141_v32 = vadd.f32 %v1140_v22, %v1139_v14  ;;  %v1030_v42 = vrot.slane %v1029_v31, 1  ;;  %v919_v48 = vadd.f32 %v918_v37, %v917_v28  ;;  %v1387_v59 = vsel %vm1376_vm3, %v807_v41, %v1386_v57  ;;  %v93_v41 = vld [vmem:[%s8553_s0 + $0x18] sm:$0xff] }
  0x53   :  { %v794_v1 = vadd.f32 %v234_v50, %v218_v47  ;;  %v906_v2 = vadd.f32 %v266_v52, %v250_v51  ;;  %v349_v6 = vrot.slane %v348_v60, 2  ;;  %v460_v7 = vadd.f32 %v459_v61, %v458_v54  ;;  %v125_v51 = vld [vmem:[%s8553_s0 + $0x118] sm:$0xff] }
  0x54   :  { %v1142_v43 = vrot.slane %v1141_v32, 1  ;;  %v1031_v55 = vadd.f32 %v1030_v42, %v1029_v31  ;;  %v1388_v63 = vsel %vm1378_vm4, %v919_v48, %v1387_v59  ;;  %v683_v8 = vrot.slane %v682_v62, 4  ;;  %v1652_v31 = vld [vmem:[%s8554_s1 + $0x280] sm:$0xff]  ;;  %v109_v42 = vld [vmem:[%s8553_s0 + $0x98] sm:$0xff] }
  0x55   :  { %v572_v12 = vadd.f32 %v571_v0, %v570_v58  ;;  %v795_v13 = vrot.slane %v794_v1, 4  ;;  %v907_v14 = vrot.slane %v906_v2, 4  ;;  %v350_v16 = vadd.f32 %v349_v6, %v348_v60  ;;  %v141_v52 = vld [vmem:[%s8553_s0 + $0x198] sm:$0xff] }
  0x56   :  { %v1143_v56 = vadd.f32 %v1142_v43, %v1141_v32  ;;  %v1389_v3 = vsel %vm1380_vm5, %v1031_v55, %v1388_v63  ;;  %v461_v17 = vrot.slane %v460_v7, 2  ;;  %v684_v18 = vadd.f32 %v683_v8, %v682_v62  ;;  %v1653_v32 = vld [vmem:[%s8554_s1 + $0x288] sm:$0xff]  ;;  %v173_v57 = vld [vmem:[%s8553_s0 + $0x298] sm:$0xff] }
  0x57   :  { %v573_v19 = vrot.slane %v572_v12, 2  ;;  %v796_v20 = vadd.f32 %v795_v13, %v794_v1  ;;  %v908_v21 = vadd.f32 %v907_v14, %v906_v2  ;;  %v1018_v22 = vadd.f32 %v298_v5, %v282_v4  ;;  %v189_v58 = vld [vmem:[%s8553_s0 + $0x318] sm:$0xff] }
  0x58   :  { %v1390_v9 = vsel %vm1382_vm6, %v1143_v56, %v1389_v3  ;;  %v351_v23 = vrot.slane %v350_v16, 1  ;;  %v462_v24 = vadd.f32 %v461_v17, %v460_v7  ;;  %v685_v25 = vrot.slane %v684_v18, 2  ;;  %v205_v59 = vld [vmem:[%s8553_s0 + $0x398] sm:$0xff] }
  0x59   :  { %v6156_v15 = vmul.f32 0.0625, %v1390_v9  ;;  %v1130_v26 = vadd.f32 %v330_v11, %v314_v10  ;;  %v574_v27 = vadd.f32 %v573_v19, %v572_v12  ;;  %v797_v28 = vrot.slane %v796_v20, 2  ;;  %v221_v3 = vld [vmem:[%s8553_s0 + $0x418] sm:$0xff] }
  0x5a   :  { %v909_v29 = vrot.slane %v908_v21, 2  ;;  %v1019_v30 = vrot.slane %v1018_v22, 4  ;;  %v352_v33 = vadd.f32 %v351_v23, %v350_v16  ;;  %v463_v34 = vrot.slane %v462_v24, 1  ;;  %v237_v4 = vld [vmem:[%s8553_s0 + $0x498] sm:$0xff] }
  0x5b   :  { %8595 = vst [vmem:[#allocation9_spill] sm:$0xff] %v6156_v15  ;;  %1899 = vmatprep.mubr.f32.mxu0 %v6156_v15  ;;  %v686_v35 = vadd.f32 %v685_v25, %v684_v18  ;;  %v1131_v36 = vrot.slane %v1130_v26, 4  ;;  %v575_v37 = vrot.slane %v574_v27, 1  ;;  %v798_v38 = vadd.f32 %v797_v28, %v796_v20  ;;  %v253_v9 = vld [vmem:[%s8553_s0 + $0x518] sm:$0xff] }
  0x5c   :  { %v910_v39 = vadd.f32 %v909_v29, %v908_v21  ;;  %v1020_v40 = vadd.f32 %v1019_v30, %v1018_v22  ;;  %v464_v43 = vadd.f32 %v463_v34, %v462_v24  ;;  %v4936_v46 = vpack.c.bf16 %v1653_v32, %v1652_v31  ;;  %v269_v10 = vld [vmem:[%s8553_s0 + $0x598] sm:$0xff] }
  0x5d   :  { %v687_v44 = vrot.slane %v686_v35, 1  ;;  %v1132_v45 = vadd.f32 %v1131_v36, %v1130_v26  ;;  %v576_v47 = vadd.f32 %v575_v37, %v574_v27  ;;  %v799_v48 = vrot.slane %v798_v38, 1  ;;  %v285_v27 = vld [vmem:[%s8553_s0 + $0x618] sm:$0xff] }
  0x5e   :  { %v911_v49 = vrot.slane %v910_v39, 1  ;;  %v1021_v50 = vrot.slane %v1020_v40, 2  ;;  %v1371_v56 = vsel %vm1370_vm0, %v464_v43, %v352_v33  ;;  %4937 = vmatprep.subr.bf16.mxu0 %v4936_v46  ;;  %v367_v60 = vadd.f32 %v109_v42, %v93_v41  ;;  %v301_v28 = vld [vmem:[%s8553_s0 + $0x698] sm:$0xff] }
  0x5f   :  { %v688_v54 = vadd.f32 %v687_v44, %v686_v35  ;;  %v1133_v55 = vrot.slane %v1132_v45, 2  ;;  %v800_v61 = vadd.f32 %v799_v48, %v798_v38  ;;  %v1373_v0 = vsel %vm1372_vm1, %v576_v47, %v1371_v56  ;;  %v317_v33 = vld [vmem:[%s8553_s0 + $0x718] sm:$0xff] }
  0x60   :  { %v912_v62 = vadd.f32 %v911_v49, %v910_v39  ;;  %v1022_v63 = vadd.f32 %v1021_v50, %v1020_v40  ;;  %v368_v5 = vrot.slane %v367_v60, 4  ;;  %v479_v6 = vadd.f32 %v141_v52, %v125_v51  ;;  %v333_v34 = vld [vmem:[%s8553_s0 + $0x798] sm:$0xff]  ;;  %v1636_v50 = vld [vmem:[%s8554_s1 + $0x200] sm:$0xff]  ;;  %v1637_v51 = vld [vmem:[%s8554_s1 + $0x208] sm:$0xff] }
  0x61   :  { %v1134_v1 = vadd.f32 %v1133_v55, %v1132_v45  ;;  %v1375_v2 = vsel %vm1374_vm2, %v688_v54, %v1373_v0  ;;  %v591_v11 = vadd.f32 %v173_v57, %v157_v53  ;;  %v703_v12 = vadd.f32 %v205_v59, %v189_v58 }
  0x62   :  { %v1023_v7 = vrot.slane %v1022_v63, 1  ;;  %v1377_v8 = vsel %vm1376_vm3, %v800_v61, %v1375_v2  ;;  %v369_v16 = vadd.f32 %v368_v5, %v367_v60  ;;  %v480_v17 = vrot.slane %v479_v6, 4  ;;  %v1684_v60 = vld [vmem:[%s8554_s1 + $0x380] sm:$0xff]  ;;  %v1685_v61 = vld [vmem:[%s8554_s1 + $0x388] sm:$0xff]  ;;  %v92_v2 = vld [vmem:[%s8553_s0 + $0x10] sm:$0xff] }
  0x63   :  { %v1135_v13 = vrot.slane %v1134_v1, 1  ;;  %v1379_v14 = vsel %vm1378_vm4, %v912_v62, %v1377_v8  ;;  %v592_v19 = vrot.slane %v591_v11, 4  ;;  %v704_v20 = vrot.slane %v703_v12, 4  ;;  %v124_v8 = vld [vmem:[%s8553_s0 + $0x110] sm:$0xff] }
  0x64   :  { %v1024_v18 = vadd.f32 %v1023_v7, %v1022_v63  ;;  %v815_v21 = vadd.f32 %v237_v4, %v221_v3  ;;  %v370_v23 = vrot.slane %v369_v16, 2  ;;  %v481_v24 = vadd.f32 %v480_v17, %v479_v6  ;;  %v108_v3 = vld [vmem:[%s8553_s0 + $0x90] sm:$0xff] }
  0x65   :  { %v1136_v22 = vadd.f32 %v1135_v13, %v1134_v1  ;;  %v927_v25 = vadd.f32 %v269_v10, %v253_v9  ;;  %v593_v29 = vadd.f32 %v592_v19, %v591_v11  ;;  %v705_v30 = vadd.f32 %v704_v20, %v703_v12  ;;  %v140_v9 = vld [vmem:[%s8553_s0 + $0x190] sm:$0xff] }
  0x66   :  { %v1381_v26 = vsel %vm1380_vm5, %v1024_v18, %v1379_v14  ;;  %v816_v31 = vrot.slane %v815_v21, 4  ;;  %v371_v35 = vadd.f32 %v370_v23, %v369_v16  ;;  %v482_v36 = vrot.slane %v481_v24, 2  ;;  %v156_v14 = vld [vmem:[%s8553_s0 + $0x210] sm:$0xff] }
  0x67   :  { %v1383_v32 = vsel %vm1382_vm6, %v1136_v22, %v1381_v26  ;;  %v928_v37 = vrot.slane %v927_v25, 4  ;;  %v594_v39 = vrot.slane %v593_v29, 2  ;;  %v706_v40 = vrot.slane %v705_v30, 2  ;;  %v172_v16 = vld [vmem:[%s8553_s0 + $0x290] sm:$0xff] }
  0x68   :  { %v6220_v38 = vmul.f32 0.0625, %v1383_v32  ;;  %v817_v41 = vadd.f32 %v816_v31, %v815_v21  ;;  %v372_v42 = vrot.slane %v371_v35, 1  ;;  %v483_v43 = vadd.f32 %v482_v36, %v481_v24  ;;  %v188_v20 = vld [vmem:[%s8553_s0 + $0x310] sm:$0xff] }
  0x69   :  { %v929_v44 = vadd.f32 %v928_v37, %v927_v25  ;;  %v1039_v45 = vadd.f32 %v301_v28, %v285_v27  ;;  %v595_v46 = vadd.f32 %v594_v39, %v593_v29  ;;  %v707_v47 = vadd.f32 %v706_v40, %v705_v30  ;;  %v204_v21 = vld [vmem:[%s8553_s0 + $0x390] sm:$0xff] }
  0x6a   :  { %8596 = vst [vmem:[#allocation10_spill] sm:$0xff] %v6220_v38  ;;  %1900 = vmatmul.mubr.f32.vlgmr.msra.gmra.mrb[0].mxu0 %v6220_v38  ;;  %v818_v48 = vrot.slane %v817_v41, 2  ;;  %v1151_v49 = vadd.f32 %v333_v34, %v317_v33  ;;  %v373_v52 = vadd.f32 %v372_v42, %v371_v35  ;;  %v484_v53 = vrot.slane %v483_v43, 1  ;;  %v220_v26 = vld [vmem:[%s8553_s0 + $0x410] sm:$0xff]  ;;  %v303_v38 = vld [vmem:[%s8553_s0 + $0x6a8] sm:$0xff] }
  0x6b   :  { %v930_v54 = vrot.slane %v929_v44, 2  ;;  %v1040_v55 = vrot.slane %v1039_v45, 4  ;;  %v596_v56 = vrot.slane %v595_v46, 1  ;;  %v708_v57 = vrot.slane %v707_v47, 1  ;;  %v236_v27 = vld [vmem:[%s8553_s0 + $0x490] sm:$0xff] }
  0x6c   :  { %v819_v58 = vadd.f32 %v818_v48, %v817_v41  ;;  %v1152_v59 = vrot.slane %v1151_v49, 4  ;;  %v485_v62 = vadd.f32 %v484_v53, %v483_v43  ;;  %v4938_v1 = vpack.c.bf16 %v1637_v51, %v1636_v50  ;;  %v252_v31 = vld [vmem:[%s8553_s0 + $0x510] sm:$0xff] }
  0x6d   :  { %v931_v63 = vadd.f32 %v930_v54, %v929_v44  ;;  %v1041_v0 = vadd.f32 %v1040_v55, %v1039_v45  ;;  %v597_v4 = vadd.f32 %v596_v56, %v595_v46  ;;  %v709_v5 = vadd.f32 %v708_v57, %v707_v47  ;;  %v268_v32 = vld [vmem:[%s8553_s0 + $0x590] sm:$0xff] }
  0x6e   :  { %v820_v6 = vrot.slane %v819_v58, 1  ;;  %v1153_v7 = vadd.f32 %v1152_v59, %v1151_v49  ;;  %v1398_v12 = vsel %vm1370_vm0, %v485_v62, %v373_v52  ;;  %4939 = vmatpush3.bf16.msra.mxu0 %v4938_v1  ;;  %v4968_v13 = vpack.c.bf16 %v1685_v61, %v1684_v60  ;;  %v284_v53 = vld [vmem:[%s8553_s0 + $0x610] sm:$0xff] }
  0x6f   :  { %v932_v10 = vrot.slane %v931_v63, 1  ;;  %v1042_v11 = vrot.slane %v1041_v0, 2  ;;  %v1399_v19 = vsel %vm1372_vm1, %v597_v4, %v1398_v12  ;;  %v360_v22 = vadd.f32 %v108_v3, %v92_v2  ;;  %v300_v54 = vld [vmem:[%s8553_s0 + $0x690] sm:$0xff]  ;;  %v6296_v12 = vld [vmem:[%s8554_s1 + $0x300] sm:$0xff] }
  0x70   :  { %v821_v17 = vadd.f32 %v820_v6, %v819_v58  ;;  %v1154_v18 = vrot.slane %v1153_v7, 2  ;;  %v1400_v25 = vsel %vm1374_vm2, %v709_v5, %v1399_v19  ;;  %4969 = vmatprep.subr.bf16.mxu1 %v4968_v13  ;;  %v472_v28 = vadd.f32 %v140_v9, %v124_v8  ;;  %v316_v59 = vld [vmem:[%s8553_s0 + $0x710] sm:$0xff]  ;;  %v6301_v13 = vld [vmem:[%s8554_s1 + $0x308] sm:$0xff] }
  0x71   :  { %v933_v23 = vadd.f32 %v932_v10, %v931_v63  ;;  %v1043_v24 = vadd.f32 %v1042_v11, %v1041_v0  ;;  %v361_v33 = vrot.slane %v360_v22, 4  ;;  %v584_v34 = vadd.f32 %v172_v16, %v156_v14  ;;  %v332_v60 = vld [vmem:[%s8553_s0 + $0x790] sm:$0xff] }
  0x72   :  { %v1155_v29 = vadd.f32 %v1154_v18, %v1153_v7  ;;  %v1401_v30 = vsel %vm1376_vm3, %v821_v17, %v1400_v25  ;;  %v473_v37 = vrot.slane %v472_v28, 4  ;;  %v696_v39 = vadd.f32 %v204_v21, %v188_v20  ;;  %v1654_v14 = vld [vmem:[%s8554_s1 + $0x290] sm:$0xff]  ;;  %v1655_v20 = vld [vmem:[%s8554_s1 + $0x298] sm:$0xff] }
  0x73   :  { %v1044_v35 = vrot.slane %v1043_v24, 1  ;;  %v1402_v36 = vsel %vm1378_vm4, %v933_v23, %v1401_v30  ;;  %v362_v41 = vadd.f32 %v361_v33, %v360_v22  ;;  %v585_v42 = vrot.slane %v584_v34, 4  ;;  %v1638_v21 = vld [vmem:[%s8554_s1 + $0x210] sm:$0xff]  ;;  %v1639_v22 = vld [vmem:[%s8554_s1 + $0x218] sm:$0xff] }
  0x74   :  { %v1156_v40 = vrot.slane %v1155_v29, 1  ;;  %v808_v43 = vadd.f32 %v236_v27, %v220_v26  ;;  %v474_v45 = vadd.f32 %v473_v37, %v472_v28  ;;  %v697_v46 = vrot.slane %v696_v39, 4  ;;  %v6318_v27 = vld [vmem:[%s8554_s1 + $0x390] sm:$0xff]  ;;  %v6323_v28 = vld [vmem:[%s8554_s1 + $0x398] sm:$0xff]  ;;  %v6350_v37 = vld [vmem:[%s8554_s1 + $0x220] sm:$0xff] }
  0x75   :  { %v1045_v44 = vadd.f32 %v1044_v35, %v1043_v24  ;;  %v920_v47 = vadd.f32 %v268_v32, %v252_v31  ;;  %v363_v49 = vrot.slane %v362_v41, 2  ;;  %v586_v50 = vadd.f32 %v585_v42, %v584_v34  ;;  %v6333_v30 = vld [vmem:[%s8554_s1 + $0x318] sm:$0xff]  ;;  %v6340_v35 = vld [vmem:[%s8554_s1 + $0x2a0] sm:$0xff]  ;;  %v255_v34 = vld [vmem:[%s8553_s0 + $0x528] sm:$0xff] }
  0x76   :  { %v1157_v48 = vadd.f32 %v1156_v40, %v1155_v29  ;;  %v809_v51 = vrot.slane %v808_v43, 4  ;;  %v475_v55 = vrot.slane %v474_v45, 2  ;;  %v698_v56 = vadd.f32 %v697_v46, %v696_v39  ;;  %v6328_v29 = vld [vmem:[%s8554_s1 + $0x310] sm:$0xff]  ;;  %v6355_v39 = vld [vmem:[%s8554_s1 + $0x228] sm:$0xff]  ;;  %v6371_v46 = vld [vmem:[%s8554_s1 + $0x320] sm:$0xff] }
  0x77   :  { %v1403_v52 = vsel %vm1380_vm5, %v1045_v44, %v1402_v36  ;;  %v921_v57 = vrot.slane %v920_v47, 4  ;;  %v364_v61 = vadd.f32 %v363_v49, %v362_v41  ;;  %v587_v62 = vrot.slane %v586_v50, 2  ;;  %v6345_v36 = vld [vmem:[%s8554_s1 + $0x2a8] sm:$0xff]  ;;  %v6361_v44 = vld [vmem:[%s8554_s1 + $0x3a0] sm:$0xff]  ;;  %v6386_v49 = vld [vmem:[%s8554_s1 + $0x2b8] sm:$0xff] }
  0x78   :  { %v1404_v58 = vsel %vm1382_vm6, %v1157_v48, %v1403_v52  ;;  %v810_v63 = vadd.f32 %v809_v51, %v808_v43  ;;  %v476_v1 = vadd.f32 %v475_v55, %v474_v45  ;;  %v699_v2 = vrot.slane %v698_v56, 2  ;;  %v6366_v45 = vld [vmem:[%s8554_s1 + $0x3a8] sm:$0xff]  ;;  %v6381_v48 = vld [vmem:[%s8554_s1 + $0x2b0] sm:$0xff]  ;;  %v6397_v55 = vld [vmem:[%s8554_s1 + $0x238] sm:$0xff] }
  0x79   :  { %v6290_v0 = vmul.f32 0.0625, %v1404_v58  ;;  %v922_v3 = vadd.f32 %v921_v57, %v920_v47  ;;  %v365_v4 = vrot.slane %v364_v61, 1  ;;  %v588_v5 = vadd.f32 %v587_v62, %v586_v50  ;;  %v6376_v47 = vld [vmem:[%s8554_s1 + $0x328] sm:$0xff]  ;;  %v6407_v57 = vld [vmem:[%s8554_s1 + $0x3b8] sm:$0xff]  ;;  %v6412_v58 = vld [vmem:[%s8554_s1 + $0x330] sm:$0xff] }
  0x7a   :  { %v811_v6 = vrot.slane %v810_v63, 2  ;;  %v1032_v7 = vadd.f32 %v300_v54, %v284_v53  ;;  %v477_v8 = vrot.slane %v476_v1, 1  ;;  %v700_v9 = vadd.f32 %v699_v2, %v698_v56  ;;  %v6392_v54 = vld [vmem:[%s8554_s1 + $0x230] sm:$0xff]  ;;  %v6428_v2 = vld [vmem:[%s8554_s1 + $0x2c8] sm:$0xff] }
  0x7b   :  { %8597 = vst [vmem:[#allocation11_spill] sm:$0xff] %v6290_v0  ;;  %1969 = vmatprep.mubr.f32.mxu1 %v6290_v0  ;;  %v923_v10 = vrot.slane %v922_v3, 2  ;;  %v1144_v11 = vadd.f32 %v332_v60, %v316_v59  ;;  %v366_v16 = vadd.f32 %v365_v4, %v364_v61  ;;  %v589_v17 = vrot.slane %v588_v5, 1  ;;  %v6402_v56 = vld [vmem:[%s8554_s1 + $0x3b0] sm:$0xff]  ;;  %v6417_v59 = vld [vmem:[%s8554_s1 + $0x338] sm:$0xff]  ;;  %v6438_v4 = vld [vmem:[%s8554_s1 + $0x248] sm:$0xff] }
  0x7c   :  { %v812_v18 = vadd.f32 %v811_v6, %v810_v63  ;;  %v1033_v19 = vrot.slane %v1032_v7, 4  ;;  %v478_v23 = vadd.f32 %v477_v8, %v476_v1  ;;  %v701_v24 = vrot.slane %v700_v9, 1  ;;  %v6423_v1 = vld [vmem:[%s8554_s1 + $0x2c0] sm:$0xff]  ;;  %v6448_v6 = vld [vmem:[%s8554_s1 + $0x3c8] sm:$0xff] }
  0x7d   :  { %v924_v25 = vadd.f32 %v923_v10, %v922_v3  ;;  %v1145_v26 = vrot.slane %v1144_v11, 4  ;;  %v590_v31 = vadd.f32 %v589_v17, %v588_v5  ;;  %v4940_v53 = vpack.c.bf16 %v1655_v20, %v1654_v14  ;;  %v6433_v3 = vld [vmem:[%s8554_s1 + $0x240] sm:$0xff]  ;;  %v6463_v14 = vld [vmem:[%s8554_s1 + $0x348] sm:$0xff]  ;;  %v6473_v17 = vld [vmem:[%s8554_s1 + $0x2d8] sm:$0xff] }
  0x7e   :  { %v813_v32 = vrot.slane %v812_v18, 1  ;;  %v1034_v33 = vadd.f32 %v1033_v19, %v1032_v7  ;;  %v702_v40 = vadd.f32 %v701_v24, %v700_v9  ;;  %v1391_v43 = vsel %vm1370_vm0, %v478_v23, %v366_v16  ;;  %v6443_v5 = vld [vmem:[%s8554_s1 + $0x3c0] sm:$0xff]  ;;  %v6468_v16 = vld [vmem:[%s8554_s1 + $0x2d0] sm:$0xff]  ;;  %v6483_v19 = vld [vmem:[%s8554_s1 + $0x258] sm:$0xff] }
  0x7f   :  { %v925_v41 = vrot.slane %v924_v25, 1  ;;  %v1146_v42 = vadd.f32 %v1145_v26, %v1144_v11  ;;  %v1392_v52 = vsel %vm1372_vm1, %v590_v31, %v1391_v43  ;;  %v4942_v63 = vpack.c.bf16 %v1639_v22, %v1638_v21  ;;  %4941 = vmatprep.subr.bf16.mxu0 %v4940_v53  ;;  %v6458_v11 = vld [vmem:[%s8554_s1 + $0x340] sm:$0xff]  ;;  %v6493_v24 = vld [vmem:[%s8554_s1 + $0x3d0] sm:$0xff]  ;;  %v6508_v31 = vld [vmem:[%s8554_s1 + $0x358] sm:$0xff] }
  0x80   :  { %v814_v50 = vadd.f32 %v813_v32, %v812_v18  ;;  %v1035_v51 = vrot.slane %v1034_v33, 2  ;;  %v1393_v62 = vsel %vm1374_vm2, %v702_v40, %v1392_v52  ;;  %v6478_v18 = vld [vmem:[%s8554_s1 + $0x250] sm:$0xff]  ;;  %v4944_v22 = vpack.c.bf16 %v6345_v36, %v6340_v35  ;;  %v6513_v32 = vld [vmem:[%s8554_s1 + $0x2e0] sm:$0xff]  ;;  %v6544_v43 = vld [vmem:[%s8554_s1 + $0x3e8] sm:$0xff] }
  0x81   :  { %v926_v60 = vadd.f32 %v925_v41, %v924_v25  ;;  %v1147_v61 = vrot.slane %v1146_v42, 2  ;;  %4943 = vmatpush3.bf16.msra.mxu0 %v4942_v63  ;;  %v4946_v23 = vpack.c.bf16 %v6355_v39, %v6350_v37  ;;  %v6498_v25 = vld [vmem:[%s8554_s1 + $0x3d8] sm:$0xff]  ;;  %v6503_v26 = vld [vmem:[%s8554_s1 + $0x350] sm:$0xff]  ;;  %v4948_v39 = vpack.c.bf16 %v6386_v49, %v6381_v48  ;;  %v6529_v40 = vld [vmem:[%s8554_s1 + $0x260] sm:$0xff]  ;;  %8599 = vst [vmem:[#allocation13_spill] sm:$0xff] %v6544_v43 }
  0x82   :  { %v1036_v7 = vadd.f32 %v1035_v51, %v1034_v33  ;;  %v1394_v8 = vsel %vm1376_vm3, %v814_v50, %v1393_v62  ;;  %v6518_v33 = vld [vmem:[%s8554_s1 + $0x2e8] sm:$0xff]  ;;  %v6549_v48 = vld [vmem:[%s8554_s1 + $0x360] sm:$0xff]  ;;  %4945 = vmatprep.subr.bf16.mxu0 %v4944_v22  ;;  %v4950_v51 = vpack.c.bf16 %v6397_v55, %v6392_v54  ;;  %v6575_v54 = vld [vmem:[%s8554_s1 + $0x270] sm:$0xff]  ;;  %v4952_v22 = vpack.c.bf16 %v6428_v2, %v6423_v1 }
  0x83   :  { %v1148_v20 = vadd.f32 %v1147_v61, %v1146_v42  ;;  %v1395_v21 = vsel %vm1378_vm4, %v926_v60, %v1394_v8  ;;  %v6534_v41 = vld [vmem:[%s8554_s1 + $0x268] sm:$0xff]  ;;  %v6539_v42 = vld [vmem:[%s8554_s1 + $0x3e0] sm:$0xff]  ;;  %8600 = vst [vmem:[#allocation14_spill] sm:$0xff] %v6549_v48  ;;  %v6565_v60 = vld [vmem:[%s8554_s1 + $0x2f0] sm:$0xff]  ;;  %v4954_v53 = vpack.c.bf16 %v6438_v4, %v6433_v3  ;;  %v8608_v43 = vpack.c.bf16 %v6323_v28, %v6318_v27 }
  0x84   :  { %v1037_v35 = vrot.slane %v1036_v7, 1  ;;  %8598 = vst [vmem:[#allocation12_spill] sm:$0xff] %v6539_v42  ;;  %v6554_v49 = vld [vmem:[%s8554_s1 + $0x368] sm:$0xff]  ;;  %v6570_v61 = vld [vmem:[%s8554_s1 + $0x2f8] sm:$0xff]  ;;  %v6585_v62 = vld [vmem:[%s8554_s1 + $0x3f0] sm:$0xff] }
  0x85   :  { %8601 = vst [vmem:[#allocation15_spill] sm:$0xff] %v6554_v49  ;;  %v1149_v50 = vrot.slane %v1148_v20, 1  ;;  %v6580_v55 = vld [vmem:[%s8554_s1 + $0x278] sm:$0xff]  ;;  %8602 = vst [vmem:[#allocation16_spill] sm:$0xff] %v6585_v62  ;;  %v6601_v37 = vld [vmem:[%s8554_s1 + $0x370] sm:$0xff]  ;;  %4947 = vmatpush3.bf16.msra.mxu0 %v4946_v23 }
  0x86   :  { %v6590_v63 = vld [vmem:[%s8554_s1 + $0x3f8] sm:$0xff]  ;;  %v1038_v8 = vadd.f32 %v1037_v35, %v1036_v7  ;;  %8604 = vst [vmem:[#allocation18_spill] sm:$0xff] %v6601_v37  ;;  %v95_v1 = vld [vmem:[%s8553_s0 + $0x28] sm:$0xff]  ;;  %v4956_v35 = vpack.c.bf16 %v6473_v17, %v6468_v16  ;;  %4949 = vmatprep.subr.bf16.mxu0 %v4948_v39 }
  0x87   :  { %8603 = vst [vmem:[#allocation17_spill] sm:$0xff] %v6590_v63  ;;  %v6606_v36 = vld [vmem:[%s8554_s1 + $0x378] sm:$0xff]  ;;  %v111_v2 = vld [vmem:[%s8553_s0 + $0xa8] sm:$0xff]  ;;  %v1150_v4 = vadd.f32 %v1149_v50, %v1148_v20 }
  0x88   :  { %8605 = vst [vmem:[#allocation19_spill] sm:$0xff] %v6606_v36  ;;  %v127_v3 = vld [vmem:[%s8553_s0 + $0x128] sm:$0xff]  ;;  %v1396_v23 = vsel %vm1380_vm5, %v1038_v8, %v1395_v21  ;;  %v381_v16 = vadd.f32 %v111_v2, %v95_v1 }
  0x89   :  { %v143_v10 = vld [vmem:[%s8553_s0 + $0x1a8] sm:$0xff]  ;;  %v1397_v39 = vsel %vm1382_vm6, %v1150_v4, %v1396_v23  ;;  %4951 = vmatpush3.bf16.msra.mxu0 %v4950_v51 }
  0x8a   :  { %v159_v9 = vld [vmem:[%s8553_s0 + $0x228] sm:$0xff]  ;;  %v6664_v23 = vmul.f32 0.0625, %v1397_v39  ;;  %v493_v15 = vadd.f32 %v143_v10, %v127_v3  ;;  %4953 = vmatprep.subr.bf16.mxu0 %v4952_v22  ;;  %v8607_v39 = vpack.c.bf16 %v6301_v13, %v6296_v12  ;;  %v382_v37 = vrot.slane %v381_v16, 4 }
  0x8b   :  { %v175_v20 = vld [vmem:[%s8553_s0 + $0x2a8] sm:$0xff] }
  0x8c   :  { %v191_v7 = vld [vmem:[%s8553_s0 + $0x328] sm:$0xff]  ;;  %8606 = vst [vmem:[#allocation20_spill] sm:$0xff] %v6664_v23  ;;  %v605_v62 = vadd.f32 %v175_v20, %v159_v9  ;;  %1970 = vmatmul.mubr.f32.vlgmr.msra.gmra.mrb[0].mxu1 %v6664_v23  ;;  %v494_v36 = vrot.slane %v493_v15, 4 }
  0x8d   :  { %v207_v52 = vld [vmem:[%s8553_s0 + $0x3a8] sm:$0xff]  ;;  %4971 = vmatpush3.bf16.msra.mxu1 %v8607_v39  ;;  %4955 = vmatpush3.bf16.msra.mxu0 %v4954_v53  ;;  %v8610_v53 = vpack.c.bf16 %v6366_v45, %v6361_v44 }
  0x8e   :  { %v223_v21 = vld [vmem:[%s8553_s0 + $0x428] sm:$0xff]  ;;  %v717_v63 = vadd.f32 %v207_v52, %v191_v7  ;;  %v606_v49 = vrot.slane %v605_v62, 4  ;;  %4973 = vmatprep.subr.bf16.mxu1 %v8608_v43  ;;  %v383_v52 = vadd.f32 %v382_v37, %v381_v16  ;;  %v495_v22 = vadd.f32 %v494_v36, %v493_v15  ;;  %4957 = vmatprep.subr.bf16.mxu0 %v4956_v35 }
  0x8f   :  { %v239_v50 = vld [vmem:[%s8553_s0 + $0x4a8] sm:$0xff]  ;;  %v8612_v35 = vpack.c.bf16 %v6518_v33, %v6513_v32  ;;  %v110_v32 = vld [vmem:[%s8553_s0 + $0xa0] sm:$0xff]  ;;  %v8614_v33 = vpack.c.bf16 %v6407_v57, %v6402_v56  ;;  %v8615_v56 = vpack.c.bf16 %v6534_v41, %v6529_v40  ;;  %v8616_v40 = vpack.c.bf16 %v6570_v61, %v6565_v60 }
  0x90   :  { %v271_v4 = vld [vmem:[%s8553_s0 + $0x5a8] sm:$0xff]  ;;  %v829_v48 = vadd.f32 %v239_v50, %v223_v21  ;;  %v718_v10 = vrot.slane %v717_v63, 4  ;;  %v496_v27 = vrot.slane %v495_v22, 2  ;;  %v254_v61 = vld [vmem:[%s8553_s0 + $0x520] sm:$0xff] }
  0x91   :  { %v287_v0 = vld [vmem:[%s8553_s0 + $0x628] sm:$0xff]  ;;  %v941_v51 = vadd.f32 %v271_v4, %v255_v34  ;;  %v607_v34 = vadd.f32 %v606_v49, %v605_v62 }
  0x92   :  { %v319_v17 = vld [vmem:[%s8553_s0 + $0x728] sm:$0xff]  ;;  %v1053_v42 = vadd.f32 %v303_v38, %v287_v0  ;;  %v830_v9 = vrot.slane %v829_v48, 4  ;;  %v719_v12 = vadd.f32 %v718_v10, %v717_v63  ;;  %v8609_v38 = vpack.c.bf16 %v6333_v30, %v6328_v29  ;;  %v142_v10 = vld [vmem:[%s8553_s0 + $0x1a0] sm:$0xff] }
  0x93   :  { %v335_v8 = vld [vmem:[%s8553_s0 + $0x7a8] sm:$0xff]  ;;  %v942_v1 = vrot.slane %v941_v51, 4  ;;  %v384_v0 = vrot.slane %v383_v52, 2  ;;  %v608_v28 = vrot.slane %v607_v34, 2  ;;  %v497_v63 = vadd.f32 %v496_v27, %v495_v22  ;;  %v174_v22 = vld [vmem:[%s8553_s0 + $0x2a0] sm:$0xff] }
  0x94   :  { %v1165_v2 = vadd.f32 %v335_v8, %v319_v17  ;;  %v1054_v3 = vrot.slane %v1053_v42, 4  ;;  %v831_v13 = vadd.f32 %v830_v9, %v829_v48  ;;  %4975 = vmatpush3.bf16.msra.mxu1 %v8609_v38  ;;  %v720_v15 = vrot.slane %v719_v12, 2  ;;  %v94_v8 = vld [vmem:[%s8553_s0 + $0x20] sm:$0xff] }
  0x95   :  { %v943_v7 = vadd.f32 %v942_v1, %v941_v51  ;;  %4977 = vmatprep.subr.bf16.mxu1 %v8610_v53  ;;  %v8611_v48 = vpack.c.bf16 %v6483_v19, %v6478_v18  ;;  %v385_v62 = vadd.f32 %v384_v0, %v383_v52  ;;  %v609_v29 = vadd.f32 %v608_v28, %v607_v34  ;;  %v126_v51 = vld [vmem:[%s8553_s0 + $0x120] sm:$0xff] }
  0x96   :  { %v1166_v20 = vrot.slane %v1165_v2, 4  ;;  %v1055_v43 = vadd.f32 %v1054_v3, %v1053_v42  ;;  %v832_v36 = vrot.slane %v831_v13, 2  ;;  %v721_v42 = vadd.f32 %v720_v15, %v719_v12  ;;  %v158_v9 = vld [vmem:[%s8553_s0 + $0x220] sm:$0xff] }
  0x97   :  { %v944_v37 = vrot.slane %v943_v7, 2  ;;  %4959 = vmatpush3.bf16.msra.mxu0 %v8611_v48  ;;  %v8613_v17 = vpack.c.bf16 %v6376_v47, %v6371_v46  ;;  %v386_v50 = vrot.slane %v385_v62, 1  ;;  %v498_v21 = vrot.slane %v497_v63, 1  ;;  %v190_v34 = vld [vmem:[%s8553_s0 + $0x320] sm:$0xff] }
  0x98   :  { %v1167_v49 = vadd.f32 %v1166_v20, %v1165_v2  ;;  %v1056_v30 = vrot.slane %v1055_v43, 2  ;;  %4961 = vmatprep.subr.bf16.mxu0 %v8612_v35  ;;  %v833_v16 = vadd.f32 %v832_v36, %v831_v13  ;;  %v610_v18 = vrot.slane %v609_v29, 1  ;;  %v206_v3 = vld [vmem:[%s8553_s0 + $0x3a0] sm:$0xff] }
  0x99   :  { %v945_v44 = vadd.f32 %v944_v37, %v943_v7  ;;  %4979 = vmatpush3.bf16.msra.mxu1 %v8613_v17  ;;  %v722_v4 = vrot.slane %v721_v42, 1  ;;  %v387_v57 = vadd.f32 %v386_v50, %v385_v62  ;;  %v499_v1 = vadd.f32 %v498_v21, %v497_v63  ;;  %v222_v20 = vld [vmem:[%s8553_s0 + $0x420] sm:$0xff] }
  0x9a   :  { %v1168_v45 = vrot.slane %v1167_v49, 2  ;;  %v1057_v19 = vadd.f32 %v1056_v30, %v1055_v43  ;;  %4981 = vmatprep.subr.bf16.mxu1 %v8614_v33  ;;  %v834_v39 = vrot.slane %v833_v16, 1  ;;  %v611_v2 = vadd.f32 %v610_v18, %v609_v29  ;;  %v238_v38 = vld [vmem:[%s8553_s0 + $0x4a0] sm:$0xff] }
  0x9b   :  { %v946_v46 = vrot.slane %v945_v44, 1  ;;  %4963 = vmatpush3.bf16.msra.mxu0 %v8615_v56  ;;  %v723_v41 = vadd.f32 %v722_v4, %v721_v42  ;;  %v8617_v0 = vpack.c.bf16 %v6417_v59, %v6412_v58  ;;  %v1412_v60 = vsel %vm1370_vm0, %v499_v1, %v387_v57  ;;  %v270_v28 = vld [vmem:[%s8553_s0 + $0x5a0] sm:$0xff] }
  0x9c   :  { %v1169_v47 = vadd.f32 %v1168_v45, %v1167_v49  ;;  %v1058_v52 = vrot.slane %v1057_v19, 1  ;;  %4965 = vmatprep.subr.bf16.mxu0 %v8616_v40  ;;  %v835_v12 = vadd.f32 %v834_v39, %v833_v16  ;;  %v374_v43 = vadd.f32 %v110_v32, %v94_v8  ;;  %v286_v50 = vld [vmem:[%s8553_s0 + $0x620] sm:$0xff] }
  0x9d   :  { %v947_v13 = vadd.f32 %v946_v46, %v945_v44  ;;  %4983 = vmatpush3.bf16.msra.mxu1 %v8617_v0  ;;  %v486_v53 = vadd.f32 %v142_v10, %v126_v51  ;;  %v8618_v15 = vpack.c.bf16 %v6448_v6, %v6443_v5  ;;  %v1413_v58 = vsel %vm1372_vm1, %v611_v2, %v1412_v60  ;;  %v8624_v1 = vld [vmem:[#allocation13_spill] sm:$0xff]  ;;  %v8625_v2 = vld [vmem:[#allocation12_spill] sm:$0xff]  ;;  %v8627_v60 = vld [vmem:[#allocation15_spill] sm:$0xff] }
  0x9e   :  { %v1170_v7 = vrot.slane %v1169_v47, 1  ;;  %v1059_v27 = vadd.f32 %v1058_v52, %v1057_v19  ;;  %v598_v59 = vadd.f32 %v174_v22, %v158_v9  ;;  %v710_v37 = vadd.f32 %v206_v3, %v190_v34  ;;  %v1716_v0 = vld [vmem:[%s8554_s1 + $0x480] sm:$0xff] }
  0x9f   :  { %4985 = vmatprep.subr.bf16.mxu1 %v8618_v15  ;;  %v8619_v49 = vpack.c.bf16 %v6580_v55, %v6575_v54  ;;  %v1414_v48 = vsel %vm1374_vm2, %v723_v41, %v1413_v58  ;;  %v375_v62 = vrot.slane %v374_v43, 4  ;;  %v487_v63 = vrot.slane %v486_v53, 4  ;;  %v97_v58 = vld [vmem:[%s8553_s0 + $0x38] sm:$0xff] }
  0xa0   :  { %v1171_v36 = vadd.f32 %v1170_v7, %v1169_v47  ;;  %v822_v29 = vadd.f32 %v238_v38, %v222_v20  ;;  %v1415_v30 = vsel %vm1376_vm3, %v835_v12, %v1414_v48  ;;  %v599_v35 = vrot.slane %v598_v59, 4 }
  0xa1   :  { %4967 = vmatpush3.bf16.msra.mxu0 %v8619_v49  ;;  %v711_v42 = vrot.slane %v710_v37, 4  ;;  %v934_v5 = vadd.f32 %v270_v28, %v254_v61  ;;  %v8620_v6 = vpack.c.bf16 %v6463_v14, %v6458_v11  ;;  %v1416_v16 = vsel %vm1378_vm4, %v947_v13, %v1415_v30  ;;  %v302_v11 = vld [vmem:[%s8553_s0 + $0x6a0] sm:$0xff]  ;;  %v8628_v61 = vld [vmem:[#allocation14_spill] sm:$0xff]  ;;  %v8631_v49 = vld [vmem:[#allocation16_spill] sm:$0xff] }
  0xa2   :  { %v376_v44 = vadd.f32 %v375_v62, %v374_v43  ;;  %v488_v45 = vadd.f32 %v487_v63, %v486_v53  ;;  %v823_v54 = vrot.slane %v822_v29, 4  ;;  %v8621_v55 = vpack.c.bf16 %v6498_v25, %v6493_v24  ;;  %v318_v24 = vld [vmem:[%s8553_s0 + $0x720] sm:$0xff] }
  0xa3   :  { %4987 = vmatpush3.bf16.msra.mxu1 %v8620_v6  ;;  %v1417_v17 = vsel %vm1380_vm5, %v1059_v27, %v1416_v16  ;;  %v600_v14 = vadd.f32 %v599_v35, %v598_v59  ;;  %v712_v21 = vadd.f32 %v711_v42, %v710_v37  ;;  %v935_v18 = vrot.slane %v934_v5, 4  ;;  %v334_v25 = vld [vmem:[%s8553_s0 + $0x7a0] sm:$0xff]  ;;  %v1717_v27 = vld [vmem:[%s8554_s1 + $0x488] sm:$0xff]  ;;  %v113_v59 = vld [vmem:[%s8553_s0 + $0xb8] sm:$0xff] }
  0xa4   :  { %4989 = vmatprep.subr.bf16.mxu1 %v8621_v55  ;;  %v1418_v19 = vsel %vm1382_vm6, %v1171_v36, %v1417_v17  ;;  %v377_v8 = vrot.slane %v376_v44, 2  ;;  %v489_v32 = vrot.slane %v488_v45, 2  ;;  %v824_v33 = vadd.f32 %v823_v54, %v822_v29  ;;  %v8630_v37 = vld [vmem:[#allocation17_spill] sm:$0xff]  ;;  %v129_v35 = vld [vmem:[%s8553_s0 + $0x138] sm:$0xff] }
  0xa5   :  { %v6787_v4 = vmul.f32 0.0625, %v1418_v19  ;;  %v601_v39 = vrot.slane %v600_v14, 2  ;;  %v713_v46 = vrot.slane %v712_v21, 2  ;;  %v936_v47 = vadd.f32 %v935_v18, %v934_v5  ;;  %v145_v42 = vld [vmem:[%s8553_s0 + $0x1b8] sm:$0xff]  ;;  %v8633_v18 = vld [vmem:[#allocation19_spill] sm:$0xff]  ;;  %v8634_v19 = vld [vmem:[#allocation18_spill] sm:$0xff] }
  0xa6   :  { %v8623_v51 = vpack.c.bf16 %v6508_v31, %v6503_v26  ;;  %v378_v10 = vadd.f32 %v377_v8, %v376_v44  ;;  %v490_v9 = vadd.f32 %v489_v32, %v488_v45  ;;  %v825_v56 = vrot.slane %v824_v33, 2  ;;  %v161_v45 = vld [vmem:[%s8553_s0 + $0x238] sm:$0xff] }
  0xa7   :  { %8622 = vst [vmem:[#allocation21_spill] sm:$0xff] %v6787_v4  ;;  %v1046_v57 = vadd.f32 %v302_v11, %v286_v50  ;;  %v8626_v52 = vpack.c.bf16 %v8624_v1, %v8625_v2  ;;  %2039 = vmatprep.mubr.f32.mxu0 %v6787_v4  ;;  %v602_v22 = vadd.f32 %v601_v39, %v600_v14  ;;  %v937_v3 = vrot.slane %v936_v47, 2  ;;  %v177_v54 = vld [vmem:[%s8553_s0 + $0x2b8] sm:$0xff]  ;;  %v323_v4 = vld [vmem:[%s8553_s0 + $0x748] sm:$0xff] }
  0xa8   :  { %4991 = vmatpush3.bf16.msra.mxu1 %v8623_v51  ;;  %v714_v34 = vadd.f32 %v713_v46, %v712_v21  ;;  %v1158_v40 = vadd.f32 %v334_v25, %v318_v24  ;;  %v379_v41 = vrot.slane %v378_v10, 1  ;;  %v491_v12 = vrot.slane %v490_v9, 1  ;;  %v193_v11 = vld [vmem:[%s8553_s0 + $0x338] sm:$0xff] }
  0xa9   :  { %4993 = vmatprep.subr.bf16.mxu1 %v8626_v52  ;;  %v826_v13 = vadd.f32 %v825_v56, %v824_v33  ;;  %v1047_v7 = vrot.slane %v1046_v57, 4  ;;  %v603_v26 = vrot.slane %v602_v22, 1  ;;  %v938_v20 = vadd.f32 %v937_v3, %v936_v47  ;;  %v209_v14 = vld [vmem:[%s8553_s0 + $0x3b8] sm:$0xff] }
  0xaa   :  { %v715_v31 = vrot.slane %v714_v34, 1  ;;  %v1159_v38 = vrot.slane %v1158_v40, 4  ;;  %v8629_v28 = vpack.c.bf16 %v8627_v60, %v8628_v61  ;;  %v380_v43 = vadd.f32 %v379_v41, %v378_v10  ;;  %v225_v32 = vld [vmem:[%s8553_s0 + $0x438] sm:$0xff] }
  0xab   :  { %v492_v53 = vadd.f32 %v491_v12, %v490_v9  ;;  %v827_v15 = vrot.slane %v826_v13, 1  ;;  %v1048_v36 = vadd.f32 %v1047_v7, %v1046_v57  ;;  %v8632_v48 = vpack.c.bf16 %v8630_v37, %v8631_v49  ;;  %v241_v33 = vld [vmem:[%s8553_s0 + $0x4b8] sm:$0xff] }
  0xac   :  { %4995 = vmatpush3.bf16.msra.mxu1 %v8629_v28  ;;  %v604_v62 = vadd.f32 %v603_v26, %v602_v22  ;;  %v716_v63 = vadd.f32 %v715_v31, %v714_v34  ;;  %v939_v29 = vrot.slane %v938_v20, 1  ;;  %v1160_v30 = vadd.f32 %v1159_v38, %v1158_v40  ;;  %v257_v51 = vld [vmem:[%s8553_s0 + $0x538] sm:$0xff] }
  0xad   :  { %4997 = vmatprep.subr.bf16.mxu1 %v8632_v48  ;;  %v828_v5 = vadd.f32 %v827_v15, %v826_v13  ;;  %v1049_v6 = vrot.slane %v1048_v36, 2  ;;  %v1405_v16 = vsel %vm1370_vm0, %v492_v53, %v380_v43  ;;  %v5000_v44 = vpack.c.bf16 %v1717_v27, %v1716_v0  ;;  %v273_v10 = vld [vmem:[%s8553_s0 + $0x5b8] sm:$0xff] }
  0xae   :  { %v940_v55 = vadd.f32 %v939_v29, %v938_v20  ;;  %v1161_v17 = vrot.slane %v1160_v30, 2  ;;  %v1406_v50 = vsel %vm1372_vm1, %v604_v62, %v1405_v16  ;;  %v395_v21 = vadd.f32 %v113_v59, %v97_v58  ;;  %v289_v27 = vld [vmem:[%s8553_s0 + $0x638] sm:$0xff] }
  0xaf   :  { %v8635_v24 = vpack.c.bf16 %v8633_v18, %v8634_v19  ;;  %v1050_v25 = vadd.f32 %v1049_v6, %v1048_v36  ;;  %v1407_v8 = vsel %vm1374_vm2, %v716_v63, %v1406_v50  ;;  %5001 = vmatprep.subr.bf16.mxu0 %v5000_v44  ;;  %v507_v39 = vadd.f32 %v145_v42, %v129_v35  ;;  %v305_v60 = vld [vmem:[%s8553_s0 + $0x6b8] sm:$0xff] }
  0xb0   :  { %v1162_v46 = vadd.f32 %v1161_v17, %v1160_v30  ;;  %v1408_v47 = vsel %vm1376_vm3, %v828_v5, %v1407_v8  ;;  %v396_v9 = vrot.slane %v395_v21, 4  ;;  %v619_v56 = vadd.f32 %v177_v54, %v161_v45  ;;  %v321_v15 = vld [vmem:[%s8553_s0 + $0x738] sm:$0xff]  ;;  %v1700_v45 = vld [vmem:[%s8554_s1 + $0x400] sm:$0xff]  ;;  %v1701_v54 = vld [vmem:[%s8554_s1 + $0x408] sm:$0xff] }
  0xb1   :  { %4999 = vmatpush3.bf16.msra.mxu1 %v8635_v24  ;;  %v1051_v57 = vrot.slane %v1050_v25, 1  ;;  %v1409_v1 = vsel %vm1378_vm4, %v940_v55, %v1408_v47  ;;  %v508_v2 = vrot.slane %v507_v39, 4  ;;  %v731_v52 = vadd.f32 %v209_v14, %v193_v11  ;;  %v337_v36 = vld [vmem:[%s8553_s0 + $0x7b8] sm:$0xff]  ;;  %v1748_v24 = vld [vmem:[%s8554_s1 + $0x580] sm:$0xff]  ;;  %v112_v47 = vld [vmem:[%s8553_s0 + $0xb0] sm:$0xff] }
  0xb2   :  { %v1163_v22 = vrot.slane %v1162_v46, 1  ;;  %v397_v34 = vadd.f32 %v396_v9, %v395_v21  ;;  %v620_v3 = vrot.slane %v619_v56, 4  ;;  %v843_v40 = vadd.f32 %v241_v33, %v225_v32 }
  0xb3   :  { %v1052_v41 = vadd.f32 %v1051_v57, %v1050_v25  ;;  %v509_v12 = vadd.f32 %v508_v2, %v507_v39  ;;  %v732_v13 = vrot.slane %v731_v52, 4  ;;  %v955_v7 = vadd.f32 %v273_v10, %v257_v51  ;;  %v1749_v25 = vld [vmem:[%s8554_s1 + $0x588] sm:$0xff]  ;;  %v128_v51 = vld [vmem:[%s8553_s0 + $0x130] sm:$0xff] }
  0xb4   :  { %v1164_v26 = vadd.f32 %v1163_v22, %v1162_v46  ;;  %v398_v31 = vrot.slane %v397_v34, 2  ;;  %v621_v20 = vadd.f32 %v620_v3, %v619_v56  ;;  %v844_v38 = vrot.slane %v843_v40, 4  ;;  %v96_v46 = vld [vmem:[%s8553_s0 + $0x30] sm:$0xff] }
  0xb5   :  { %v1410_v0 = vsel %vm1380_vm5, %v1052_v41, %v1409_v1  ;;  %v510_v61 = vrot.slane %v509_v12, 2  ;;  %v733_v28 = vadd.f32 %v732_v13, %v731_v52  ;;  %v956_v43 = vrot.slane %v955_v7, 4  ;;  %v144_v1 = vld [vmem:[%s8553_s0 + $0x1b0] sm:$0xff] }
  0xb6   :  { %v1411_v53 = vsel %vm1382_vm6, %v1164_v26, %v1410_v0  ;;  %v399_v58 = vadd.f32 %v398_v31, %v397_v34  ;;  %v622_v59 = vrot.slane %v621_v20, 2  ;;  %v845_v37 = vadd.f32 %v844_v38, %v843_v40  ;;  %v160_v2 = vld [vmem:[%s8553_s0 + $0x230] sm:$0xff] }
  0xb7   :  { %v6866_v49 = vmul.f32 0.0625, %v1411_v53  ;;  %v511_v48 = vadd.f32 %v510_v61, %v509_v12  ;;  %v734_v62 = vrot.slane %v733_v28, 2  ;;  %v957_v63 = vadd.f32 %v956_v43, %v955_v7  ;;  %v176_v52 = vld [vmem:[%s8553_s0 + $0x2b0] sm:$0xff] }
  0xb8   :  { %v400_v29 = vrot.slane %v399_v58, 1  ;;  %v623_v30 = vadd.f32 %v622_v59, %v621_v20  ;;  %v846_v35 = vrot.slane %v845_v37, 2  ;;  %v1067_v42 = vadd.f32 %v305_v60, %v289_v27  ;;  %v192_v41 = vld [vmem:[%s8553_s0 + $0x330] sm:$0xff] }
  0xb9   :  { %8636 = vst [vmem:[#allocation13_spill] sm:$0xff] %v6866_v49  ;;  %2040 = vmatmul.mubr.f32.vlgmr.msra.gmra.mrb[2].mxu0 %v6866_v49  ;;  %v512_v5 = vrot.slane %v511_v48, 1  ;;  %v735_v6 = vadd.f32 %v734_v62, %v733_v28  ;;  %v958_v16 = vrot.slane %v957_v63, 2  ;;  %v1179_v44 = vadd.f32 %v337_v36, %v321_v15  ;;  %v208_v12 = vld [vmem:[%s8553_s0 + $0x3b0] sm:$0xff]  ;;  %v211_v49 = vld [vmem:[%s8553_s0 + $0x3c8] sm:$0xff] }
  0xba   :  { %v401_v55 = vadd.f32 %v400_v29, %v399_v58  ;;  %v624_v17 = vrot.slane %v623_v30, 1  ;;  %v847_v50 = vadd.f32 %v846_v35, %v845_v37  ;;  %v1068_v11 = vrot.slane %v1067_v42, 4  ;;  %v224_v31 = vld [vmem:[%s8553_s0 + $0x430] sm:$0xff] }
  0xbb   :  { %v513_v14 = vadd.f32 %v512_v5, %v511_v48  ;;  %v736_v21 = vrot.slane %v735_v6, 1  ;;  %v959_v18 = vadd.f32 %v958_v16, %v957_v63  ;;  %v1180_v19 = vrot.slane %v1179_v44, 4  ;;  %v240_v20 = vld [vmem:[%s8553_s0 + $0x4b0] sm:$0xff] }
  0xbc   :  { %v625_v8 = vadd.f32 %v624_v17, %v623_v30  ;;  %v848_v32 = vrot.slane %v847_v50, 1  ;;  %v1069_v33 = vadd.f32 %v1068_v11, %v1067_v42  ;;  %v5002_v39 = vpack.c.bf16 %v1701_v54, %v1700_v45  ;;  %v256_v60 = vld [vmem:[%s8553_s0 + $0x530] sm:$0xff] }
  0xbd   :  { %v737_v10 = vadd.f32 %v736_v21, %v735_v6  ;;  %v960_v9 = vrot.slane %v959_v18, 1  ;;  %v1181_v56 = vadd.f32 %v1180_v19, %v1179_v44  ;;  %v1426_v57 = vsel %vm1370_vm0, %v513_v14, %v401_v55  ;;  %v272_v61 = vld [vmem:[%s8553_s0 + $0x5b0] sm:$0xff] }
  0xbe   :  { %v849_v22 = vadd.f32 %v848_v32, %v847_v50  ;;  %v1070_v34 = vrot.slane %v1069_v33, 2  ;;  %v1427_v3 = vsel %vm1372_vm1, %v625_v8, %v1426_v57  ;;  %5003 = vmatpush3.bf16.msra.mxu0 %v5002_v39  ;;  %v5032_v40 = vpack.c.bf16 %v1749_v25, %v1748_v24  ;;  %v288_v50 = vld [vmem:[%s8553_s0 + $0x630] sm:$0xff] }
  0xbf   :  { %v961_v13 = vadd.f32 %v960_v9, %v959_v18  ;;  %v1182_v7 = vrot.slane %v1181_v56, 2  ;;  %v1428_v26 = vsel %vm1374_vm2, %v737_v10, %v1427_v3  ;;  %v388_v38 = vadd.f32 %v112_v47, %v96_v46  ;;  %v304_v11 = vld [vmem:[%s8553_s0 + $0x6b0] sm:$0xff] }
  0xc0   :  { %v1071_v0 = vadd.f32 %v1070_v34, %v1069_v33  ;;  %v1429_v27 = vsel %vm1376_vm3, %v849_v22, %v1428_v26  ;;  %5033 = vmatprep.subr.bf16.mxu1 %v5032_v40  ;;  %v500_v28 = vadd.f32 %v144_v1, %v128_v51  ;;  %v612_v43 = vadd.f32 %v176_v52, %v160_v2  ;;  %v320_v24 = vld [vmem:[%s8553_s0 + $0x730] sm:$0xff]  ;;  %v6941_v1 = vld [vmem:[%s8554_s1 + $0x500] sm:$0xff]  ;;  %v6946_v2 = vld [vmem:[%s8554_s1 + $0x508] sm:$0xff] }
  0xc1   :  { %v1183_v53 = vadd.f32 %v1182_v7, %v1181_v56  ;;  %v1430_v15 = vsel %vm1378_vm4, %v961_v13, %v1429_v27  ;;  %v389_v36 = vrot.slane %v388_v38, 4  ;;  %v724_v58 = vadd.f32 %v208_v12, %v192_v41  ;;  %v336_v25 = vld [vmem:[%s8553_s0 + $0x7b0] sm:$0xff]  ;;  %v1719_v41 = vld [vmem:[%s8554_s1 + $0x498] sm:$0xff] }
  0xc2   :  { %v1072_v59 = vrot.slane %v1071_v0, 1  ;;  %v501_v37 = vrot.slane %v500_v28, 4  ;;  %v613_v48 = vrot.slane %v612_v43, 4  ;;  %v836_v62 = vadd.f32 %v240_v20, %v224_v31  ;;  %v1718_v52 = vld [vmem:[%s8554_s1 + $0x490] sm:$0xff]  ;;  %v1703_v13 = vld [vmem:[%s8554_s1 + $0x418] sm:$0xff] }
  0xc3   :  { %v1184_v63 = vrot.slane %v1183_v53, 1  ;;  %v390_v29 = vadd.f32 %v389_v36, %v388_v38  ;;  %v725_v30 = vrot.slane %v724_v58, 4  ;;  %v948_v35 = vadd.f32 %v272_v61, %v256_v60  ;;  %v1702_v12 = vld [vmem:[%s8554_s1 + $0x410] sm:$0xff]  ;;  %v6979_v60 = vld [vmem:[%s8554_s1 + $0x518] sm:$0xff]  ;;  %v6989_v36 = vld [vmem:[%s8554_s1 + $0x4a8] sm:$0xff] }
  0xc4   :  { %v1073_v42 = vadd.f32 %v1072_v59, %v1071_v0  ;;  %v502_v5 = vadd.f32 %v501_v37, %v500_v28  ;;  %v614_v6 = vadd.f32 %v613_v48, %v612_v43  ;;  %v837_v16 = vrot.slane %v836_v62, 4  ;;  %v6964_v38 = vld [vmem:[%s8554_s1 + $0x590] sm:$0xff]  ;;  %v6969_v0 = vld [vmem:[%s8554_s1 + $0x598] sm:$0xff]  ;;  %v6999_v59 = vld [vmem:[%s8554_s1 + $0x428] sm:$0xff] }
  0xc5   :  { %v1185_v44 = vadd.f32 %v1184_v63, %v1183_v53  ;;  %v391_v45 = vrot.slane %v390_v29, 2  ;;  %v726_v54 = vadd.f32 %v725_v30, %v724_v58  ;;  %v949_v55 = vrot.slane %v948_v35, 4  ;;  %v6974_v27 = vld [vmem:[%s8554_s1 + $0x510] sm:$0xff]  ;;  %v6994_v58 = vld [vmem:[%s8554_s1 + $0x420] sm:$0xff]  ;;  %v7011_v30 = vld [vmem:[%s8554_s1 + $0x5a8] sm:$0xff] }
  0xc6   :  { %v1431_v17 = vsel %vm1380_vm5, %v1073_v42, %v1430_v15  ;;  %v503_v14 = vrot.slane %v502_v5, 2  ;;  %v615_v21 = vrot.slane %v614_v6, 2  ;;  %v838_v18 = vadd.f32 %v837_v16, %v836_v62  ;;  %v6984_v15 = vld [vmem:[%s8554_s1 + $0x4a0] sm:$0xff]  ;;  %v7021_v42 = vld [vmem:[%s8554_s1 + $0x528] sm:$0xff] }
  0xc7   :  { %v1432_v19 = vsel %vm1382_vm6, %v1185_v44, %v1431_v17  ;;  %v392_v8 = vadd.f32 %v391_v45, %v390_v29  ;;  %v727_v32 = vrot.slane %v726_v54, 2  ;;  %v950_v33 = vadd.f32 %v949_v55, %v948_v35  ;;  %v7006_v29 = vld [vmem:[%s8554_s1 + $0x5a0] sm:$0xff]  ;;  %v7027_v45 = vld [vmem:[%s8554_s1 + $0x4b0] sm:$0xff]  ;;  %v7042_v17 = vld [vmem:[%s8554_s1 + $0x438] sm:$0xff] }
  0xc8   :  { %v6936_v39 = vmul.f32 0.0625, %v1432_v19  ;;  %v504_v46 = vadd.f32 %v503_v14, %v502_v5  ;;  %v616_v47 = vadd.f32 %v615_v21, %v614_v6  ;;  %v839_v51 = vrot.slane %v838_v18, 2  ;;  %v7016_v35 = vld [vmem:[%s8554_s1 + $0x520] sm:$0xff]  ;;  %v7037_v55 = vld [vmem:[%s8554_s1 + $0x430] sm:$0xff]  ;;  %v147_v63 = vld [vmem:[%s8553_s0 + $0x1c8] sm:$0xff] }
  0xc9   :  { %v393_v10 = vrot.slane %v392_v8, 1  ;;  %v728_v9 = vadd.f32 %v727_v32, %v726_v54  ;;  %v951_v56 = vrot.slane %v950_v33, 2  ;;  %v1060_v57 = vadd.f32 %v304_v11, %v288_v50  ;;  %v7032_v54 = vld [vmem:[%s8554_s1 + $0x4b8] sm:$0xff]  ;;  %v7047_v50 = vld [vmem:[%s8554_s1 + $0x5b0] sm:$0xff]  ;;  %v7073_v32 = vld [vmem:[%s8554_s1 + $0x4c8] sm:$0xff] }
  0xca   :  { %8637 = vst [vmem:[#allocation12_spill] sm:$0xff] %v6936_v39  ;;  %2109 = vmatprep.mubr.f32.mxu1 %v6936_v39  ;;  %v505_v22 = vrot.slane %v504_v46, 1  ;;  %v617_v34 = vrot.slane %v616_v47, 1  ;;  %v840_v3 = vadd.f32 %v839_v51, %v838_v18  ;;  %v1172_v40 = vadd.f32 %v336_v25, %v320_v24  ;;  %v7052_v11 = vld [vmem:[%s8554_s1 + $0x5b8] sm:$0xff]  ;;  %v7058_v24 = vld [vmem:[%s8554_s1 + $0x530] sm:$0xff]  ;;  %v227_v39 = vld [vmem:[%s8553_s0 + $0x448] sm:$0xff] }
  0xcb   :  { %v394_v7 = vadd.f32 %v393_v10, %v392_v8  ;;  %v729_v26 = vrot.slane %v728_v9, 1  ;;  %v952_v31 = vadd.f32 %v951_v56, %v950_v33  ;;  %v1061_v20 = vrot.slane %v1060_v57, 4  ;;  %v7063_v25 = vld [vmem:[%s8554_s1 + $0x538] sm:$0xff]  ;;  %v7068_v8 = vld [vmem:[%s8554_s1 + $0x4c0] sm:$0xff]  ;;  %v131_v10 = vld [vmem:[%s8553_s0 + $0x148] sm:$0xff] }
  0xcc   :  { %v506_v61 = vadd.f32 %v505_v22, %v504_v46  ;;  %v618_v28 = vadd.f32 %v617_v34, %v616_v47  ;;  %v841_v43 = vrot.slane %v840_v3, 1  ;;  %v1173_v53 = vrot.slane %v1172_v40, 4  ;;  %v7078_v33 = vld [vmem:[%s8554_s1 + $0x440] sm:$0xff]  ;;  %v7083_v46 = vld [vmem:[%s8554_s1 + $0x448] sm:$0xff]  ;;  %v7113_v34 = vld [vmem:[%s8554_s1 + $0x4d0] sm:$0xff] }
  0xcd   :  { %v730_v37 = vadd.f32 %v729_v26, %v728_v9  ;;  %v953_v48 = vrot.slane %v952_v31, 1  ;;  %v1062_v62 = vadd.f32 %v1061_v20, %v1060_v57  ;;  %v5004_v44 = vpack.c.bf16 %v1719_v41, %v1718_v52  ;;  %v7093_v56 = vld [vmem:[%s8554_s1 + $0x5c0] sm:$0xff]  ;;  %v7098_v57 = vld [vmem:[%s8554_s1 + $0x5c8] sm:$0xff]  ;;  %v7133_v26 = vld [vmem:[%s8554_s1 + $0x458] sm:$0xff] }
  0xce   :  { %v842_v5 = vadd.f32 %v841_v43, %v840_v3  ;;  %v1174_v6 = vadd.f32 %v1173_v53, %v1172_v40  ;;  %v1419_v16 = vsel %vm1370_vm0, %v506_v61, %v394_v7  ;;  %v5006_v19 = vpack.c.bf16 %v1703_v13, %v1702_v12  ;;  %v7103_v52 = vld [vmem:[%s8554_s1 + $0x540] sm:$0xff]  ;;  %v7108_v22 = vld [vmem:[%s8554_s1 + $0x548] sm:$0xff]  ;;  %v7118_v3 = vld [vmem:[%s8554_s1 + $0x4d8] sm:$0xff] }
  0xcf   :  { %v954_v14 = vadd.f32 %v953_v48, %v952_v31  ;;  %v1063_v21 = vrot.slane %v1062_v62, 2  ;;  %v1420_v18 = vsel %vm1372_vm1, %v618_v28, %v1419_v16  ;;  %5005 = vmatprep.subr.bf16.mxu0 %v5004_v44  ;;  %v5008_v12 = vpack.c.bf16 %v6989_v36, %v6984_v15  ;;  %v7128_v7 = vld [vmem:[%s8554_s1 + $0x450] sm:$0xff]  ;;  %v7143_v20 = vld [vmem:[%s8554_s1 + $0x5d8] sm:$0xff]  ;;  %v7178_v48 = vld [vmem:[%s8554_s1 + $0x468] sm:$0xff] }
  0xd0   :  { %v1175_v47 = vrot.slane %v1174_v6, 2  ;;  %v1421_v51 = vsel %vm1374_vm2, %v730_v37, %v1420_v18  ;;  %5007 = vmatpush3.bf16.msra.mxu0 %v5006_v19  ;;  %v5010_v13 = vpack.c.bf16 %v6999_v59, %v6994_v58  ;;  %v7138_v31 = vld [vmem:[%s8554_s1 + $0x5d0] sm:$0xff]  ;;  %v7153_v28 = vld [vmem:[%s8554_s1 + $0x558] sm:$0xff]  ;;  %v7163_v58 = vld [vmem:[%s8554_s1 + $0x4e0] sm:$0xff]  ;;  %v5012_v16 = vpack.c.bf16 %v7032_v54, %v7027_v45 }
  0xd1   :  { %v1064_v40 = vadd.f32 %v1063_v21, %v1062_v62  ;;  %v1422_v41 = vsel %vm1376_vm3, %v842_v5, %v1421_v51  ;;  %v7148_v61 = vld [vmem:[%s8554_s1 + $0x550] sm:$0xff]  ;;  %8639 = vst [vmem:[#allocation14_spill] sm:$0xff] %v7153_v28  ;;  %v7168_v59 = vld [vmem:[%s8554_s1 + $0x4e8] sm:$0xff]  ;;  %v7173_v37 = vld [vmem:[%s8554_s1 + $0x460] sm:$0xff]  ;;  %5009 = vmatprep.subr.bf16.mxu0 %v5008_v12  ;;  %v5014_v44 = vpack.c.bf16 %v7042_v17, %v7037_v55 }
  0xd2   :  { %8638 = vst [vmem:[#allocation15_spill] sm:$0xff] %v7148_v61  ;;  %v1176_v43 = vadd.f32 %v1175_v47, %v1174_v6  ;;  %v1423_v53 = vsel %vm1378_vm4, %v954_v14, %v1422_v41  ;;  %v7183_v62 = vld [vmem:[%s8554_s1 + $0x5e0] sm:$0xff]  ;;  %v7188_v5 = vld [vmem:[%s8554_s1 + $0x5e8] sm:$0xff]  ;;  %v7209_v45 = vld [vmem:[%s8554_s1 + $0x4f0] sm:$0xff]  ;;  %v5016_v51 = vpack.c.bf16 %v7073_v32, %v7068_v8  ;;  %v5018_v41 = vpack.c.bf16 %v7083_v46, %v7078_v33 }
  0xd3   :  { %8640 = vst [vmem:[#allocation17_spill] sm:$0xff] %v7183_v62  ;;  %8641 = vst [vmem:[#allocation16_spill] sm:$0xff] %v7188_v5  ;;  %v1065_v6 = vrot.slane %v1064_v40, 1  ;;  %v7199_v21 = vld [vmem:[%s8554_s1 + $0x560] sm:$0xff]  ;;  %v7204_v18 = vld [vmem:[%s8554_s1 + $0x568] sm:$0xff]  ;;  %v5020_v9 = vpack.c.bf16 %v7118_v3, %v7113_v34  ;;  %v521_v23 = vadd.f32 %v147_v63, %v131_v10  ;;  %v8648_v63 = vpack.c.bf16 %v6969_v0, %v6964_v38 }
  0xd4   :  { %8642 = vst [vmem:[#allocation19_spill] sm:$0xff] %v7199_v21  ;;  %8643 = vst [vmem:[#allocation18_spill] sm:$0xff] %v7204_v18  ;;  %v7214_v54 = vld [vmem:[%s8554_s1 + $0x4f8] sm:$0xff]  ;;  %v7219_v55 = vld [vmem:[%s8554_s1 + $0x470] sm:$0xff]  ;;  %v1177_v19 = vrot.slane %v1176_v43, 1  ;;  %5011 = vmatpush3.bf16.msra.mxu0 %v5010_v13 }
  0xd5   :  { %v7224_v17 = vld [vmem:[%s8554_s1 + $0x478] sm:$0xff]  ;;  %v7235_v12 = vld [vmem:[%s8554_s1 + $0x5f0] sm:$0xff]  ;;  %v99_v32 = vld [vmem:[%s8553_s0 + $0x48] sm:$0xff]  ;;  %v1066_v46 = vadd.f32 %v1065_v6, %v1064_v40  ;;  %5013 = vmatprep.subr.bf16.mxu0 %v5012_v16  ;;  %v5022_v6 = vpack.c.bf16 %v7133_v26, %v7128_v7  ;;  %v5024_v26 = vpack.c.bf16 %v7168_v59, %v7163_v58  ;;  %v522_v59 = vrot.slane %v521_v23, 4 }
  0xd6   :  { %8644 = vst [vmem:[#allocation22_spill] sm:$0xff] %v7235_v12  ;;  %v7240_v14 = vld [vmem:[%s8554_s1 + $0x5f8] sm:$0xff]  ;;  %v7245_v47 = vld [vmem:[%s8554_s1 + $0x570] sm:$0xff]  ;;  %v115_v33 = vld [vmem:[%s8553_s0 + $0xc8] sm:$0xff]  ;;  %v1178_v3 = vadd.f32 %v1177_v19, %v1176_v43 }
  0xd7   :  { %8645 = vst [vmem:[#allocation23_spill] sm:$0xff] %v7240_v14  ;;  %v7250_v8 = vld [vmem:[%s8554_s1 + $0x578] sm:$0xff]  ;;  %v163_v40 = vld [vmem:[%s8553_s0 + $0x248] sm:$0xff]  ;;  %v1424_v7 = vsel %vm1380_vm5, %v1066_v46, %v1423_v53  ;;  %v409_v46 = vadd.f32 %v115_v33, %v99_v32 }
  0xd8   :  { %v179_v13 = vld [vmem:[%s8553_s0 + $0x2c8] sm:$0xff]  ;;  %v1425_v58 = vsel %vm1382_vm6, %v1178_v3, %v1424_v7  ;;  %5015 = vmatpush3.bf16.msra.mxu0 %v5014_v44  ;;  %v8647_v44 = vpack.c.bf16 %v6946_v2, %v6941_v1 }
  0xd9   :  { %v195_v34 = vld [vmem:[%s8553_s0 + $0x348] sm:$0xff]  ;;  %v7326_v7 = vmul.f32 0.0625, %v1425_v58  ;;  %5017 = vmatprep.subr.bf16.mxu0 %v5016_v51  ;;  %v633_v21 = vadd.f32 %v179_v13, %v163_v40  ;;  %v410_v5 = vrot.slane %v409_v46, 4  ;;  %v8649_v13 = vpack.c.bf16 %v6979_v60, %v6974_v27  ;;  %v98_v27 = vld [vmem:[%s8553_s0 + $0x40] sm:$0xff] }
  0xda   :  { %v243_v43 = vld [vmem:[%s8553_s0 + $0x4c8] sm:$0xff]  ;;  %v745_v18 = vadd.f32 %v211_v49, %v195_v34  ;;  %v8650_v34 = vpack.c.bf16 %v7011_v30, %v7006_v29  ;;  %v114_v29 = vld [vmem:[%s8553_s0 + $0xc0] sm:$0xff] }
  0xdb   :  { %v259_v36 = vld [vmem:[%s8553_s0 + $0x548] sm:$0xff]  ;;  %8646 = vst [vmem:[#allocation24_spill] sm:$0xff] %v7326_v7  ;;  %v857_v62 = vadd.f32 %v243_v43, %v227_v39  ;;  %2110 = vmatmul.mubr.f32.vlgmr.msra.gmra.mrb[2].mxu1 %v7326_v7  ;;  %v634_v12 = vrot.slane %v633_v21, 4  ;;  %v411_v49 = vadd.f32 %v410_v5, %v409_v46  ;;  %v130_v30 = vld [vmem:[%s8553_s0 + $0x140] sm:$0xff] }
  0xdc   :  { %v275_v15 = vld [vmem:[%s8553_s0 + $0x5c8] sm:$0xff]  ;;  %5035 = vmatpush3.bf16.msra.mxu1 %v8647_v44  ;;  %v746_v14 = vrot.slane %v745_v18, 4  ;;  %5019 = vmatpush3.bf16.msra.mxu0 %v5018_v41  ;;  %v8652_v44 = vpack.c.bf16 %v7052_v11, %v7047_v50  ;;  %v226_v50 = vld [vmem:[%s8553_s0 + $0x440] sm:$0xff]  ;;  %v8654_v11 = vpack.c.bf16 %v7214_v54, %v7209_v45  ;;  %v402_v54 = vadd.f32 %v114_v29, %v98_v27 }
  0xdd   :  { %v291_v53 = vld [vmem:[%s8553_s0 + $0x648] sm:$0xff]  ;;  %v969_v61 = vadd.f32 %v275_v15, %v259_v36  ;;  %v858_v19 = vrot.slane %v857_v62, 4  ;;  %5037 = vmatprep.subr.bf16.mxu1 %v8648_v63  ;;  %5021 = vmatprep.subr.bf16.mxu0 %v5020_v9  ;;  %v523_v15 = vadd.f32 %v522_v59, %v521_v23  ;;  %v412_v1 = vrot.slane %v411_v49, 2  ;;  %v290_v29 = vld [vmem:[%s8553_s0 + $0x640] sm:$0xff] }
  0xde   :  { %v307_v16 = vld [vmem:[%s8553_s0 + $0x6c8] sm:$0xff]  ;;  %v747_v36 = vadd.f32 %v746_v14, %v745_v18 }
  0xdf   :  { %v339_v3 = vld [vmem:[%s8553_s0 + $0x7c8] sm:$0xff]  ;;  %v1081_v28 = vadd.f32 %v307_v16, %v291_v53  ;;  %v970_v39 = vrot.slane %v969_v61, 4  ;;  %v859_v32 = vadd.f32 %v858_v19, %v857_v62  ;;  %v524_v38 = vrot.slane %v523_v15, 2 }
  0xe0   :  { %v1193_v58 = vadd.f32 %v339_v3, %v323_v4  ;;  %v635_v4 = vadd.f32 %v634_v12, %v633_v21  ;;  %5039 = vmatpush3.bf16.msra.mxu1 %v8649_v13  ;;  %v748_v41 = vrot.slane %v747_v36, 2  ;;  %5023 = vmatpush3.bf16.msra.mxu0 %v5022_v6  ;;  %v413_v23 = vadd.f32 %v412_v1, %v411_v49  ;;  %v146_v6 = vld [vmem:[%s8553_s0 + $0x1c0] sm:$0xff] }
  0xe1   :  { %v1082_v10 = vrot.slane %v1081_v28, 4  ;;  %v971_v2 = vadd.f32 %v970_v39, %v969_v61  ;;  %v860_v5 = vrot.slane %v859_v32, 2  ;;  %5041 = vmatprep.subr.bf16.mxu1 %v8650_v34  ;;  %5025 = vmatprep.subr.bf16.mxu0 %v5024_v26  ;;  %v525_v61 = vadd.f32 %v524_v38, %v523_v15  ;;  %v162_v3 = vld [vmem:[%s8553_s0 + $0x240] sm:$0xff] }
  0xe2   :  { %v1194_v51 = vrot.slane %v1193_v58, 4  ;;  %v636_v0 = vrot.slane %v635_v4, 2  ;;  %v749_v21 = vadd.f32 %v748_v41, %v747_v36  ;;  %v414_v60 = vrot.slane %v413_v23, 1  ;;  %v242_v36 = vld [vmem:[%s8553_s0 + $0x4c0] sm:$0xff] }
  0xe3   :  { %v1083_v33 = vadd.f32 %v1082_v10, %v1081_v28  ;;  %v972_v9 = vrot.slane %v971_v2, 2  ;;  %v861_v18 = vadd.f32 %v860_v5, %v859_v32  ;;  %v8651_v26 = vpack.c.bf16 %v7021_v42, %v7016_v35  ;;  %v194_v10 = vld [vmem:[%s8553_s0 + $0x340] sm:$0xff] }
  0xe4   :  { %v1195_v40 = vadd.f32 %v1194_v51, %v1193_v58  ;;  %v637_v28 = vadd.f32 %v636_v0, %v635_v4  ;;  %v526_v19 = vrot.slane %v525_v61, 1  ;;  %v750_v59 = vrot.slane %v749_v21, 1  ;;  %v178_v58 = vld [vmem:[%s8553_s0 + $0x2c0] sm:$0xff] }
  0xe5   :  { %v1084_v62 = vrot.slane %v1083_v33, 2  ;;  %v973_v12 = vadd.f32 %v972_v9, %v971_v2  ;;  %5043 = vmatpush3.bf16.msra.mxu1 %v8651_v26  ;;  %v862_v46 = vrot.slane %v861_v18, 1  ;;  %v8653_v35 = vpack.c.bf16 %v7178_v48, %v7173_v37  ;;  %v210_v51 = vld [vmem:[%s8553_s0 + $0x3c0] sm:$0xff] }
  0xe6   :  { %v1196_v14 = vrot.slane %v1195_v40, 2  ;;  %v638_v53 = vrot.slane %v637_v28, 1  ;;  %5045 = vmatprep.subr.bf16.mxu1 %v8652_v44  ;;  %v415_v42 = vadd.f32 %v414_v60, %v413_v23  ;;  %v527_v37 = vadd.f32 %v526_v19, %v525_v61  ;;  %v258_v32 = vld [vmem:[%s8553_s0 + $0x540] sm:$0xff] }
  0xe7   :  { %v1085_v43 = vadd.f32 %v1084_v62, %v1083_v33  ;;  %5027 = vmatpush3.bf16.msra.mxu0 %v8653_v35  ;;  %v974_v63 = vrot.slane %v973_v12, 1  ;;  %v751_v15 = vadd.f32 %v750_v59, %v749_v21  ;;  %v863_v4 = vadd.f32 %v862_v46, %v861_v18  ;;  %v274_v1 = vld [vmem:[%s8553_s0 + $0x5c0] sm:$0xff]  ;;  %v8661_v35 = vld [vmem:[#allocation14_spill] sm:$0xff] }
  0xe8   :  { %v1197_v16 = vadd.f32 %v1196_v14, %v1195_v40  ;;  %5029 = vmatprep.subr.bf16.mxu0 %v8654_v11  ;;  %v639_v48 = vadd.f32 %v638_v53, %v637_v28  ;;  %v8655_v40 = vpack.c.bf16 %v7063_v25, %v7058_v24  ;;  %v1440_v13 = vsel %vm1370_vm0, %v527_v37, %v415_v42  ;;  %v8662_v42 = vld [vmem:[#allocation15_spill] sm:$0xff]  ;;  %v8665_v11 = vld [vmem:[#allocation17_spill] sm:$0xff] }
  0xe9   :  { %v1086_v49 = vrot.slane %v1085_v43, 1  ;;  %v975_v2 = vadd.f32 %v974_v63, %v973_v12  ;;  %v514_v38 = vadd.f32 %v146_v6, %v130_v30  ;;  %v626_v0 = vadd.f32 %v178_v58, %v162_v3 }
  0xea   :  { %v1198_v39 = vrot.slane %v1197_v16, 1  ;;  %5047 = vmatpush3.bf16.msra.mxu1 %v8655_v40  ;;  %v738_v41 = vadd.f32 %v210_v51, %v194_v10  ;;  %v8656_v5 = vpack.c.bf16 %v7098_v57, %v7093_v56  ;;  %v8657_v34 = vpack.c.bf16 %v7224_v17, %v7219_v55  ;;  %v101_v40 = vld [vmem:[%s8553_s0 + $0x58] sm:$0xff] }
  0xeb   :  { %v1087_v33 = vadd.f32 %v1086_v49, %v1085_v43  ;;  %v1441_v23 = vsel %vm1372_vm1, %v639_v48, %v1440_v13  ;;  %v403_v9 = vrot.slane %v402_v54, 4  ;;  %v850_v62 = vadd.f32 %v242_v36, %v226_v50  ;;  %v8664_v50 = vld [vmem:[#allocation16_spill] sm:$0xff] }
  0xec   :  { %v1199_v45 = vadd.f32 %v1198_v39, %v1197_v16  ;;  %5049 = vmatprep.subr.bf16.mxu1 %v8656_v5  ;;  %5031 = vmatpush3.bf16.msra.mxu0 %v8657_v34  ;;  %v962_v14 = vadd.f32 %v274_v1, %v258_v32  ;;  %v1442_v24 = vsel %vm1374_vm2, %v751_v15, %v1441_v23  ;;  %v515_v25 = vrot.slane %v514_v38, 4  ;;  %v1780_v32 = vld [vmem:[%s8554_s1 + $0x680] sm:$0xff]  ;;  %v1781_v1 = vld [vmem:[%s8554_s1 + $0x688] sm:$0xff]  ;;  %v117_v13 = vld [vmem:[%s8553_s0 + $0xd8] sm:$0xff] }
  0xed   :  { %v627_v61 = vrot.slane %v626_v0, 4  ;;  %v739_v28 = vrot.slane %v738_v41, 4  ;;  %v1443_v21 = vsel %vm1376_vm3, %v863_v4, %v1442_v24  ;;  %v404_v18 = vadd.f32 %v403_v9, %v402_v54  ;;  %v133_v34 = vld [vmem:[%s8553_s0 + $0x158] sm:$0xff] }
  0xee   :  { %v851_v27 = vrot.slane %v850_v62, 4  ;;  %v963_v56 = vrot.slane %v962_v14, 4  ;;  %v8658_v57 = vpack.c.bf16 %v7108_v22, %v7103_v52  ;;  %v1444_v55 = vsel %vm1378_vm4, %v975_v2, %v1443_v21  ;;  %v306_v52 = vld [vmem:[%s8553_s0 + $0x6c0] sm:$0xff]  ;;  %v149_v23 = vld [vmem:[%s8553_s0 + $0x1d8] sm:$0xff] }
  0xef   :  { %v516_v17 = vadd.f32 %v515_v25, %v514_v38  ;;  %v628_v60 = vadd.f32 %v627_v61, %v626_v0  ;;  %v740_v12 = vadd.f32 %v739_v28, %v738_v41  ;;  %v8659_v43 = vpack.c.bf16 %v7143_v20, %v7138_v31  ;;  %v322_v31 = vld [vmem:[%s8553_s0 + $0x740] sm:$0xff]  ;;  %v165_v9 = vld [vmem:[%s8553_s0 + $0x258] sm:$0xff] }
  0xf0   :  { %5051 = vmatpush3.bf16.msra.mxu1 %v8658_v57  ;;  %v1445_v16 = vsel %vm1380_vm5, %v1087_v33, %v1444_v55  ;;  %v405_v22 = vrot.slane %v404_v18, 2  ;;  %v852_v30 = vadd.f32 %v851_v27, %v850_v62  ;;  %v964_v6 = vadd.f32 %v963_v56, %v962_v14  ;;  %v338_v20 = vld [vmem:[%s8553_s0 + $0x7c0] sm:$0xff]  ;;  %v8667_v62 = vld [vmem:[#allocation18_spill] sm:$0xff]  ;;  %v8668_v14 = vld [vmem:[#allocation19_spill] sm:$0xff] }
  0xf1   :  { %5053 = vmatprep.subr.bf16.mxu1 %v8659_v43  ;;  %v1446_v26 = vsel %vm1382_vm6, %v1199_v45, %v1445_v16  ;;  %v517_v19 = vrot.slane %v516_v17, 2  ;;  %v629_v53 = vrot.slane %v628_v60, 2  ;;  %v741_v59 = vrot.slane %v740_v12, 2  ;;  %v197_v27 = vld [vmem:[%s8553_s0 + $0x358] sm:$0xff]  ;;  %v8670_v57 = vld [vmem:[#allocation23_spill] sm:$0xff]  ;;  %v8671_v55 = vld [vmem:[#allocation22_spill] sm:$0xff] }
  0xf2   :  { %v7427_v46 = vmul.f32 0.0625, %v1446_v26  ;;  %v406_v3 = vadd.f32 %v405_v22, %v404_v18  ;;  %v853_v58 = vrot.slane %v852_v30, 2  ;;  %v965_v44 = vrot.slane %v964_v6, 2  ;;  %v181_v18 = vld [vmem:[%s8553_s0 + $0x2d8] sm:$0xff] }
  0xf3   :  { %v8663_v63 = vpack.c.bf16 %v8661_v35, %v8662_v42  ;;  %v518_v49 = vadd.f32 %v517_v19, %v516_v17  ;;  %v630_v39 = vadd.f32 %v629_v53, %v628_v60  ;;  %v742_v10 = vadd.f32 %v741_v59, %v740_v12  ;;  %v213_v56 = vld [vmem:[%s8553_s0 + $0x3d8] sm:$0xff] }
  0xf4   :  { %8660 = vst [vmem:[#allocation25_spill] sm:$0xff] %v7427_v46  ;;  %v1074_v51 = vadd.f32 %v306_v52, %v290_v29  ;;  %v8666_v37 = vpack.c.bf16 %v8664_v50, %v8665_v11  ;;  %2179 = vmatprep.mubr.f32.mxu0 %v7427_v46  ;;  %v407_v48 = vrot.slane %v406_v3, 1  ;;  %v854_v15 = vadd.f32 %v853_v58, %v852_v30  ;;  %v245_v58 = vld [vmem:[%s8553_s0 + $0x4d8] sm:$0xff] }
  0xf5   :  { %5055 = vmatpush3.bf16.msra.mxu1 %v8663_v63  ;;  %v966_v4 = vadd.f32 %v965_v44, %v964_v6  ;;  %v1186_v36 = vadd.f32 %v338_v20, %v322_v31  ;;  %v519_v2 = vrot.slane %v518_v49, 1  ;;  %v631_v33 = vrot.slane %v630_v39, 1 }
  0xf6   :  { %5057 = vmatprep.subr.bf16.mxu1 %v8666_v37  ;;  %v743_v45 = vrot.slane %v742_v10, 1  ;;  %v1075_v54 = vrot.slane %v1074_v51, 4  ;;  %v408_v38 = vadd.f32 %v407_v48, %v406_v3  ;;  %v855_v0 = vrot.slane %v854_v15, 1  ;;  %v229_v3 = vld [vmem:[%s8553_s0 + $0x458] sm:$0xff] }
  0xf7   :  { %v967_v41 = vrot.slane %v966_v4, 1  ;;  %v1187_v5 = vrot.slane %v1186_v36, 4  ;;  %v8669_v24 = vpack.c.bf16 %v8667_v62, %v8668_v14  ;;  %v520_v25 = vadd.f32 %v519_v2, %v518_v49  ;;  %v341_v62 = vld [vmem:[%s8553_s0 + $0x7d8] sm:$0xff] }
  0xf8   :  { %v632_v61 = vadd.f32 %v631_v33, %v630_v39  ;;  %v744_v28 = vadd.f32 %v743_v45, %v742_v10  ;;  %v1076_v21 = vadd.f32 %v1075_v54, %v1074_v51  ;;  %v8672_v17 = vpack.c.bf16 %v8670_v57, %v8671_v55 }
  0xf9   :  { %5059 = vmatpush3.bf16.msra.mxu1 %v8669_v24  ;;  %v856_v60 = vadd.f32 %v855_v0, %v854_v15  ;;  %v968_v12 = vadd.f32 %v967_v41, %v966_v4  ;;  %v1188_v43 = vadd.f32 %v1187_v5, %v1186_v36  ;;  %v5064_v16 = vpack.c.bf16 %v1781_v1, %v1780_v32  ;;  %v309_v0 = vld [vmem:[%s8553_s0 + $0x6d8] sm:$0xff] }
  0xfa   :  { %5061 = vmatprep.subr.bf16.mxu1 %v8672_v17  ;;  %v1077_v29 = vrot.slane %v1076_v21, 2  ;;  %v1433_v52 = vsel %vm1370_vm0, %v520_v25, %v408_v38  ;;  %v423_v22 = vadd.f32 %v117_v13, %v101_v40  ;;  %v535_v30 = vadd.f32 %v149_v23, %v133_v34  ;;  %v293_v38 = vld [vmem:[%s8553_s0 + $0x658] sm:$0xff]  ;;  %v1764_v17 = vld [vmem:[%s8554_s1 + $0x600] sm:$0xff] }
  0xfb   :  { %v1189_v6 = vrot.slane %v1188_v43, 2  ;;  %v1434_v26 = vsel %vm1372_vm1, %v632_v61, %v1433_v52  ;;  %5065 = vmatprep.subr.bf16.mxu0 %v5064_v16  ;;  %v647_v31 = vadd.f32 %v181_v18, %v165_v9  ;;  %v759_v20 = vadd.f32 %v213_v56, %v197_v27  ;;  %v325_v9 = vld [vmem:[%s8553_s0 + $0x758] sm:$0xff]  ;;  %v1812_v52 = vld [vmem:[%s8554_s1 + $0x780] sm:$0xff] }
  0xfc   :  { %v8673_v19 = vpack.c.bf16 %v7250_v8, %v7245_v47  ;;  %v1078_v53 = vadd.f32 %v1077_v29, %v1076_v21  ;;  %v1435_v59 = vsel %vm1374_vm2, %v744_v28, %v1434_v26  ;;  %v424_v44 = vrot.slane %v423_v22, 4  ;;  %v261_v47 = vld [vmem:[%s8553_s0 + $0x558] sm:$0xff] }
  0xfd   :  { %v536_v35 = vrot.slane %v535_v30, 4  ;;  %v1190_v42 = vadd.f32 %v1189_v6, %v1188_v43  ;;  %v1436_v63 = vsel %vm1376_vm3, %v856_v60, %v1435_v59  ;;  %v277_v8 = vld [vmem:[%s8553_s0 + $0x5d8] sm:$0xff]  ;;  %v648_v49 = vrot.slane %v647_v31, 4  ;;  %v1765_v60 = vld [vmem:[%s8554_s1 + $0x608] sm:$0xff] }
  0xfe   :  { %5063 = vmatpush3.bf16.msra.mxu1 %v8673_v19  ;;  %v760_v39 = vrot.slane %v759_v20, 4  ;;  %v1079_v10 = vrot.slane %v1078_v53, 1  ;;  %v1437_v51 = vsel %vm1378_vm4, %v968_v12, %v1436_v63  ;;  %v425_v50 = vadd.f32 %v424_v44, %v423_v22  ;;  %v1813_v22 = vld [vmem:[%s8554_s1 + $0x788] sm:$0xff]  ;;  %v116_v19 = vld [vmem:[%s8553_s0 + $0xd0] sm:$0xff] }
  0xff   :  { %v537_v11 = vadd.f32 %v536_v35, %v535_v30  ;;  %v1191_v37 = vrot.slane %v1190_v42, 1  ;;  %v649_v48 = vadd.f32 %v648_v49, %v647_v31  ;;  %v871_v4 = vadd.f32 %v245_v58, %v229_v3  ;;  %v148_v35 = vld [vmem:[%s8553_s0 + $0x1d0] sm:$0xff] }
 0x100   :  { %v761_v15 = vadd.f32 %v760_v39, %v759_v20  ;;  %v1080_v36 = vadd.f32 %v1079_v10, %v1078_v53  ;;  %v426_v32 = vrot.slane %v425_v50, 2  ;;  %v983_v2 = vadd.f32 %v277_v8, %v261_v47  ;;  %v100_v20 = vld [vmem:[%s8553_s0 + $0x50] sm:$0xff] }
 0x101   :  { %v538_v1 = vrot.slane %v537_v11, 2  ;;  %v1192_v33 = vadd.f32 %v1191_v37, %v1190_v42  ;;  %v650_v45 = vrot.slane %v649_v48, 2  ;;  %v872_v40 = vrot.slane %v871_v4, 4  ;;  %v132_v53 = vld [vmem:[%s8553_s0 + $0x150] sm:$0xff] }
 0x102   :  { %v762_v54 = vrot.slane %v761_v15, 2  ;;  %v1438_v13 = vsel %vm1380_vm5, %v1080_v36, %v1437_v51  ;;  %v427_v41 = vadd.f32 %v426_v32, %v425_v50  ;;  %v984_v34 = vrot.slane %v983_v2, 4  ;;  %v164_v42 = vld [vmem:[%s8553_s0 + $0x250] sm:$0xff] }
 0x103   :  { %v539_v5 = vadd.f32 %v538_v1, %v537_v11  ;;  %v1439_v23 = vsel %vm1382_vm6, %v1192_v33, %v1438_v13  ;;  %v651_v14 = vadd.f32 %v650_v45, %v649_v48  ;;  %v873_v25 = vadd.f32 %v872_v40, %v871_v4  ;;  %v180_v63 = vld [vmem:[%s8553_s0 + $0x2d0] sm:$0xff] }
 0x104   :  { %v763_v24 = vadd.f32 %v762_v54, %v761_v15  ;;  %v7506_v61 = vmul.f32 0.0625, %v1439_v23  ;;  %v428_v28 = vrot.slane %v427_v41, 1  ;;  %v985_v18 = vadd.f32 %v984_v34, %v983_v2  ;;  %v196_v10 = vld [vmem:[%s8553_s0 + $0x350] sm:$0xff] }
 0x105   :  { %v540_v21 = vrot.slane %v539_v5, 1  ;;  %v652_v27 = vrot.slane %v651_v14, 1  ;;  %v874_v57 = vrot.slane %v873_v25, 2  ;;  %v1095_v55 = vadd.f32 %v309_v0, %v293_v38  ;;  %v212_v51 = vld [vmem:[%s8553_s0 + $0x3d0] sm:$0xff] }
 0x106   :  { %8674 = vst [vmem:[#allocation14_spill] sm:$0xff] %v7506_v61  ;;  %v764_v56 = vrot.slane %v763_v24, 1  ;;  %2180 = vmatmul.mubr.f32.vlgmr.msra.gmra.mrb[4].mxu0 %v7506_v61  ;;  %v429_v12 = vadd.f32 %v428_v28, %v427_v41  ;;  %v986_v16 = vrot.slane %v985_v18, 2  ;;  %v1207_v29 = vadd.f32 %v341_v62, %v325_v9  ;;  %v228_v33 = vld [vmem:[%s8553_s0 + $0x450] sm:$0xff]  ;;  %v279_v61 = vld [vmem:[%s8553_s0 + $0x5e8] sm:$0xff] }
 0x107   :  { %v541_v43 = vadd.f32 %v540_v21, %v539_v5  ;;  %v653_v30 = vadd.f32 %v652_v27, %v651_v14  ;;  %v875_v26 = vadd.f32 %v874_v57, %v873_v25  ;;  %v1096_v31 = vrot.slane %v1095_v55, 4  ;;  %v244_v45 = vld [vmem:[%s8553_s0 + $0x4d0] sm:$0xff] }
 0x108   :  { %v765_v6 = vadd.f32 %v764_v56, %v763_v24  ;;  %v987_v59 = vadd.f32 %v986_v16, %v985_v18  ;;  %v1208_v3 = vrot.slane %v1207_v29, 4  ;;  %v5066_v44 = vpack.c.bf16 %v1765_v60, %v1764_v17  ;;  %v260_v0 = vld [vmem:[%s8553_s0 + $0x550] sm:$0xff] }
 0x109   :  { %v1454_v58 = vsel %vm1370_vm0, %v541_v43, %v429_v12  ;;  %v876_v47 = vrot.slane %v875_v26, 1  ;;  %v1097_v8 = vadd.f32 %v1096_v31, %v1095_v55  ;;  %v5096_v39 = vpack.c.bf16 %v1813_v22, %v1812_v52  ;;  %v276_v41 = vld [vmem:[%s8553_s0 + $0x5d0] sm:$0xff] }
 0x10a   :  { %v1455_v49 = vsel %vm1372_vm1, %v653_v30, %v1454_v58  ;;  %v988_v50 = vrot.slane %v987_v59, 1  ;;  %v1209_v11 = vadd.f32 %v1208_v3, %v1207_v29  ;;  %5067 = vmatpush3.bf16.msra.mxu0 %v5066_v44  ;;  %v416_v48 = vadd.f32 %v116_v19, %v100_v20  ;;  %v292_v16 = vld [vmem:[%s8553_s0 + $0x650] sm:$0xff] }
 0x10b   :  { %v1456_v37 = vsel %vm1374_vm2, %v765_v6, %v1455_v49  ;;  %v877_v15 = vadd.f32 %v876_v47, %v875_v26  ;;  %v1098_v4 = vrot.slane %v1097_v8, 2  ;;  %5097 = vmatprep.subr.bf16.mxu1 %v5096_v39  ;;  %v528_v36 = vadd.f32 %v148_v35, %v132_v53  ;;  %v308_v6 = vld [vmem:[%s8553_s0 + $0x6d0] sm:$0xff]  ;;  %v7579_v35 = vld [vmem:[%s8554_s1 + $0x700] sm:$0xff] }
 0x10c   :  { %v640_v32 = vadd.f32 %v180_v63, %v164_v42  ;;  %v989_v1 = vadd.f32 %v988_v50, %v987_v59  ;;  %v1210_v2 = vrot.slane %v1209_v11, 2  ;;  %v417_v54 = vrot.slane %v416_v48, 4  ;;  %v324_v26 = vld [vmem:[%s8553_s0 + $0x750] sm:$0xff]  ;;  %v7584_v42 = vld [vmem:[%s8554_s1 + $0x708] sm:$0xff] }
 0x10d   :  { %v752_v40 = vadd.f32 %v212_v51, %v196_v10  ;;  %v1099_v13 = vadd.f32 %v1098_v4, %v1097_v8  ;;  %v1457_v38 = vsel %vm1376_vm3, %v877_v15, %v1456_v37  ;;  %v529_v5 = vrot.slane %v528_v36, 4  ;;  %v340_v31 = vld [vmem:[%s8553_s0 + $0x7d0] sm:$0xff]  ;;  %v1783_v10 = vld [vmem:[%s8554_s1 + $0x698] sm:$0xff] }
 0x10e   :  { %v641_v34 = vrot.slane %v640_v32, 4  ;;  %v1211_v23 = vadd.f32 %v1210_v2, %v1209_v11  ;;  %v1458_v9 = vsel %vm1378_vm4, %v989_v1, %v1457_v38  ;;  %v418_v62 = vadd.f32 %v417_v54, %v416_v48  ;;  %v1782_v63 = vld [vmem:[%s8554_s1 + $0x690] sm:$0xff]  ;;  %v1767_v15 = vld [vmem:[%s8554_s1 + $0x618] sm:$0xff] }
 0x10f   :  { %v753_v14 = vrot.slane %v752_v40, 4  ;;  %v1100_v24 = vrot.slane %v1099_v13, 1  ;;  %v530_v25 = vadd.f32 %v529_v5, %v528_v36  ;;  %v864_v21 = vadd.f32 %v244_v45, %v228_v33  ;;  %v1766_v51 = vld [vmem:[%s8554_s1 + $0x610] sm:$0xff]  ;;  %v7608_v36 = vld [vmem:[%s8554_s1 + $0x798] sm:$0xff]  ;;  %v247_v5 = vld [vmem:[%s8553_s0 + $0x4e8] sm:$0xff] }
 0x110   :  { %v642_v28 = vadd.f32 %v641_v34, %v640_v32  ;;  %v1212_v18 = vrot.slane %v1211_v23, 1  ;;  %v419_v27 = vrot.slane %v418_v62, 2  ;;  %v976_v57 = vadd.f32 %v276_v41, %v260_v0  ;;  %v7603_v4 = vld [vmem:[%s8554_s1 + $0x790] sm:$0xff]  ;;  %v7619_v54 = vld [vmem:[%s8554_s1 + $0x718] sm:$0xff]  ;;  %v7634_v34 = vld [vmem:[%s8554_s1 + $0x620] sm:$0xff] }
 0x111   :  { %v754_v56 = vadd.f32 %v753_v14, %v752_v40  ;;  %v1101_v55 = vadd.f32 %v1100_v24, %v1099_v13  ;;  %v531_v17 = vrot.slane %v530_v25, 2  ;;  %v865_v12 = vrot.slane %v864_v21, 4  ;;  %v7614_v45 = vld [vmem:[%s8554_s1 + $0x710] sm:$0xff]  ;;  %v7624_v40 = vld [vmem:[%s8554_s1 + $0x6a0] sm:$0xff]  ;;  %v1785_v13 = vld [vmem:[%s8554_s1 + $0x6a8] sm:$0xff] }
 0x112   :  { %v643_v60 = vrot.slane %v642_v28, 2  ;;  %v1213_v43 = vadd.f32 %v1212_v18, %v1211_v23  ;;  %v420_v29 = vadd.f32 %v419_v27, %v418_v62  ;;  %v977_v22 = vrot.slane %v976_v57, 4  ;;  %v7639_v23 = vld [vmem:[%s8554_s1 + $0x628] sm:$0xff]  ;;  %v7665_v27 = vld [vmem:[%s8554_s1 + $0x6b0] sm:$0xff] }
 0x113   :  { %v755_v52 = vrot.slane %v754_v56, 2  ;;  %v1459_v30 = vsel %vm1380_vm5, %v1101_v55, %v1458_v9  ;;  %v532_v20 = vadd.f32 %v531_v17, %v530_v25  ;;  %v866_v53 = vadd.f32 %v865_v12, %v864_v21  ;;  %v7644_v9 = vld [vmem:[%s8554_s1 + $0x7a0] sm:$0xff]  ;;  %v7649_v62 = vld [vmem:[%s8554_s1 + $0x7a8] sm:$0xff]  ;;  %v7676_v12 = vld [vmem:[%s8554_s1 + $0x630] sm:$0xff] }
 0x114   :  { %v644_v19 = vadd.f32 %v643_v60, %v642_v28  ;;  %v1460_v59 = vsel %vm1382_vm6, %v1213_v43, %v1459_v30  ;;  %v421_v3 = vrot.slane %v420_v29, 1  ;;  %v978_v44 = vadd.f32 %v977_v22, %v976_v57  ;;  %v7655_v21 = vld [vmem:[%s8554_s1 + $0x720] sm:$0xff]  ;;  %v7660_v18 = vld [vmem:[%s8554_s1 + $0x728] sm:$0xff]  ;;  %v7681_v43 = vld [vmem:[%s8554_s1 + $0x638] sm:$0xff] }
 0x115   :  { %v756_v58 = vadd.f32 %v755_v52, %v754_v56  ;;  %v7589_v47 = vmul.f32 0.0625, %v1460_v59  ;;  %v533_v8 = vrot.slane %v532_v20, 1  ;;  %v867_v39 = vrot.slane %v866_v53, 2  ;;  %v7670_v56 = vld [vmem:[%s8554_s1 + $0x6b8] sm:$0xff]  ;;  %v7696_v52 = vld [vmem:[%s8554_s1 + $0x730] sm:$0xff]  ;;  %v7724_v59 = vld [vmem:[%s8554_s1 + $0x648] sm:$0xff] }
 0x116   :  { %v645_v49 = vrot.slane %v644_v19, 1  ;;  %v422_v50 = vadd.f32 %v421_v3, %v420_v29  ;;  %v979_v37 = vrot.slane %v978_v44, 2  ;;  %v1088_v48 = vadd.f32 %v308_v6, %v292_v16  ;;  %v7686_v16 = vld [vmem:[%s8554_s1 + $0x7b0] sm:$0xff]  ;;  %v7691_v29 = vld [vmem:[%s8554_s1 + $0x7b8] sm:$0xff]  ;;  %v7729_v3 = vld [vmem:[%s8554_s1 + $0x7c0] sm:$0xff] }
 0x117   :  { %8675 = vst [vmem:[#allocation15_spill] sm:$0xff] %v7589_v47  ;;  %v757_v11 = vrot.slane %v756_v58, 1  ;;  %2249 = vmatprep.mubr.f32.mxu1 %v7589_v47  ;;  %v534_v32 = vadd.f32 %v533_v8, %v532_v20  ;;  %v868_v2 = vadd.f32 %v867_v39, %v866_v53  ;;  %v1200_v33 = vadd.f32 %v340_v31, %v324_v26  ;;  %v7701_v22 = vld [vmem:[%s8554_s1 + $0x738] sm:$0xff]  ;;  %v7709_v20 = vld [vmem:[%s8554_s1 + $0x6c0] sm:$0xff]  ;;  %v151_v8 = vld [vmem:[%s8553_s0 + $0x1e8] sm:$0xff] }
 0x118   :  { %v646_v1 = vadd.f32 %v645_v49, %v644_v19  ;;  %v980_v0 = vadd.f32 %v979_v37, %v978_v44  ;;  %v1089_v41 = vrot.slane %v1088_v48, 4  ;;  %v5068_v28 = vpack.c.bf16 %v1783_v10, %v1782_v63  ;;  %v7714_v19 = vld [vmem:[%s8554_s1 + $0x6c8] sm:$0xff]  ;;  %v7719_v53 = vld [vmem:[%s8554_s1 + $0x640] sm:$0xff]  ;;  %v7767_v37 = vld [vmem:[%s8554_s1 + $0x658] sm:$0xff] }
 0x119   :  { %v758_v38 = vadd.f32 %v757_v11, %v756_v58  ;;  %v869_v14 = vrot.slane %v868_v2, 1  ;;  %v1201_v24 = vrot.slane %v1200_v33, 4  ;;  %v1447_v25 = vsel %vm1370_vm0, %v534_v32, %v422_v50  ;;  %v7734_v58 = vld [vmem:[%s8554_s1 + $0x7c8] sm:$0xff]  ;;  %v7742_v39 = vld [vmem:[%s8554_s1 + $0x740] sm:$0xff]  ;;  %v7757_v50 = vld [vmem:[%s8554_s1 + $0x6d8] sm:$0xff] }
 0x11a   :  { %v981_v57 = vrot.slane %v980_v0, 1  ;;  %v1090_v55 = vadd.f32 %v1089_v41, %v1088_v48  ;;  %v1448_v17 = vsel %vm1372_vm1, %v646_v1, %v1447_v25  ;;  %v5070_v60 = vpack.c.bf16 %v1767_v15, %v1766_v51  ;;  %5069 = vmatprep.subr.bf16.mxu0 %v5068_v28  ;;  %v7747_v10 = vld [vmem:[%s8554_s1 + $0x748] sm:$0xff]  ;;  %v7752_v51 = vld [vmem:[%s8554_s1 + $0x6d0] sm:$0xff]  ;;  %v7822_v28 = vld [vmem:[%s8554_s1 + $0x7e0] sm:$0xff] }
 0x11b   :  { %v870_v30 = vadd.f32 %v869_v14, %v868_v2  ;;  %v1202_v6 = vadd.f32 %v1201_v24, %v1200_v33  ;;  %v1449_v26 = vsel %vm1374_vm2, %v758_v38, %v1448_v17  ;;  %v5072_v49 = vpack.c.bf16 %v1785_v13, %v7624_v40  ;;  %v7762_v11 = vld [vmem:[%s8554_s1 + $0x650] sm:$0xff]  ;;  %v7782_v33 = vld [vmem:[%s8554_s1 + $0x7d8] sm:$0xff]  ;;  %v7797_v38 = vld [vmem:[%s8554_s1 + $0x6e0] sm:$0xff]  ;;  %8676 = vst [vmem:[#allocation16_spill] sm:$0xff] %v7822_v28 }
 0x11c   :  { %v982_v44 = vadd.f32 %v981_v57, %v980_v0  ;;  %v1091_v63 = vrot.slane %v1090_v55, 2  ;;  %5071 = vmatpush3.bf16.msra.mxu0 %v5070_v60  ;;  %v5074_v32 = vpack.c.bf16 %v7639_v23, %v7634_v34  ;;  %v7777_v2 = vld [vmem:[%s8554_s1 + $0x7d0] sm:$0xff]  ;;  %v7792_v13 = vld [vmem:[%s8554_s1 + $0x758] sm:$0xff]  ;;  %v7802_v0 = vld [vmem:[%s8554_s1 + $0x6e8] sm:$0xff]  ;;  %v5076_v14 = vpack.c.bf16 %v7670_v56, %v7665_v27 }
 0x11d   :  { %v1203_v48 = vrot.slane %v1202_v6, 2  ;;  %v1450_v15 = vsel %vm1376_vm3, %v870_v30, %v1449_v26  ;;  %v7787_v40 = vld [vmem:[%s8554_s1 + $0x750] sm:$0xff]  ;;  %5073 = vmatprep.subr.bf16.mxu0 %v5072_v49  ;;  %v7812_v24 = vld [vmem:[%s8554_s1 + $0x660] sm:$0xff]  ;;  %v7817_v25 = vld [vmem:[%s8554_s1 + $0x668] sm:$0xff]  ;;  %v5078_v17 = vpack.c.bf16 %v7681_v43, %v7676_v12  ;;  %v5086_v30 = vpack.c.bf16 %v7767_v37, %v7762_v11 }
 0x11e   :  { %v1092_v41 = vadd.f32 %v1091_v63, %v1090_v55  ;;  %v1451_v34 = vsel %vm1378_vm4, %v982_v44, %v1450_v15  ;;  %v7827_v57 = vld [vmem:[%s8554_s1 + $0x7e8] sm:$0xff]  ;;  %v7832_v27 = vld [vmem:[%s8554_s1 + $0x760] sm:$0xff]  ;;  %v7848_v26 = vld [vmem:[%s8554_s1 + $0x6f0] sm:$0xff]  ;;  %v5082_v15 = vpack.c.bf16 %v7724_v59, %v7719_v53 }
 0x11f   :  { %8677 = vst [vmem:[#allocation17_spill] sm:$0xff] %v7832_v27  ;;  %v7837_v56 = vld [vmem:[%s8554_s1 + $0x768] sm:$0xff]  ;;  %v1204_v55 = vadd.f32 %v1203_v48, %v1202_v6  ;;  %v7853_v44 = vld [vmem:[%s8554_s1 + $0x6f8] sm:$0xff]  ;;  %v7858_v12 = vld [vmem:[%s8554_s1 + $0x670] sm:$0xff]  ;;  %v5080_v48 = vpack.c.bf16 %v7714_v19, %v7709_v20 }
 0x120   :  { %8678 = vst [vmem:[#allocation18_spill] sm:$0xff] %v7837_v56  ;;  %v7863_v43 = vld [vmem:[%s8554_s1 + $0x678] sm:$0xff]  ;;  %v7868_v6 = vld [vmem:[%s8554_s1 + $0x7f0] sm:$0xff]  ;;  %v1093_v49 = vrot.slane %v1092_v41, 1  ;;  %5075 = vmatpush3.bf16.msra.mxu0 %v5074_v32  ;;  %v103_v20 = vld [vmem:[%s8553_s0 + $0x68] sm:$0xff]  ;;  %v5084_v32 = vpack.c.bf16 %v7757_v50, %v7752_v51  ;;  %v5088_v50 = vpack.c.bf16 %v7802_v0, %v7797_v38 }
 0x121   :  { %8679 = vst [vmem:[#allocation19_spill] sm:$0xff] %v7868_v6  ;;  %v7873_v63 = vld [vmem:[%s8554_s1 + $0x7f8] sm:$0xff]  ;;  %v7884_v60 = vld [vmem:[%s8554_s1 + $0x770] sm:$0xff]  ;;  %v119_v19 = vld [vmem:[%s8553_s0 + $0xe8] sm:$0xff]  ;;  %v1205_v53 = vrot.slane %v1204_v55, 1  ;;  %5077 = vmatprep.subr.bf16.mxu0 %v5076_v14 }
 0x122   :  { %8680 = vst [vmem:[#allocation23_spill] sm:$0xff] %v7873_v63  ;;  %8681 = vst [vmem:[#allocation22_spill] sm:$0xff] %v7884_v60  ;;  %v7889_v23 = vld [vmem:[%s8554_s1 + $0x778] sm:$0xff]  ;;  %v135_v1 = vld [vmem:[%s8553_s0 + $0x168] sm:$0xff]  ;;  %v1094_v31 = vadd.f32 %v1093_v49, %v1092_v41  ;;  %v437_v51 = vadd.f32 %v119_v19, %v103_v20  ;;  %v8683_v20 = vpack.c.bf16 %v7584_v42, %v7579_v35 }
 0x123   :  { %8682 = vst [vmem:[#allocation26_spill] sm:$0xff] %v7889_v23  ;;  %v167_v14 = vld [vmem:[%s8553_s0 + $0x268] sm:$0xff]  ;;  %v1206_v49 = vadd.f32 %v1205_v53, %v1204_v55  ;;  %v549_v46 = vadd.f32 %v151_v8, %v135_v1 }
 0x124   :  { %v183_v11 = vld [vmem:[%s8553_s0 + $0x2e8] sm:$0xff]  ;;  %v1452_v53 = vsel %vm1380_vm5, %v1094_v31, %v1451_v34  ;;  %5079 = vmatpush3.bf16.msra.mxu0 %v5078_v17 }
 0x125   :  { %v199_v37 = vld [vmem:[%s8553_s0 + $0x368] sm:$0xff]  ;;  %v1453_v34 = vsel %vm1382_vm6, %v1206_v49, %v1452_v53  ;;  %5081 = vmatprep.subr.bf16.mxu0 %v5080_v48  ;;  %v661_v6 = vadd.f32 %v183_v11, %v167_v14  ;;  %v438_v49 = vrot.slane %v437_v51, 4  ;;  %v550_v48 = vrot.slane %v549_v46, 4 }
 0x126   :  { %v215_v41 = vld [vmem:[%s8553_s0 + $0x3e8] sm:$0xff]  ;;  %v7967_v7 = vmul.f32 0.0625, %v1453_v34 }
 0x127   :  { %v231_v0 = vld [vmem:[%s8553_s0 + $0x468] sm:$0xff]  ;;  %v773_v63 = vadd.f32 %v215_v41, %v199_v37  ;;  %v662_v17 = vrot.slane %v661_v6, 4  ;;  %v439_v8 = vadd.f32 %v438_v49, %v437_v51  ;;  %v551_v1 = vadd.f32 %v550_v48, %v549_v46  ;;  %v134_v49 = vld [vmem:[%s8553_s0 + $0x160] sm:$0xff] }
 0x128   :  { %v263_v55 = vld [vmem:[%s8553_s0 + $0x568] sm:$0xff]  ;;  %v885_v27 = vadd.f32 %v247_v5, %v231_v0  ;;  %2250 = vmatmul.mubr.f32.vlgmr.msra.gmra.mrb[4].mxu1 %v7967_v7  ;;  %5083 = vmatpush3.bf16.msra.mxu0 %v5082_v15  ;;  %v8685_v46 = vpack.c.bf16 %v7619_v54, %v7614_v45  ;;  %v102_v45 = vld [vmem:[%s8553_s0 + $0x60] sm:$0xff]  ;;  %v8687_v54 = vpack.c.bf16 %v7817_v25, %v7812_v24 }
 0x129   :  { %v295_v47 = vld [vmem:[%s8553_s0 + $0x668] sm:$0xff]  ;;  %v997_v53 = vadd.f32 %v279_v61, %v263_v55  ;;  %v774_v60 = vrot.slane %v773_v63, 4  ;;  %5099 = vmatpush3.bf16.msra.mxu1 %v8683_v20  ;;  %5085 = vmatprep.subr.bf16.mxu0 %v5084_v32  ;;  %v8684_v61 = vpack.c.bf16 %v7608_v36, %v7603_v4  ;;  %v440_v37 = vrot.slane %v439_v8, 2  ;;  %v150_v48 = vld [vmem:[%s8553_s0 + $0x1e0] sm:$0xff] }
 0x12a   :  { %v311_v31 = vld [vmem:[%s8553_s0 + $0x6e8] sm:$0xff]  ;;  %v886_v23 = vrot.slane %v885_v27, 4  ;;  %v552_v41 = vrot.slane %v551_v1, 2  ;;  %v8688_v24 = vpack.c.bf16 %v7660_v18, %v7655_v21  ;;  %v8689_v25 = vpack.c.bf16 %v7853_v44, %v7848_v26  ;;  %v198_v21 = vld [vmem:[%s8553_s0 + $0x360] sm:$0xff] }
 0x12b   :  { %v327_v59 = vld [vmem:[%s8553_s0 + $0x768] sm:$0xff]  ;;  %v1109_v56 = vadd.f32 %v311_v31, %v295_v47  ;;  %v998_v19 = vrot.slane %v997_v53, 4  ;;  %5101 = vmatprep.subr.bf16.mxu1 %v8684_v61  ;;  %v663_v47 = vadd.f32 %v662_v17, %v661_v6  ;;  %v775_v14 = vadd.f32 %v774_v60, %v773_v63  ;;  %v118_v17 = vld [vmem:[%s8553_s0 + $0xe0] sm:$0xff] }
 0x12c   :  { %v343_v38 = vld [vmem:[%s8553_s0 + $0x7e8] sm:$0xff]  ;;  %v887_v15 = vadd.f32 %v886_v23, %v885_v27  ;;  %5087 = vmatpush3.bf16.msra.mxu0 %v5086_v30  ;;  %v441_v4 = vadd.f32 %v440_v37, %v439_v8  ;;  %v553_v36 = vadd.f32 %v552_v41, %v551_v1  ;;  %v8686_v23 = vpack.c.bf16 %v7649_v62, %v7644_v9 }
 0x12d   :  { %v1221_v28 = vadd.f32 %v343_v38, %v327_v59  ;;  %v1110_v5 = vrot.slane %v1109_v56, 4  ;;  %v999_v59 = vadd.f32 %v998_v19, %v997_v53  ;;  %v664_v35 = vrot.slane %v663_v47, 2  ;;  %5103 = vmatpush3.bf16.msra.mxu1 %v8685_v46  ;;  %5089 = vmatprep.subr.bf16.mxu0 %v5088_v50  ;;  %v166_v19 = vld [vmem:[%s8553_s0 + $0x260] sm:$0xff] }
 0x12e   :  { %v776_v42 = vrot.slane %v775_v14, 2  ;;  %v888_v32 = vrot.slane %v887_v15, 2  ;;  %5105 = vmatprep.subr.bf16.mxu1 %v8686_v23  ;;  %v442_v0 = vrot.slane %v441_v4, 1  ;;  %v554_v55 = vrot.slane %v553_v36, 1 }
 0x12f   :  { %v1222_v11 = vrot.slane %v1221_v28, 4  ;;  %v1111_v38 = vadd.f32 %v1110_v5, %v1109_v56  ;;  %v1000_v6 = vrot.slane %v999_v59, 2  ;;  %v665_v27 = vadd.f32 %v664_v35, %v663_v47  ;;  %v182_v5 = vld [vmem:[%s8553_s0 + $0x2e0] sm:$0xff] }
 0x130   :  { %v777_v56 = vadd.f32 %v776_v42, %v775_v14  ;;  %v889_v30 = vadd.f32 %v888_v32, %v887_v15  ;;  %5091 = vmatpush3.bf16.msra.mxu0 %v8687_v54  ;;  %v443_v53 = vadd.f32 %v442_v0, %v441_v4  ;;  %v555_v20 = vadd.f32 %v554_v55, %v553_v36  ;;  %v214_v14 = vld [vmem:[%s8553_s0 + $0x3e0] sm:$0xff] }
 0x131   :  { %v1223_v51 = vadd.f32 %v1222_v11, %v1221_v28  ;;  %v1112_v60 = vrot.slane %v1111_v38, 2  ;;  %v1001_v28 = vadd.f32 %v1000_v6, %v999_v59  ;;  %v666_v50 = vrot.slane %v665_v27, 1  ;;  %5107 = vmatpush3.bf16.msra.mxu1 %v8688_v24  ;;  %5093 = vmatprep.subr.bf16.mxu0 %v8689_v25  ;;  %v230_v15 = vld [vmem:[%s8553_s0 + $0x460] sm:$0xff] }
 0x132   :  { %v778_v34 = vrot.slane %v777_v56, 1  ;;  %v890_v9 = vrot.slane %v889_v30, 1  ;;  %v8690_v18 = vpack.c.bf16 %v7691_v29, %v7686_v16  ;;  %v246_v11 = vld [vmem:[%s8553_s0 + $0x4e0] sm:$0xff]  ;;  %v1468_v16 = vsel %vm1370_vm0, %v555_v20, %v443_v53 }
 0x133   :  { %v1224_v63 = vrot.slane %v1223_v51, 2  ;;  %v1113_v31 = vadd.f32 %v1112_v60, %v1111_v38  ;;  %v1002_v8 = vrot.slane %v1001_v28, 1  ;;  %v667_v26 = vadd.f32 %v666_v50, %v665_v27  ;;  %v262_v29 = vld [vmem:[%s8553_s0 + $0x560] sm:$0xff] }
 0x134   :  { %5109 = vmatprep.subr.bf16.mxu1 %v8690_v18  ;;  %v779_v44 = vadd.f32 %v778_v34, %v777_v56  ;;  %v891_v61 = vadd.f32 %v890_v9, %v889_v30  ;;  %v278_v59 = vld [vmem:[%s8553_s0 + $0x5e0] sm:$0xff]  ;;  %v430_v38 = vadd.f32 %v118_v17, %v102_v45  ;;  %v8691_v35 = vpack.c.bf16 %v7863_v43, %v7858_v12 }
 0x135   :  { %v1225_v62 = vadd.f32 %v1224_v63, %v1223_v51  ;;  %v1114_v1 = vrot.slane %v1113_v31, 1  ;;  %v1003_v37 = vadd.f32 %v1002_v8, %v1001_v28  ;;  %v1469_v32 = vsel %vm1372_vm1, %v667_v26, %v1468_v16  ;;  %v294_v28 = vld [vmem:[%s8553_s0 + $0x660] sm:$0xff]  ;;  %v105_v16 = vld [vmem:[%s8553_s0 + $0x78] sm:$0xff] }
 0x136   :  { %5095 = vmatpush3.bf16.msra.mxu0 %v8691_v35  ;;  %v542_v51 = vadd.f32 %v150_v48, %v134_v49  ;;  %v654_v46 = vadd.f32 %v182_v5, %v166_v19  ;;  %v8692_v4 = vpack.c.bf16 %v7701_v22, %v7696_v52  ;;  %v1470_v36 = vsel %vm1374_vm2, %v779_v44, %v1469_v32  ;;  %v326_v34 = vld [vmem:[%s8553_s0 + $0x760] sm:$0xff]  ;;  %v153_v35 = vld [vmem:[%s8553_s0 + $0x1f8] sm:$0xff] }
 0x137   :  { %v1226_v47 = vrot.slane %v1225_v62, 1  ;;  %v1115_v41 = vadd.f32 %v1114_v1, %v1113_v31  ;;  %v431_v6 = vrot.slane %v430_v38, 4  ;;  %v766_v60 = vadd.f32 %v214_v14, %v198_v21  ;;  %v342_v9 = vld [vmem:[%s8553_s0 + $0x7e0] sm:$0xff] }
 0x138   :  { %5111 = vmatpush3.bf16.msra.mxu1 %v8692_v4  ;;  %v878_v23 = vadd.f32 %v246_v11, %v230_v15  ;;  %v8693_v27 = vpack.c.bf16 %v7734_v58, %v7729_v3  ;;  %v1471_v12 = vsel %vm1376_vm3, %v891_v61, %v1470_v36  ;;  %v543_v43 = vrot.slane %v542_v51, 4  ;;  %v310_v3 = vld [vmem:[%s8553_s0 + $0x6e0] sm:$0xff]  ;;  %v169_v4 = vld [vmem:[%s8553_s0 + $0x278] sm:$0xff] }
 0x139   :  { %v1227_v42 = vadd.f32 %v1226_v47, %v1225_v62  ;;  %v655_v56 = vrot.slane %v654_v46, 4  ;;  %v990_v30 = vadd.f32 %v278_v59, %v262_v29  ;;  %v1472_v63 = vsel %vm1378_vm4, %v1003_v37, %v1471_v12  ;;  %v8697_v47 = vld [vmem:[#allocation16_spill] sm:$0xff] }
 0x13a   :  { %5113 = vmatprep.subr.bf16.mxu1 %v8693_v27  ;;  %v432_v0 = vadd.f32 %v431_v6, %v430_v38  ;;  %v767_v55 = vrot.slane %v766_v60, 4  ;;  %v879_v52 = vrot.slane %v878_v23, 4  ;;  %v1473_v22 = vsel %vm1380_vm5, %v1115_v41, %v1472_v63  ;;  %v185_v36 = vld [vmem:[%s8553_s0 + $0x2f8] sm:$0xff]  ;;  %v8699_v6 = vld [vmem:[#allocation18_spill] sm:$0xff] }
 0x13b   :  { %v544_v58 = vadd.f32 %v543_v43, %v542_v51  ;;  %v656_v31 = vadd.f32 %v655_v56, %v654_v46  ;;  %v991_v45 = vrot.slane %v990_v30, 4  ;;  %v8694_v54 = vpack.c.bf16 %v7747_v10, %v7742_v39  ;;  %v201_v56 = vld [vmem:[%s8553_s0 + $0x378] sm:$0xff] }
 0x13c   :  { %v1474_v50 = vsel %vm1382_vm6, %v1227_v42, %v1473_v22  ;;  %v433_v62 = vrot.slane %v432_v0, 2  ;;  %v768_v17 = vadd.f32 %v767_v55, %v766_v60  ;;  %v880_v49 = vadd.f32 %v879_v52, %v878_v23  ;;  %v8700_v60 = vld [vmem:[#allocation17_spill] sm:$0xff]  ;;  %v8703_v55 = vld [vmem:[#allocation19_spill] sm:$0xff] }
 0x13d   :  { %5115 = vmatpush3.bf16.msra.mxu1 %v8694_v54  ;;  %v8695_v48 = vpack.c.bf16 %v7782_v33, %v7777_v2  ;;  %v8064_v24 = vmul.f32 0.0625, %v1474_v50  ;;  %v545_v39 = vrot.slane %v544_v58, 2  ;;  %v657_v10 = vrot.slane %v656_v31, 2 }
 0x13e   :  { %v992_v25 = vadd.f32 %v991_v45, %v990_v30  ;;  %v434_v53 = vadd.f32 %v433_v62, %v432_v0  ;;  %v769_v20 = vrot.slane %v768_v17, 2  ;;  %v881_v8 = vrot.slane %v880_v49, 2  ;;  %v217_v30 = vld [vmem:[%s8553_s0 + $0x3f8] sm:$0xff]  ;;  %v8702_v0 = vld [vmem:[#allocation23_spill] sm:$0xff] }
 0x13f   :  { %5117 = vmatprep.subr.bf16.mxu1 %v8695_v48  ;;  %v1102_v1 = vadd.f32 %v310_v3, %v294_v28  ;;  %2319 = vmatprep.mubr.f32.mxu0 %v8064_v24  ;;  %v546_v19 = vadd.f32 %v545_v39, %v544_v58  ;;  %v658_v5 = vadd.f32 %v657_v10, %v656_v31  ;;  %v233_v62 = vld [vmem:[%s8553_s0 + $0x478] sm:$0xff]  ;;  %v8705_v39 = vld [vmem:[#allocation26_spill] sm:$0xff] }
 0x140   :  { %v993_v21 = vrot.slane %v992_v25, 2  ;;  %v1214_v18 = vadd.f32 %v342_v9, %v326_v34  ;;  %v8696_v26 = vpack.c.bf16 %v7792_v13, %v7787_v40  ;;  %v435_v2 = vrot.slane %v434_v53, 1  ;;  %v121_v40 = vld [vmem:[%s8553_s0 + $0xf8] sm:$0xff]  ;;  %v8706_v10 = vld [vmem:[#allocation22_spill] sm:$0xff] }
 0x141   :  { %v770_v33 = vadd.f32 %v769_v20, %v768_v17  ;;  %v882_v44 = vadd.f32 %v881_v8, %v880_v49  ;;  %v1103_v61 = vrot.slane %v1102_v1, 4  ;;  %v8698_v14 = vpack.c.bf16 %v7827_v57, %v8697_v47  ;;  %v137_v57 = vld [vmem:[%s8553_s0 + $0x178] sm:$0xff] }
 0x142   :  { %5119 = vmatpush3.bf16.msra.mxu1 %v8696_v26  ;;  %v547_v15 = vrot.slane %v546_v19, 1  ;;  %v659_v11 = vrot.slane %v658_v5, 1  ;;  %v994_v37 = vadd.f32 %v993_v21, %v992_v25  ;;  %v1215_v41 = vrot.slane %v1214_v18, 4  ;;  %v249_v17 = vld [vmem:[%s8553_s0 + $0x4f8] sm:$0xff] }
 0x143   :  { %5121 = vmatprep.subr.bf16.mxu1 %v8698_v14  ;;  %v436_v13 = vadd.f32 %v435_v2, %v434_v53  ;;  %v771_v29 = vrot.slane %v770_v33, 1  ;;  %v883_v59 = vrot.slane %v882_v44, 1  ;;  %v1104_v38 = vadd.f32 %v1103_v61, %v1102_v1  ;;  %v265_v8 = vld [vmem:[%s8553_s0 + $0x578] sm:$0xff]  ;;  %v8123_v14 = vpop.f32.mrb[0].mxu0 }
 0x144   :  { %v548_v42 = vadd.f32 %v547_v15, %v546_v19  ;;  %v660_v32 = vadd.f32 %v659_v11, %v658_v5  ;;  %v995_v51 = vrot.slane %v994_v37, 1  ;;  %v1216_v46 = vadd.f32 %v1215_v41, %v1214_v18  ;;  %v281_v1 = vld [vmem:[%s8553_s0 + $0x5f8] sm:$0xff] }
 0x145   :  { %v8701_v23 = vpack.c.bf16 %v8699_v6, %v8700_v60  ;;  %v772_v27 = vadd.f32 %v771_v29, %v770_v33  ;;  %v884_v12 = vadd.f32 %v883_v59, %v882_v44  ;;  %v1105_v43 = vrot.slane %v1104_v38, 2  ;;  %v313_v29 = vld [vmem:[%s8553_s0 + $0x6f8] sm:$0xff] }
 0x146   :  { %v451_v63 = vadd.f32 %v121_v40, %v105_v16  ;;  %v8704_v52 = vpack.c.bf16 %v8702_v0, %v8703_v55  ;;  %v996_v22 = vadd.f32 %v995_v51, %v994_v37  ;;  %v1217_v28 = vrot.slane %v1216_v46, 2  ;;  %v8125_v16 = vpop.f32.mrb[1].mxu0 }
 0x147   :  { %5123 = vmatpush3.bf16.msra.mxu1 %v8701_v23  ;;  %v1461_v3 = vsel %vm1370_vm0, %v548_v42, %v436_v13  ;;  %v563_v58 = vadd.f32 %v153_v35, %v137_v57  ;;  %v1106_v31 = vadd.f32 %v1105_v43, %v1104_v38  ;;  %v675_v50 = vadd.f32 %v185_v36, %v169_v4  ;;  %v297_v13 = vld [vmem:[%s8553_s0 + $0x678] sm:$0xff] }
 0x148   :  { %5125 = vmatprep.subr.bf16.mxu1 %v8704_v52  ;;  %v1462_v45 = vsel %vm1372_vm1, %v660_v32, %v1461_v3  ;;  %v452_v54 = vrot.slane %v451_v63, 4  ;;  %v1218_v34 = vadd.f32 %v1217_v28, %v1216_v46  ;;  %v787_v48 = vadd.f32 %v217_v30, %v201_v56  ;;  %v329_v42 = vld [vmem:[%s8553_s0 + $0x778] sm:$0xff]  ;;  %v104_v30 = vld [vmem:[%s8553_s0 + $0x70] sm:$0xff] }
 0x149   :  { %v1463_v9 = vsel %vm1374_vm2, %v772_v27, %v1462_v45  ;;  %v564_v49 = vrot.slane %v563_v58, 4  ;;  %v8707_v25 = vpack.c.bf16 %v8705_v39, %v8706_v10  ;;  %v1107_v53 = vrot.slane %v1106_v31, 1  ;;  %v345_v32 = vld [vmem:[%s8553_s0 + $0x7f8] sm:$0xff]  ;;  %v168_v10 = vld [vmem:[%s8553_s0 + $0x270] sm:$0xff] }
 0x14a   :  { %v1464_v20 = vsel %vm1376_vm3, %v884_v12, %v1463_v9  ;;  %v453_v19 = vadd.f32 %v452_v54, %v451_v63  ;;  %v676_v5 = vrot.slane %v675_v50, 4  ;;  %v1219_v21 = vrot.slane %v1218_v34, 1  ;;  %v120_v63 = vld [vmem:[%s8553_s0 + $0xf0] sm:$0xff] }
 0x14b   :  { %5127 = vmatpush3.bf16.msra.mxu1 %v8707_v25  ;;  %v1465_v18 = vsel %vm1378_vm4, %v996_v22, %v1464_v20  ;;  %v565_v26 = vadd.f32 %v564_v49, %v563_v58  ;;  %v788_v2 = vrot.slane %v787_v48, 4  ;;  %v1108_v33 = vadd.f32 %v1107_v53, %v1106_v31  ;;  %v152_v9 = vld [vmem:[%s8553_s0 + $0x1f0] sm:$0xff] }
 0x14c   :  { %v454_v44 = vrot.slane %v453_v19, 2  ;;  %v677_v61 = vadd.f32 %v676_v5, %v675_v50  ;;  %v899_v47 = vadd.f32 %v249_v17, %v233_v62  ;;  %v1220_v15 = vadd.f32 %v1219_v21, %v1218_v34  ;;  %v136_v34 = vld [vmem:[%s8553_s0 + $0x170] sm:$0xff] }
 0x14d   :  { %v566_v11 = vrot.slane %v565_v26, 2  ;;  %v789_v37 = vadd.f32 %v788_v2, %v787_v48  ;;  %v1011_v41 = vadd.f32 %v281_v1, %v265_v8  ;;  %v1466_v40 = vsel %vm1380_vm5, %v1108_v33, %v1465_v18  ;;  %v184_v25 = vld [vmem:[%s8553_s0 + $0x2f0] sm:$0xff] }
 0x14e   :  { %v455_v59 = vadd.f32 %v454_v44, %v453_v19  ;;  %v678_v38 = vrot.slane %v677_v61, 2  ;;  %v900_v57 = vrot.slane %v899_v47, 4  ;;  %v1467_v35 = vsel %vm1382_vm6, %v1220_v15, %v1466_v40  ;;  %v200_v1 = vld [vmem:[%s8553_s0 + $0x370] sm:$0xff] }
 0x14f   :  { %v567_v51 = vadd.f32 %v566_v11, %v565_v26  ;;  %v790_v46 = vrot.slane %v789_v37, 2  ;;  %v1012_v4 = vrot.slane %v1011_v41, 4  ;;  %v8141_v36 = vmul.f32 0.0625, %v1467_v35  ;;  %v216_v19 = vld [vmem:[%s8553_s0 + $0x3f0] sm:$0xff] }
 0x150   :  { %v456_v6 = vrot.slane %v455_v59, 1  ;;  %v679_v60 = vadd.f32 %v678_v38, %v677_v61  ;;  %v901_v23 = vadd.f32 %v900_v57, %v899_v47  ;;  %v1123_v56 = vadd.f32 %v313_v29, %v297_v13  ;;  %v264_v38 = vld [vmem:[%s8553_s0 + $0x570] sm:$0xff] }
 0x151   :  { %v568_v27 = vrot.slane %v567_v51, 1  ;;  %v791_v12 = vadd.f32 %v790_v46, %v789_v37  ;;  %v1013_v43 = vadd.f32 %v1012_v4, %v1011_v41  ;;  %2320 = vmatmul.mubr.f32.vlgmr.msra.gmra.mrb[6].mxu0 %v8141_v36  ;;  %v1235_v22 = vadd.f32 %v345_v32, %v329_v42  ;;  %v232_v37 = vld [vmem:[%s8553_s0 + $0x470] sm:$0xff] }
 0x152   :  { %v457_v0 = vadd.f32 %v456_v6, %v455_v59  ;;  %v680_v55 = vrot.slane %v679_v60, 1  ;;  %v902_v52 = vrot.slane %v901_v23, 2  ;;  %v1124_v31 = vrot.slane %v1123_v56, 4  ;;  %v248_v41 = vld [vmem:[%s8553_s0 + $0x4f0] sm:$0xff] }
 0x153   :  { %v569_v28 = vadd.f32 %v568_v27, %v567_v51  ;;  %v792_v3 = vrot.slane %v791_v12, 1  ;;  %v1014_v58 = vrot.slane %v1013_v43, 2  ;;  %v1236_v50 = vrot.slane %v1235_v22, 4  ;;  %v280_v57 = vld [vmem:[%s8553_s0 + $0x5f0] sm:$0xff] }
 0x154   :  { %v681_v45 = vadd.f32 %v680_v55, %v679_v60  ;;  %v903_v54 = vadd.f32 %v902_v52, %v901_v23  ;;  %v444_v62 = vadd.f32 %v120_v63, %v104_v30  ;;  %v1125_v48 = vadd.f32 %v1124_v31, %v1123_v56  ;;  %v344_v31 = vld [vmem:[%s8553_s0 + $0x7f0] sm:$0xff] }
 0x155   :  { %v793_v17 = vadd.f32 %v792_v3, %v791_v12  ;;  %v1015_v49 = vadd.f32 %v1014_v58, %v1013_v43  ;;  %v1482_v39 = vsel %vm1370_vm0, %v569_v28, %v457_v0  ;;  %v1237_v20 = vadd.f32 %v1236_v50, %v1235_v22  ;;  %v296_v0 = vld [vmem:[%s8553_s0 + $0x670] sm:$0xff] }
 0x156   :  { %v904_v53 = vrot.slane %v903_v54, 1  ;;  %v1483_v8 = vsel %vm1372_vm1, %v681_v45, %v1482_v39  ;;  %v445_v5 = vrot.slane %v444_v62, 4  ;;  %v1126_v18 = vrot.slane %v1125_v48, 2  ;;  %v312_v3 = vld [vmem:[%s8553_s0 + $0x6f0] sm:$0xff] }
 0x157   :  { %v1016_v21 = vrot.slane %v1015_v49, 1  ;;  %v1484_v26 = vsel %vm1374_vm2, %v793_v17, %v1483_v8  ;;  %v556_v2 = vadd.f32 %v152_v9, %v136_v34  ;;  %v1238_v44 = vrot.slane %v1237_v20, 2  ;;  %v328_v58 = vld [vmem:[%s8553_s0 + $0x770] sm:$0xff] }
 0x158   :  { %v905_v33 = vadd.f32 %v904_v53, %v903_v54  ;;  %v446_v61 = vadd.f32 %v445_v5, %v444_v62  ;;  %v668_v47 = vadd.f32 %v184_v25, %v168_v10  ;;  %v1127_v11 = vadd.f32 %v1126_v18, %v1125_v48 }
 0x159   :  { %v1017_v15 = vadd.f32 %v1016_v21, %v1015_v49  ;;  %v557_v40 = vrot.slane %v556_v2, 4  ;;  %v780_v13 = vadd.f32 %v216_v19, %v200_v1  ;;  %v1239_v29 = vadd.f32 %v1238_v44, %v1237_v20 }
 0x15a   :  { %v1485_v59 = vsel %vm1376_vm3, %v905_v33, %v1484_v26  ;;  %v447_v35 = vrot.slane %v446_v61, 2  ;;  %v669_v42 = vrot.slane %v668_v47, 4  ;;  %v1128_v32 = vrot.slane %v1127_v11, 1 }
 0x15b   :  { %v1486_v51 = vsel %vm1378_vm4, %v1017_v15, %v1485_v59  ;;  %v558_v46 = vadd.f32 %v557_v40, %v556_v2  ;;  %v781_v4 = vrot.slane %v780_v13, 4  ;;  %v1240_v6 = vrot.slane %v1239_v29, 1 }
 0x15c   :  { %v448_v60 = vadd.f32 %v447_v35, %v446_v61  ;;  %v670_v23 = vadd.f32 %v669_v42, %v668_v47  ;;  %v892_v27 = vadd.f32 %v248_v41, %v232_v37  ;;  %v1129_v12 = vadd.f32 %v1128_v32, %v1127_v11  ;;  %v4310_v42 = vld [vmem:[%s8555_s2] ss:$0 sm:$0xff] }
 0x15d   :  { %v559_v43 = vrot.slane %v558_v46, 2  ;;  %v782_v56 = vadd.f32 %v781_v4, %v780_v13  ;;  %v1004_v30 = vadd.f32 %v280_v57, %v264_v38  ;;  %v1241_v63 = vadd.f32 %v1240_v6, %v1239_v29 }
 0x15e   :  { %v449_v55 = vrot.slane %v448_v60, 1  ;;  %v671_v52 = vrot.slane %v670_v23, 2  ;;  %v893_v22 = vrot.slane %v892_v27, 4  ;;  %v1487_v28 = vsel %vm1380_vm5, %v1129_v12, %v1486_v51 }
 0x15f   :  { %v560_v45 = vadd.f32 %v559_v43, %v558_v46  ;;  %v783_v54 = vrot.slane %v782_v56, 2  ;;  %v1005_v50 = vrot.slane %v1004_v30, 4  ;;  %v1488_v34 = vsel %vm1382_vm6, %v1241_v63, %v1487_v28  ;;  %v2415_v28 = vld [vmem:[#allocation3 + $0x98] sm:$0xff] }
 0x160   :  { %v450_v9 = vadd.f32 %v449_v55, %v448_v60  ;;  %v672_v62 = vadd.f32 %v671_v52, %v670_v23  ;;  %v894_v17 = vadd.f32 %v893_v22, %v892_v27  ;;  %v8199_v49 = vmul.f32 0.0625, %v1488_v34  ;;  %v4379_v23 = vpop.f32.mrb[0].mxu1  ;;  %v2413_v55 = vld [vmem:[#allocation3 + $0x88] sm:$0xff]  ;;  %v2399_v52 = vld [vmem:[#allocation3 + $0x18] sm:$0xff] }
 0x161   :  { %v561_v48 = vrot.slane %v560_v45, 1  ;;  %v784_v39 = vadd.f32 %v783_v54, %v782_v56  ;;  %v1006_v10 = vadd.f32 %v1005_v50, %v1004_v30  ;;  %v1116_v20 = vadd.f32 %v312_v3, %v296_v0  ;;  %v4380_v27 = vpop.f32.mrb[1].mxu1  ;;  %v2397_v0 = vld [vmem:[#allocation3 + $0x8] sm:$0xff]  ;;  %v2396_v3 = vld [vmem:[#allocation3] sm:$0xff]  ;;  %v2398_v54 = vld [vmem:[#allocation3 + $0x10] sm:$0xff] }
 0x162   :  { %v673_v25 = vrot.slane %v672_v62, 1  ;;  %v895_v53 = vrot.slane %v894_v17, 2  ;;  %v1228_v8 = vadd.f32 %v344_v31, %v328_v58  ;;  %2389 = vmatprep.mubr.f32.mxu1 %v8199_v49  ;;  %v4346_v21 = vadd.f32 %v8125_v16, %v8123_v14  ;;  %v2412_v58 = vld [vmem:[#allocation3 + $0x80] sm:$0xff]  ;;  %v2414_v50 = vld [vmem:[#allocation3 + $0x90] sm:$0xff]  ;;  %v2429_v34 = vld [vmem:[#allocation3 + $0x108] sm:$0xff] }
 0x163   :  { %v562_v1 = vadd.f32 %v561_v48, %v560_v45  ;;  %v785_v19 = vrot.slane %v784_v39, 1  ;;  %v1007_v5 = vrot.slane %v1006_v10, 2  ;;  %v1117_v2 = vrot.slane %v1116_v20, 4  ;;  %v2447_v48 = vld [vmem:[#allocation3 + $0x198] sm:$0xff] }
 0x164   :  { %v674_v18 = vadd.f32 %v673_v25, %v672_v62  ;;  %v896_v26 = vadd.f32 %v895_v53, %v894_v17  ;;  %v1229_v33 = vrot.slane %v1228_v8, 4  ;;  %v1902_v60 = vadd.f32 %v4346_v21, %v4310_v42  ;;  %v2445_v62 = vld [vmem:[#allocation3 + $0x188] sm:$0xff]  ;;  %v2431_v17 = vld [vmem:[#allocation3 + $0x118] sm:$0xff]  ;;  %v2428_v25 = vld [vmem:[#allocation3 + $0x100] sm:$0xff] }
 0x165   :  { %v786_v44 = vadd.f32 %v785_v19, %v784_v39  ;;  %v1008_v61 = vadd.f32 %v1007_v5, %v1006_v10  ;;  %v1475_v47 = vsel %vm1370_vm0, %v562_v1, %v450_v9  ;;  %v1118_v11 = vadd.f32 %v1117_v2, %v1116_v20  ;;  %v2444_v53 = vld [vmem:[#allocation3 + $0x180] sm:$0xff]  ;;  %v2430_v20 = vld [vmem:[#allocation3 + $0x110] sm:$0xff]  ;;  %v2461_v19 = vld [vmem:[#allocation3 + $0x208] sm:$0xff] }
 0x166   :  { %v897_v15 = vrot.slane %v896_v26, 1  ;;  %v1230_v37 = vadd.f32 %v1229_v33, %v1228_v8  ;;  %v1476_v41 = vsel %vm1372_vm1, %v674_v18, %v1475_v47  ;;  %v4381_v43 = vadd.f32 %v4380_v27, %v4379_v23  ;;  %v2446_v1 = vld [vmem:[#allocation3 + $0x190] sm:$0xff]  ;;  %v2477_v5 = vld [vmem:[#allocation3 + $0x288] sm:$0xff]  ;;  %v2479_v2 = vld [vmem:[#allocation3 + $0x298] sm:$0xff] }
 0x167   :  { %v1009_v40 = vrot.slane %v1008_v61, 1  ;;  %v1477_v13 = vsel %vm1374_vm2, %v786_v44, %v1476_v41  ;;  %v1119_v59 = vrot.slane %v1118_v11, 2  ;;  %v5128_v22 = vpack.c.bf16 %v2413_v55, %v2397_v0  ;;  %v2460_v33 = vld [vmem:[#allocation3 + $0x200] sm:$0xff]  ;;  %v2462_v47 = vld [vmem:[#allocation3 + $0x210] sm:$0xff]  ;;  %v2509_v41 = vld [vmem:[#allocation3 + $0x388] sm:$0xff] }
 0x168   :  { %v898_v29 = vadd.f32 %v897_v15, %v896_v26  ;;  %v1231_v38 = vrot.slane %v1230_v37, 2  ;;  %v8216_v63 = vadd.f32 %v4381_v43, %v1902_v60  ;;  %v5160_v31 = vpack.c.bf16 %v2415_v28, %v2399_v52  ;;  %v2463_v26 = vld [vmem:[#allocation3 + $0x218] sm:$0xff]  ;;  %v2478_v15 = vld [vmem:[#allocation3 + $0x290] sm:$0xff]  ;;  %v2525_v42 = vld [vmem:[#allocation3 + $0x408] sm:$0xff] }
 0x169   :  { %v1010_v14 = vadd.f32 %v1009_v40, %v1008_v61  ;;  %v1120_v16 = vadd.f32 %v1119_v59, %v1118_v11  ;;  %v5130_v45 = vpack.c.bf16 %v2412_v58, %v2396_v3  ;;  %5129 = vmatprep.subr.bf16.mxu0 %v5128_v22  ;;  %v5162_v9 = vpack.c.bf16 %v2414_v50, %v2398_v54  ;;  %v2476_v61 = vld [vmem:[#allocation3 + $0x280] sm:$0xff]  ;;  %v2495_v40 = vld [vmem:[#allocation3 + $0x318] sm:$0xff]  ;;  %v2557_v0 = vld [vmem:[#allocation3 + $0x508] sm:$0xff] }
 0x16a   :  { %v1232_v57 = vadd.f32 %v1231_v38, %v1230_v37  ;;  %v1478_v35 = vsel %vm1376_vm3, %v898_v29, %v1477_v13  ;;  %5161 = vmatprep.subr.bf16.mxu1 %v5160_v31  ;;  %v5132_v39 = vpack.c.bf16 %v2445_v62, %v2429_v34  ;;  %v5164_v10 = vpack.c.bf16 %v2447_v48, %v2431_v17  ;;  %v2493_v37 = vld [vmem:[#allocation3 + $0x308] sm:$0xff]  ;;  %v2511_v59 = vld [vmem:[#allocation3 + $0x398] sm:$0xff]  ;;  %v2492_v38 = vld [vmem:[#allocation3 + $0x300] sm:$0xff] }
 0x16b   :  { %v1121_v32 = vrot.slane %v1120_v16, 1  ;;  %v1479_v46 = vsel %vm1378_vm4, %v1010_v14, %v1478_v35  ;;  %5131 = vmatpush1.bf16.msra.mxu0 %v5130_v45  ;;  %v5134_v8 = vpack.c.bf16 %v2444_v53, %v2428_v25  ;;  %v5166_v21 = vpack.c.bf16 %v2446_v1, %v2430_v20  ;;  %v2508_v14 = vld [vmem:[#allocation3 + $0x380] sm:$0xff]  ;;  %v2510_v35 = vld [vmem:[#allocation3 + $0x390] sm:$0xff]  ;;  %v2573_v55 = vld [vmem:[#allocation3 + $0x588] sm:$0xff] }
 0x16c   :  { %v1233_v51 = vrot.slane %v1232_v57, 1  ;;  %5133 = vmatprep.subr.bf16.mxu0 %v5132_v39  ;;  %v5136_v18 = vpack.c.bf16 %v2477_v5, %v2461_v19  ;;  %v5168_v44 = vpack.c.bf16 %v2479_v2, %v2463_v26  ;;  %v5138_v11 = vpack.c.bf16 %v2476_v61, %v2460_v33  ;;  %v2524_v23 = vld [vmem:[#allocation3 + $0x400] sm:$0xff]  ;;  %v2559_v52 = vld [vmem:[#allocation3 + $0x518] sm:$0xff]  ;;  %v2574_v62 = vld [vmem:[#allocation3 + $0x590] sm:$0xff] }
 0x16d   :  { %v1122_v4 = vadd.f32 %v1121_v32, %v1120_v16  ;;  %v5170_v13 = vpack.c.bf16 %v2478_v15, %v2462_v47  ;;  %v5140_v29 = vpack.c.bf16 %v2509_v41, %v2493_v37  ;;  %v5172_v16 = vpack.c.bf16 %v2511_v59, %v2495_v40  ;;  %v2541_v32 = vld [vmem:[#allocation3 + $0x488] sm:$0xff]  ;;  %v2540_v27 = vld [vmem:[#allocation3 + $0x480] sm:$0xff]  ;;  %v2575_v22 = vld [vmem:[#allocation3 + $0x598] sm:$0xff] }
 0x16e   :  { %v1234_v6 = vadd.f32 %v1233_v51, %v1232_v57  ;;  %v2494_v57 = vld [vmem:[#allocation3 + $0x310] sm:$0xff]  ;;  %v2527_v51 = vld [vmem:[#allocation3 + $0x418] sm:$0xff]  ;;  %v5144_v60 = vpack.c.bf16 %v2541_v32, %v2525_v42  ;;  %v5146_v28 = vpack.c.bf16 %v2540_v27, %v2524_v23  ;;  %v5148_v31 = vpack.c.bf16 %v2573_v55, %v2557_v0  ;;  %v2556_v45 = vld [vmem:[#allocation3 + $0x500] sm:$0xff] }
 0x16f   :  { %v1480_v12 = vsel %vm1380_vm5, %v1122_v4, %v1479_v46  ;;  %5135 = vmatpush1.bf16.msra.mxu0 %v5134_v8  ;;  %v2543_v46 = vld [vmem:[#allocation3 + $0x498] sm:$0xff]  ;;  %v5142_v4 = vpack.c.bf16 %v2508_v14, %v2492_v38  ;;  %v2572_v54 = vld [vmem:[#allocation3 + $0x580] sm:$0xff]  ;;  %v5180_v34 = vpack.c.bf16 %v2575_v22, %v2559_v52  ;;  %v2589_v1 = vld [vmem:[#allocation3 + $0x608] sm:$0xff] }
 0x170   :  { %v1481_v56 = vsel %vm1382_vm6, %v1234_v6, %v1480_v12  ;;  %5137 = vmatprep.subr.bf16.mxu0 %v5136_v18  ;;  %v5174_v6 = vpack.c.bf16 %v2510_v35, %v2494_v57  ;;  %v2526_v12 = vld [vmem:[#allocation3 + $0x410] sm:$0xff]  ;;  %v5176_v43 = vpack.c.bf16 %v2543_v46, %v2527_v51  ;;  %v5150_v48 = vpack.c.bf16 %v2572_v54, %v2556_v45  ;;  %v2605_v19 = vld [vmem:[#allocation3 + $0x688] sm:$0xff]  ;;  %v2591_v5 = vld [vmem:[#allocation3 + $0x618] sm:$0xff] }
 0x171   :  { %v8214_v30 = vmul.f32 0.0625, %v1481_v56  ;;  %v2542_v56 = vld [vmem:[#allocation3 + $0x490] sm:$0xff]  ;;  %v2607_v18 = vld [vmem:[#allocation3 + $0x698] sm:$0xff]  ;;  %v2588_v26 = vld [vmem:[#allocation3 + $0x600] sm:$0xff] }
 0x172   :  { %v5178_v58 = vpack.c.bf16 %v2542_v56, %v2526_v12  ;;  %v2604_v2 = vld [vmem:[#allocation3 + $0x680] sm:$0xff]  ;;  %v5184_v33 = vpack.c.bf16 %v2607_v18, %v2591_v5  ;;  %v2606_v61 = vld [vmem:[#allocation3 + $0x690] sm:$0xff]  ;;  %v2621_v15 = vld [vmem:[#allocation3 + $0x708] sm:$0xff] }
 0x173   :  { %2390 = vmatmul.mubr.f32.vlgmr.msra.gmra.mrb[6].mxu1 %v8214_v30  ;;  %5139 = vmatpush1.bf16.msra.mxu0 %v5138_v11  ;;  %v2637_v11 = vld [vmem:[#allocation3 + $0x788] sm:$0xff]  ;;  %v2623_v37 = vld [vmem:[#allocation3 + $0x718] sm:$0xff]  ;;  %v2622_v14 = vld [vmem:[#allocation3 + $0x710] sm:$0xff] }
 0x174   :  { %5163 = vmatpush1.bf16.msra.mxu1 %v5162_v9  ;;  %5141 = vmatprep.subr.bf16.mxu0 %v5140_v29  ;;  %v2558_v9 = vld [vmem:[#allocation3 + $0x510] sm:$0xff]  ;;  %v5156_v41 = vpack.c.bf16 %v2637_v11, %v2621_v15  ;;  %v2639_v40 = vld [vmem:[#allocation3 + $0x798] sm:$0xff]  ;;  %v2636_v29 = vld [vmem:[#allocation3 + $0x780] sm:$0xff] }
 0x175   :  { %5165 = vmatprep.subr.bf16.mxu1 %v5164_v10  ;;  %v5182_v10 = vpack.c.bf16 %v2574_v62, %v2558_v9  ;;  %v5188_v59 = vpack.c.bf16 %v2639_v40, %v2623_v37  ;;  %v2401_v35 = vld [vmem:[#allocation3 + $0x28] sm:$0xff]  ;;  %v2403_v32 = vld [vmem:[#allocation3 + $0x38] sm:$0xff]  ;;  %v2400_v45 = vld [vmem:[#allocation3 + $0x20] sm:$0xff] }
 0x176   :  { %v2417_v42 = vld [vmem:[#allocation3 + $0xa8] sm:$0xff]  ;;  %v2419_v46 = vld [vmem:[#allocation3 + $0xb8] sm:$0xff]  ;;  %v2416_v54 = vld [vmem:[#allocation3 + $0xa0] sm:$0xff] }
 0x177   :  { %5143 = vmatpush1.bf16.msra.mxu0 %v5142_v4  ;;  %v5192_v51 = vpack.c.bf16 %v2417_v42, %v2401_v35  ;;  %v5763_v4 = vmov 0.0   ;;  %v2418_v9 = vld [vmem:[#allocation3 + $0xb0] sm:$0xff]  ;;  %v2433_v62 = vld [vmem:[#allocation3 + $0x128] sm:$0xff]  ;;  %v2480_v15 = vld [vmem:[#allocation3 + $0x2a0] sm:$0xff] }
 0x178   :  { %5167 = vmatpush1.bf16.msra.mxu1 %v5166_v21  ;;  %5145 = vmatprep.subr.bf16.mxu0 %v5144_v60  ;;  %v5152_v21 = vpack.c.bf16 %v2605_v19, %v2589_v1  ;;  %v2450_v18 = vld [vmem:[#allocation3 + $0x1b0] sm:$0xff]  ;;  %v2512_v35 = vld [vmem:[#allocation3 + $0x3a0] sm:$0xff] }
 0x179   :  { %5169 = vmatprep.subr.bf16.mxu1 %v5168_v44  ;;  %v5154_v44 = vpack.c.bf16 %v2604_v2, %v2588_v26  ;;  %2800 = vmatprep.mubr.f32.mxu0 %v5763_v4  ;;  %v2465_v26 = vld [vmem:[#allocation3 + $0x228] sm:$0xff]  ;;  %v2482_v40 = vld [vmem:[#allocation3 + $0x2b0] sm:$0xff] }
 0x17a   :  { %2871 = vmatprep.mubr.f32.mxu1 %v5763_v4  ;;  %v2481_v2 = vld [vmem:[#allocation3 + $0x2a8] sm:$0xff] }
 0x17b   :  { %5147 = vmatpush1.bf16.msra.mxu0 %v5146_v28  ;;  %v5200_v11 = vpack.c.bf16 %v2481_v2, %v2465_v26  ;;  %v2594_v2 = vld [vmem:[#allocation3 + $0x630] sm:$0xff] }
 0x17c   :  { %5171 = vmatpush1.bf16.msra.mxu1 %v5170_v13  ;;  %5149 = vmatprep.subr.bf16.mxu0 %v5148_v31  ;;  %v2620_v13 = vld [vmem:[#allocation3 + $0x700] sm:$0xff] }
 0x17d   :  { %5173 = vmatprep.subr.bf16.mxu1 %v5172_v16  ;;  %v5158_v38 = vpack.c.bf16 %v2636_v29, %v2620_v13  ;;  %v2638_v16 = vld [vmem:[#allocation3 + $0x790] sm:$0xff]  ;;  %v2497_v13 = vld [vmem:[#allocation3 + $0x328] sm:$0xff] }
 0x17e   :  { %v5190_v57 = vpack.c.bf16 %v2638_v16, %v2622_v14  ;;  %v2513_v29 = vld [vmem:[#allocation3 + $0x3a8] sm:$0xff] }
 0x17f   :  { %5151 = vmatpush1.bf16.msra.mxu0 %v5150_v48  ;;  %v2435_v48 = vld [vmem:[#allocation3 + $0x138] sm:$0xff]  ;;  %v5204_v42 = vpack.c.bf16 %v2513_v29, %v2497_v13  ;;  %v2626_v29 = vld [vmem:[#allocation3 + $0x730] sm:$0xff] }
 0x180   :  { %5175 = vmatpush1.bf16.msra.mxu1 %v5174_v6  ;;  %5153 = vmatprep.subr.bf16.mxu0 %v5152_v21  ;;  %v5224_v6 = vpack.c.bf16 %v2419_v46, %v2403_v32  ;;  %v2434_v21 = vld [vmem:[#allocation3 + $0x130] sm:$0xff] }
 0x181   :  { %5177 = vmatprep.subr.bf16.mxu1 %v5176_v43  ;;  %v2514_v46 = vld [vmem:[#allocation3 + $0x3b0] sm:$0xff] }
 0x183   :  { %5155 = vmatpush1.bf16.msra.mxu0 %v5154_v44  ;;  %v2483_v44 = vld [vmem:[#allocation3 + $0x2b8] sm:$0xff] }
 0x184   :  { %5179 = vmatpush1.bf16.msra.mxu1 %v5178_v58  ;;  %5157 = vmatprep.subr.bf16.mxu0 %v5156_v41  ;;  %v2466_v41 = vld [vmem:[#allocation3 + $0x230] sm:$0xff] }
 0x185   :  { %5181 = vmatprep.subr.bf16.mxu1 %v5180_v34  ;;  %v2402_v34 = vld [vmem:[#allocation3 + $0x30] sm:$0xff]  ;;  %v5234_v16 = vpack.c.bf16 %v2482_v40, %v2466_v41  ;;  %v2640_v41 = vld [vmem:[#allocation3 + $0x7a0] sm:$0xff] }
 0x187   :  { %5159 = vmatpush1.bf16.msra.mxu0 %v5158_v38  ;;  %v2515_v38 = vld [vmem:[#allocation3 + $0x3b8] sm:$0xff] }
 0x188   :  { %5183 = vmatpush1.bf16.msra.mxu1 %v5182_v10  ;;  %5193 = vmatprep.subr.bf16.mxu0 %v5192_v51  ;;  %v2498_v51 = vld [vmem:[#allocation3 + $0x330] sm:$0xff] }
 0x189   :  { %5185 = vmatprep.subr.bf16.mxu1 %v5184_v33  ;;  %v2467_v33 = vld [vmem:[#allocation3 + $0x238] sm:$0xff] }
 0x18a   :  { %v5232_v37 = vpack.c.bf16 %v2483_v44, %v2467_v33  ;;  %v2610_v33 = vld [vmem:[#allocation3 + $0x6b0] sm:$0xff]  ;;  %v2625_v44 = vld [vmem:[#allocation3 + $0x728] sm:$0xff] }
 0x18c   :  { %v4414_v3 = vpop.f32.mrb[2].mxu0 }
 0x18d   :  { %v4415_v50 = vpop.f32.mrb[3].mxu0 }
 0x18e   :  { %v4416_v17 = vadd.f32 %v4415_v50, %v4414_v3 }
 0x190   :  { %v2042_v39 = vadd.f32 %v4416_v17, %v8216_v63  ;;  %v2590_v63 = vld [vmem:[#allocation3 + $0x610] sm:$0xff]  ;;  %v2449_v17 = vld [vmem:[#allocation3 + $0x1a8] sm:$0xff] }
 0x191   :  { %v5186_v47 = vpack.c.bf16 %v2606_v61, %v2590_v63  ;;  %v5196_v19 = vpack.c.bf16 %v2449_v17, %v2433_v62  ;;  %v5230_v61 = vpack.c.bf16 %v2450_v18, %v2434_v21  ;;  %v2608_v21 = vld [vmem:[#allocation3 + $0x6a0] sm:$0xff] }
 0x193   :  { %5187 = vmatpush1.bf16.msra.mxu1 %v5186_v47  ;;  %v2464_v47 = vld [vmem:[#allocation3 + $0x220] sm:$0xff] }
 0x194   :  { %5189 = vmatprep.subr.bf16.mxu1 %v5188_v59  ;;  %v2499_v59 = vld [vmem:[#allocation3 + $0x338] sm:$0xff]  ;;  %v5202_v14 = vpack.c.bf16 %v2480_v15, %v2464_v47 }
 0x195   :  { %v5236_v32 = vpack.c.bf16 %v2515_v38, %v2499_v59  ;;  %v2643_v47 = vld [vmem:[#allocation3 + $0x7b8] sm:$0xff]  ;;  %v2642_v59 = vld [vmem:[#allocation3 + $0x7b0] sm:$0xff]  ;;  %v2405_v38 = vld [vmem:[#allocation3 + $0x48] sm:$0xff] }
 0x197   :  { %5191 = vmatpush1.bf16.msra.mxu1 %v5190_v57  ;;  %v2496_v57 = vld [vmem:[#allocation3 + $0x320] sm:$0xff] }
 0x198   :  { %5225 = vmatprep.subr.bf16.mxu1 %v5224_v6  ;;  %v2529_v6 = vld [vmem:[#allocation3 + $0x428] sm:$0xff] }
 0x1ae   :  { %v4449_v25 = vpop.f32.mrb[2].mxu1 }
 0x1af   :  { %v4450_v53 = vpop.f32.mrb[3].mxu1 }
 0x1b0   :  { %v4451_v20 = vadd.f32 %v4450_v53, %v4449_v25  ;;  %v5194_v25 = vpack.c.bf16 %v2416_v54, %v2400_v45  ;;  %v5226_v53 = vpack.c.bf16 %v2418_v9, %v2402_v34  ;;  %v2579_v45 = vld [vmem:[#allocation3 + $0x5b8] sm:$0xff]  ;;  %v2560_v34 = vld [vmem:[#allocation3 + $0x520] sm:$0xff] }
 0x1b1   :  { %v2576_v9 = vld [vmem:[#allocation3 + $0x5a0] sm:$0xff] }
 0x1b2   :  { %v2112_v8 = vadd.f32 %v4451_v20, %v2042_v39  ;;  %v2451_v39 = vld [vmem:[#allocation3 + $0x1b8] sm:$0xff]  ;;  %v2432_v20 = vld [vmem:[#allocation3 + $0x120] sm:$0xff] }
 0x1b3   :  { %v5228_v5 = vpack.c.bf16 %v2451_v39, %v2435_v48  ;;  %v2562_v48 = vld [vmem:[#allocation3 + $0x530] sm:$0xff] }
 0x1b4   :  { %v2578_v39 = vld [vmem:[#allocation3 + $0x5b0] sm:$0xff] }
 0x1d9   :  { %v4484_v60 = vpop.f32.mrb[4].mxu0 }
 0x1da   :  { %v4485_v23 = vpop.f32.mrb[5].mxu0 }
 0x1db   :  { %v4486_v27 = vadd.f32 %v4485_v23, %v4484_v60  ;;  %v2545_v60 = vld [vmem:[#allocation3 + $0x4a8] sm:$0xff]  ;;  %v2531_v23 = vld [vmem:[#allocation3 + $0x438] sm:$0xff] }
 0x1dd   :  { %v2182_v12 = vadd.f32 %v4486_v27, %v2112_v8  ;;  %v2448_v8 = vld [vmem:[#allocation3 + $0x1a0] sm:$0xff]  ;;  %v2547_v27 = vld [vmem:[#allocation3 + $0x4b8] sm:$0xff] }
 0x1de   :  { %v5198_v63 = vpack.c.bf16 %v2448_v8, %v2432_v20  ;;  %v2611_v20 = vld [vmem:[#allocation3 + $0x6b8] sm:$0xff]  ;;  %v5214_v8 = vpack.c.bf16 %v2576_v9, %v2560_v34 }
 0x1df   :  { %v2487_v34 = vld [vmem:[#allocation3 + $0x2d8] sm:$0xff] }
 0x1fb   :  { %v4519_v43 = vpop.f32.mrb[4].mxu1 }
 0x1fc   :  { %v4520_v56 = vpop.f32.mrb[5].mxu1 }
 0x1fd   :  { %v4521_v0 = vadd.f32 %v4520_v56, %v4519_v43  ;;  %v5238_v43 = vpack.c.bf16 %v2514_v46, %v2498_v51  ;;  %v2528_v56 = vld [vmem:[#allocation3 + $0x420] sm:$0xff] }
 0x1fe   :  { %v2420_v51 = vld [vmem:[#allocation3 + $0xc0] sm:$0xff] }
 0x1ff   :  { %v2252_v55 = vadd.f32 %v4521_v0, %v2182_v12  ;;  %v5206_v12 = vpack.c.bf16 %v2512_v35, %v2496_v57  ;;  %v2544_v0 = vld [vmem:[#allocation3 + $0x4a0] sm:$0xff]  ;;  %v2423_v57 = vld [vmem:[#allocation3 + $0xd8] sm:$0xff] }
 0x200   :  { %v5210_v54 = vpack.c.bf16 %v2544_v0, %v2528_v56  ;;  %v2455_v56 = vld [vmem:[#allocation3 + $0x1d8] sm:$0xff] }
 0x224   :  { %v4554_v52 = vpop.f32.mrb[6].mxu0 }
 0x225   :  { %v4555_v22 = vpop.f32.mrb[7].mxu0 }
 0x226   :  { %v4556_v28 = vadd.f32 %v4555_v22, %v4554_v52  ;;  %v5240_v52 = vpack.c.bf16 %v2547_v27, %v2531_v23  ;;  %v2530_v22 = vld [vmem:[#allocation3 + $0x430] sm:$0xff]  ;;  %v2437_v27 = vld [vmem:[#allocation3 + $0x148] sm:$0xff] }
 0x227   :  { %v2422_v23 = vld [vmem:[#allocation3 + $0xd0] sm:$0xff] }
 0x228   :  { %v2322_v3 = vadd.f32 %v4556_v28, %v2252_v55  ;;  %v5208_v55 = vpack.c.bf16 %v2545_v60, %v2529_v6  ;;  %v2546_v28 = vld [vmem:[#allocation3 + $0x4b0] sm:$0xff] }
 0x229   :  { %v2406_v60 = vld [vmem:[#allocation3 + $0x50] sm:$0xff] }
 0x246   :  { %v4589_v58 = vpop.f32.mrb[6].mxu1 }
 0x247   :  { %v4590_v31 = vpop.f32.mrb[7].mxu1 }
 0x248   :  { %v4591_v50 = vadd.f32 %v4590_v31, %v4589_v58  ;;  %v2577_v58 = vld [vmem:[#allocation3 + $0x5a8] sm:$0xff]  ;;  %v2563_v31 = vld [vmem:[#allocation3 + $0x538] sm:$0xff] }
 0x249   :  { %v5244_v17 = vpack.c.bf16 %v2579_v45, %v2563_v31  ;;  %v2454_v31 = vld [vmem:[#allocation3 + $0x1d0] sm:$0xff]  ;;  %v2469_v45 = vld [vmem:[#allocation3 + $0x248] sm:$0xff] }
 0x24a   :  { %v2392_v10 = vadd.f32 %v4591_v50, %v2322_v3  ;;  %v2561_v3 = vld [vmem:[#allocation3 + $0x528] sm:$0xff]  ;;  %v5242_v50 = vpack.c.bf16 %v2546_v28, %v2530_v22  ;;  %v2452_v22 = vld [vmem:[#allocation3 + $0x1c0] sm:$0xff] }
 0x24b   :  { %v5212_v62 = vpack.c.bf16 %v2577_v58, %v2561_v3  ;;  %v2438_v58 = vld [vmem:[#allocation3 + $0x150] sm:$0xff] }
 0x24c   :  { %v8222_v1 = vmax.f32 %v2392_v10, 0.0  ;;  %v2593_v10 = vld [vmem:[#allocation3 + $0x628] sm:$0xff] }
 0x24e   :  { %2801 = vmatmul.mubr.f32.vlgmr.msra.gmra.mrb[8].mxu0 %v8222_v1  ;;  %2872 = vmatmul.mubr.f32.vlgmr.msra.gmra.mrb[8].mxu1 %v8222_v1 }
 0x24f   :  { %5195 = vmatpush1.bf16.msra.mxu0 %v5194_v25  ;;  %5227 = vmatpush1.bf16.msra.mxu1 %v5226_v53  ;;  %v2609_v25 = vld [vmem:[#allocation3 + $0x6a8] sm:$0xff]  ;;  %v2595_v53 = vld [vmem:[#allocation3 + $0x638] sm:$0xff] }
 0x250   :  { %5197 = vmatprep.subr.bf16.mxu0 %v5196_v19  ;;  %5229 = vmatprep.subr.bf16.mxu1 %v5228_v5  ;;  %v5246_v19 = vpack.c.bf16 %v2578_v39, %v2562_v48  ;;  %v2592_v5 = vld [vmem:[#allocation3 + $0x620] sm:$0xff]  ;;  %v5216_v18 = vpack.c.bf16 %v2609_v25, %v2593_v10  ;;  %v5248_v26 = vpack.c.bf16 %v2611_v20, %v2595_v53  ;;  %v2470_v25 = vld [vmem:[#allocation3 + $0x250] sm:$0xff]  ;;  %v2501_v20 = vld [vmem:[#allocation3 + $0x348] sm:$0xff] }
 0x251   :  { %2942 = vmatprep.mubr.f32.mxu0 %v5763_v4  ;;  %3013 = vmatprep.mubr.f32.mxu1 %v5763_v4  ;;  %v5218_v15 = vpack.c.bf16 %v2608_v21, %v2592_v5  ;;  %v2484_v48 = vld [vmem:[#allocation3 + $0x2c0] sm:$0xff]  ;;  %v2486_v53 = vld [vmem:[#allocation3 + $0x2d0] sm:$0xff]  ;;  %v2519_v5 = vld [vmem:[#allocation3 + $0x3d8] sm:$0xff] }
 0x253   :  { %5199 = vmatpush1.bf16.msra.mxu0 %v5198_v63  ;;  %5231 = vmatpush1.bf16.msra.mxu1 %v5230_v61  ;;  %v2641_v63 = vld [vmem:[#allocation3 + $0x7a8] sm:$0xff]  ;;  %v2627_v61 = vld [vmem:[#allocation3 + $0x738] sm:$0xff] }
 0x254   :  { %5201 = vmatprep.subr.bf16.mxu0 %v5200_v11  ;;  %5233 = vmatprep.subr.bf16.mxu1 %v5232_v37  ;;  %v5250_v11 = vpack.c.bf16 %v2610_v33, %v2594_v2  ;;  %v2624_v37 = vld [vmem:[#allocation3 + $0x720] sm:$0xff]  ;;  %v5220_v40 = vpack.c.bf16 %v2641_v63, %v2625_v44  ;;  %v5252_v13 = vpack.c.bf16 %v2643_v47, %v2627_v61  ;;  %v2502_v63 = vld [vmem:[#allocation3 + $0x350] sm:$0xff]  ;;  %v2533_v47 = vld [vmem:[#allocation3 + $0x448] sm:$0xff] }
 0x255   :  { %v5222_v35 = vpack.c.bf16 %v2640_v41, %v2624_v37  ;;  %v2516_v2 = vld [vmem:[#allocation3 + $0x3c0] sm:$0xff]  ;;  %v2518_v61 = vld [vmem:[#allocation3 + $0x3d0] sm:$0xff]  ;;  %v2551_v37 = vld [vmem:[#allocation3 + $0x4d8] sm:$0xff] }
 0x257   :  { %5203 = vmatpush1.bf16.msra.mxu0 %v5202_v14  ;;  %5235 = vmatpush1.bf16.msra.mxu1 %v5234_v16  ;;  %v2421_v14 = vld [vmem:[#allocation3 + $0xc8] sm:$0xff]  ;;  %v2407_v16 = vld [vmem:[#allocation3 + $0x58] sm:$0xff] }
 0x258   :  { %5205 = vmatprep.subr.bf16.mxu0 %v5204_v42  ;;  %5237 = vmatprep.subr.bf16.mxu1 %v5236_v32  ;;  %v5254_v42 = vpack.c.bf16 %v2642_v59, %v2626_v29  ;;  %v2404_v32 = vld [vmem:[#allocation3 + $0x40] sm:$0xff]  ;;  %v5256_v46 = vpack.c.bf16 %v2421_v14, %v2405_v38  ;;  %v5288_v6 = vpack.c.bf16 %v2423_v57, %v2407_v16  ;;  %v2534_v14 = vld [vmem:[#allocation3 + $0x450] sm:$0xff]  ;;  %v2565_v57 = vld [vmem:[#allocation3 + $0x548] sm:$0xff] }
 0x259   :  { %v5258_v0 = vpack.c.bf16 %v2420_v51, %v2404_v32  ;;  %v2548_v29 = vld [vmem:[#allocation3 + $0x4c0] sm:$0xff]  ;;  %v2550_v16 = vld [vmem:[#allocation3 + $0x4d0] sm:$0xff]  ;;  %v2583_v32 = vld [vmem:[#allocation3 + $0x5d8] sm:$0xff] }
 0x25b   :  { %5207 = vmatpush1.bf16.msra.mxu0 %v5206_v12  ;;  %5239 = vmatpush1.bf16.msra.mxu1 %v5238_v43  ;;  %v2453_v12 = vld [vmem:[#allocation3 + $0x1c8] sm:$0xff]  ;;  %v2439_v43 = vld [vmem:[#allocation3 + $0x158] sm:$0xff] }
 0x25c   :  { %5209 = vmatprep.subr.bf16.mxu0 %v5208_v55  ;;  %5241 = vmatprep.subr.bf16.mxu1 %v5240_v52  ;;  %v5290_v55 = vpack.c.bf16 %v2422_v23, %v2406_v60  ;;  %v2436_v52 = vld [vmem:[#allocation3 + $0x140] sm:$0xff]  ;;  %v5260_v28 = vpack.c.bf16 %v2453_v12, %v2437_v27  ;;  %v5292_v3 = vpack.c.bf16 %v2455_v56, %v2439_v43  ;;  %v2566_v12 = vld [vmem:[#allocation3 + $0x550] sm:$0xff]  ;;  %v2597_v56 = vld [vmem:[#allocation3 + $0x648] sm:$0xff] }
 0x25d   :  { %v5262_v9 = vpack.c.bf16 %v2452_v22, %v2436_v52  ;;  %v2580_v60 = vld [vmem:[#allocation3 + $0x5c0] sm:$0xff]  ;;  %v2582_v43 = vld [vmem:[#allocation3 + $0x5d0] sm:$0xff]  ;;  %v2615_v52 = vld [vmem:[#allocation3 + $0x6d8] sm:$0xff] }
 0x25f   :  { %5211 = vmatpush1.bf16.msra.mxu0 %v5210_v54  ;;  %5243 = vmatpush1.bf16.msra.mxu1 %v5242_v50  ;;  %v2485_v54 = vld [vmem:[#allocation3 + $0x2c8] sm:$0xff]  ;;  %v2471_v50 = vld [vmem:[#allocation3 + $0x258] sm:$0xff] }
 0x260   :  { %5213 = vmatprep.subr.bf16.mxu0 %v5212_v62  ;;  %5245 = vmatprep.subr.bf16.mxu1 %v5244_v17  ;;  %v5294_v62 = vpack.c.bf16 %v2454_v31, %v2438_v58  ;;  %v2468_v17 = vld [vmem:[#allocation3 + $0x240] sm:$0xff]  ;;  %v5264_v39 = vpack.c.bf16 %v2485_v54, %v2469_v45  ;;  %v5296_v10 = vpack.c.bf16 %v2487_v34, %v2471_v50  ;;  %v2598_v54 = vld [vmem:[#allocation3 + $0x650] sm:$0xff]  ;;  %v2629_v34 = vld [vmem:[#allocation3 + $0x748] sm:$0xff] }
 0x261   :  { %v5266_v21 = vpack.c.bf16 %v2484_v48, %v2468_v17  ;;  %v2612_v58 = vld [vmem:[#allocation3 + $0x6c0] sm:$0xff]  ;;  %v2614_v50 = vld [vmem:[#allocation3 + $0x6d0] sm:$0xff]  ;;  %v2647_v17 = vld [vmem:[#allocation3 + $0x7d8] sm:$0xff] }
 0x263   :  { %5215 = vmatpush1.bf16.msra.mxu0 %v5214_v8  ;;  %5247 = vmatpush1.bf16.msra.mxu1 %v5246_v19  ;;  %v2517_v8 = vld [vmem:[#allocation3 + $0x3c8] sm:$0xff]  ;;  %v2503_v19 = vld [vmem:[#allocation3 + $0x358] sm:$0xff] }
 0x264   :  { %5217 = vmatprep.subr.bf16.mxu0 %v5216_v18  ;;  %5249 = vmatprep.subr.bf16.mxu1 %v5248_v26  ;;  %v5298_v18 = vpack.c.bf16 %v2486_v53, %v2470_v25  ;;  %v2500_v26 = vld [vmem:[#allocation3 + $0x340] sm:$0xff]  ;;  %v5268_v33 = vpack.c.bf16 %v2517_v8, %v2501_v20  ;;  %v5300_v44 = vpack.c.bf16 %v2519_v5, %v2503_v19  ;;  %v2630_v8 = vld [vmem:[#allocation3 + $0x750] sm:$0xff]  ;;  %v2409_v5 = vld [vmem:[#allocation3 + $0x68] sm:$0xff] }
 0x265   :  { %v5270_v41 = vpack.c.bf16 %v2516_v2, %v2500_v26  ;;  %v2644_v25 = vld [vmem:[#allocation3 + $0x7c0] sm:$0xff]  ;;  %v2646_v19 = vld [vmem:[#allocation3 + $0x7d0] sm:$0xff]  ;;  %v2427_v26 = vld [vmem:[#allocation3 + $0xf8] sm:$0xff] }
 0x267   :  { %5219 = vmatpush1.bf16.msra.mxu0 %v5218_v15  ;;  %5251 = vmatpush1.bf16.msra.mxu1 %v5250_v11  ;;  %v2549_v15 = vld [vmem:[#allocation3 + $0x4c8] sm:$0xff]  ;;  %v2535_v11 = vld [vmem:[#allocation3 + $0x458] sm:$0xff] }
 0x268   :  { %5221 = vmatprep.subr.bf16.mxu0 %v5220_v40  ;;  %5253 = vmatprep.subr.bf16.mxu1 %v5252_v13  ;;  %v5302_v40 = vpack.c.bf16 %v2518_v61, %v2502_v63  ;;  %v2532_v13 = vld [vmem:[#allocation3 + $0x440] sm:$0xff]  ;;  %v5272_v59 = vpack.c.bf16 %v2549_v15, %v2533_v47  ;;  %v5304_v38 = vpack.c.bf16 %v2551_v37, %v2535_v11  ;;  %v2410_v15 = vld [vmem:[#allocation3 + $0x70] sm:$0xff]  ;;  %v2441_v37 = vld [vmem:[#allocation3 + $0x168] sm:$0xff] }
 0x269   :  { %v5274_v51 = vpack.c.bf16 %v2548_v29, %v2532_v13  ;;  %v2424_v63 = vld [vmem:[#allocation3 + $0xe0] sm:$0xff]  ;;  %v2426_v11 = vld [vmem:[#allocation3 + $0xf0] sm:$0xff]  ;;  %v2459_v13 = vld [vmem:[#allocation3 + $0x1f8] sm:$0xff] }
 0x26b   :  { %5223 = vmatpush1.bf16.msra.mxu0 %v5222_v35  ;;  %5255 = vmatpush1.bf16.msra.mxu1 %v5254_v42  ;;  %v2581_v35 = vld [vmem:[#allocation3 + $0x5c8] sm:$0xff]  ;;  %v2567_v42 = vld [vmem:[#allocation3 + $0x558] sm:$0xff] }
 0x26c   :  { %5257 = vmatprep.subr.bf16.mxu0 %v5256_v46  ;;  %5289 = vmatprep.subr.bf16.mxu1 %v5288_v6  ;;  %v5306_v46 = vpack.c.bf16 %v2550_v16, %v2534_v14  ;;  %v2564_v6 = vld [vmem:[#allocation3 + $0x540] sm:$0xff]  ;;  %v5276_v23 = vpack.c.bf16 %v2581_v35, %v2565_v57  ;;  %v5308_v27 = vpack.c.bf16 %v2583_v32, %v2567_v42  ;;  %v2442_v35 = vld [vmem:[#allocation3 + $0x170] sm:$0xff]  ;;  %v2473_v32 = vld [vmem:[#allocation3 + $0x268] sm:$0xff] }
 0x26d   :  { %v5278_v22 = vpack.c.bf16 %v2580_v60, %v2564_v6  ;;  %v2456_v14 = vld [vmem:[#allocation3 + $0x1e0] sm:$0xff]  ;;  %v2458_v42 = vld [vmem:[#allocation3 + $0x1f0] sm:$0xff]  ;;  %v2491_v6 = vld [vmem:[#allocation3 + $0x2f8] sm:$0xff] }
 0x26e   :  { %2943 = vmatmul.mubr.f32.vlgmr.msra.gmra.mrb[10].mxu0 %v8222_v1  ;;  %3014 = vmatmul.mubr.f32.vlgmr.msra.gmra.mrb[10].mxu1 %v8222_v1 }
 0x26f   :  { %5259 = vmatpush1.bf16.msra.mxu0 %v5258_v0  ;;  %5291 = vmatpush1.bf16.msra.mxu1 %v5290_v55  ;;  %v2613_v0 = vld [vmem:[#allocation3 + $0x6c8] sm:$0xff]  ;;  %v2599_v55 = vld [vmem:[#allocation3 + $0x658] sm:$0xff] }
 0x270   :  { %5261 = vmatprep.subr.bf16.mxu0 %v5260_v28  ;;  %5293 = vmatprep.subr.bf16.mxu1 %v5292_v3  ;;  %v5310_v28 = vpack.c.bf16 %v2582_v43, %v2566_v12  ;;  %v2596_v3 = vld [vmem:[#allocation3 + $0x640] sm:$0xff]  ;;  %v5280_v31 = vpack.c.bf16 %v2613_v0, %v2597_v56  ;;  %v5312_v45 = vpack.c.bf16 %v2615_v52, %v2599_v55  ;;  %v2474_v0 = vld [vmem:[#allocation3 + $0x270] sm:$0xff]  ;;  %v2505_v52 = vld [vmem:[#allocation3 + $0x368] sm:$0xff] }
 0x271   :  { %3084 = vmatprep.mubr.f32.mxu0 %v5763_v4  ;;  %3155 = vmatprep.mubr.f32.mxu1 %v5763_v4  ;;  %v5282_v48 = vpack.c.bf16 %v2612_v58, %v2596_v3  ;;  %v2488_v12 = vld [vmem:[#allocation3 + $0x2e0] sm:$0xff]  ;;  %v2490_v55 = vld [vmem:[#allocation3 + $0x2f0] sm:$0xff]  ;;  %v2523_v3 = vld [vmem:[#allocation3 + $0x3f8] sm:$0xff] }
 0x273   :  { %5263 = vmatpush1.bf16.msra.mxu0 %v5262_v9  ;;  %5295 = vmatpush1.bf16.msra.mxu1 %v5294_v62  ;;  %v2645_v9 = vld [vmem:[#allocation3 + $0x7c8] sm:$0xff]  ;;  %v2631_v62 = vld [vmem:[#allocation3 + $0x758] sm:$0xff] }
 0x274   :  { %5265 = vmatprep.subr.bf16.mxu0 %v5264_v39  ;;  %5297 = vmatprep.subr.bf16.mxu1 %v5296_v10  ;;  %v5314_v39 = vpack.c.bf16 %v2614_v50, %v2598_v54  ;;  %v2628_v10 = vld [vmem:[#allocation3 + $0x740] sm:$0xff]  ;;  %v5284_v53 = vpack.c.bf16 %v2645_v9, %v2629_v34  ;;  %v5316_v20 = vpack.c.bf16 %v2647_v17, %v2631_v62  ;;  %v2506_v9 = vld [vmem:[#allocation3 + $0x370] sm:$0xff]  ;;  %v2537_v17 = vld [vmem:[#allocation3 + $0x468] sm:$0xff] }
 0x275   :  { %v5286_v2 = vpack.c.bf16 %v2644_v25, %v2628_v10  ;;  %v2520_v54 = vld [vmem:[#allocation3 + $0x3e0] sm:$0xff]  ;;  %v2522_v62 = vld [vmem:[#allocation3 + $0x3f0] sm:$0xff]  ;;  %v2555_v10 = vld [vmem:[#allocation3 + $0x4f8] sm:$0xff] }
 0x277   :  { %5267 = vmatpush1.bf16.msra.mxu0 %v5266_v21  ;;  %5299 = vmatpush1.bf16.msra.mxu1 %v5298_v18  ;;  %v2425_v21 = vld [vmem:[#allocation3 + $0xe8] sm:$0xff]  ;;  %v2411_v18 = vld [vmem:[#allocation3 + $0x78] sm:$0xff] }
 0x278   :  { %5269 = vmatprep.subr.bf16.mxu0 %v5268_v33  ;;  %5301 = vmatprep.subr.bf16.mxu1 %v5300_v44  ;;  %v5318_v33 = vpack.c.bf16 %v2646_v19, %v2630_v8  ;;  %v2408_v44 = vld [vmem:[#allocation3 + $0x60] sm:$0xff]  ;;  %v5320_v61 = vpack.c.bf16 %v2425_v21, %v2409_v5  ;;  %v5352_v47 = vpack.c.bf16 %v2427_v26, %v2411_v18  ;;  %v2538_v5 = vld [vmem:[#allocation3 + $0x470] sm:$0xff]  ;;  %v2569_v18 = vld [vmem:[#allocation3 + $0x568] sm:$0xff] }
 0x279   :  { %v5322_v29 = vpack.c.bf16 %v2424_v63, %v2408_v44  ;;  %v2554_v21 = vld [vmem:[#allocation3 + $0x4f0] sm:$0xff]  ;;  %v2585_v26 = vld [vmem:[#allocation3 + $0x5e8] sm:$0xff] }
 0x27a   :  { %v5370_v63 = vpack.c.bf16 %v2554_v21, %v2538_v5  ;;  %v3483_v5 = vld [vmem:[#allocation5 + $0x18] sm:$0xff] }
 0x27b   :  { %5271 = vmatpush1.bf16.msra.mxu0 %v5270_v41  ;;  %5303 = vmatpush1.bf16.msra.mxu1 %v5302_v40  ;;  %v2457_v41 = vld [vmem:[#allocation3 + $0x1e8] sm:$0xff]  ;;  %v2443_v40 = vld [vmem:[#allocation3 + $0x178] sm:$0xff] }
 0x27c   :  { %5273 = vmatprep.subr.bf16.mxu0 %v5272_v59  ;;  %5305 = vmatprep.subr.bf16.mxu1 %v5304_v38  ;;  %v5354_v59 = vpack.c.bf16 %v2426_v11, %v2410_v15  ;;  %v2440_v38 = vld [vmem:[#allocation3 + $0x160] sm:$0xff]  ;;  %v5324_v16 = vpack.c.bf16 %v2457_v41, %v2441_v37  ;;  %v5356_v57 = vpack.c.bf16 %v2459_v13, %v2443_v40  ;;  %v2570_v37 = vld [vmem:[#allocation3 + $0x570] sm:$0xff]  ;;  %v2601_v40 = vld [vmem:[#allocation3 + $0x668] sm:$0xff] }
 0x27d   :  { %v5326_v60 = vpack.c.bf16 %v2456_v14, %v2440_v38  ;;  %v5340_v15 = vpack.c.bf16 %v2585_v26, %v2569_v18  ;;  %v2586_v41 = vld [vmem:[#allocation3 + $0x5f0] sm:$0xff]  ;;  %v2617_v13 = vld [vmem:[#allocation3 + $0x6e8] sm:$0xff]  ;;  %v3515_v26 = vld [vmem:[#allocation5 + $0x118] sm:$0xff] }
 0x27e   :  { %v5374_v14 = vpack.c.bf16 %v2586_v41, %v2570_v37  ;;  %v3514_v18 = vld [vmem:[#allocation5 + $0x110] sm:$0xff]  ;;  %v3485_v37 = vld [vmem:[#allocation5 + $0x28] sm:$0xff] }
 0x27f   :  { %5275 = vmatpush1.bf16.msra.mxu0 %v5274_v51  ;;  %5307 = vmatpush1.bf16.msra.mxu1 %v5306_v46  ;;  %v2489_v51 = vld [vmem:[#allocation3 + $0x2e8] sm:$0xff]  ;;  %v2475_v46 = vld [vmem:[#allocation3 + $0x278] sm:$0xff] }
 0x280   :  { %5277 = vmatprep.subr.bf16.mxu0 %v5276_v23  ;;  %5309 = vmatprep.subr.bf16.mxu1 %v5308_v27  ;;  %v5358_v23 = vpack.c.bf16 %v2458_v42, %v2442_v35  ;;  %v2472_v27 = vld [vmem:[#allocation3 + $0x260] sm:$0xff]  ;;  %v5328_v43 = vpack.c.bf16 %v2489_v51, %v2473_v32  ;;  %v5360_v56 = vpack.c.bf16 %v2491_v6, %v2475_v46  ;;  %v2602_v32 = vld [vmem:[#allocation3 + $0x670] sm:$0xff]  ;;  %v2633_v46 = vld [vmem:[#allocation3 + $0x768] sm:$0xff] }
 0x281   :  { %v5330_v58 = vpack.c.bf16 %v2488_v12, %v2472_v27  ;;  %v5344_v35 = vpack.c.bf16 %v2617_v13, %v2601_v40  ;;  %v2618_v51 = vld [vmem:[#allocation3 + $0x6f0] sm:$0xff]  ;;  %v2649_v6 = vld [vmem:[#allocation3 + $0x7e8] sm:$0xff]  ;;  %v3516_v40 = vld [vmem:[#allocation5 + $0x120] sm:$0xff] }
 0x282   :  { %v5378_v12 = vpack.c.bf16 %v2618_v51, %v2602_v32  ;;  %v3517_v13 = vld [vmem:[#allocation5 + $0x128] sm:$0xff]  ;;  %v3518_v51 = vld [vmem:[#allocation5 + $0x130] sm:$0xff] }
 0x283   :  { %5279 = vmatpush1.bf16.msra.mxu0 %v5278_v22  ;;  %5311 = vmatpush1.bf16.msra.mxu1 %v5310_v28  ;;  %v2521_v22 = vld [vmem:[#allocation3 + $0x3e8] sm:$0xff]  ;;  %v2507_v28 = vld [vmem:[#allocation3 + $0x378] sm:$0xff] }
 0x284   :  { %5281 = vmatprep.subr.bf16.mxu0 %v5280_v31  ;;  %5313 = vmatprep.subr.bf16.mxu1 %v5312_v45  ;;  %v5362_v31 = vpack.c.bf16 %v2490_v55, %v2474_v0  ;;  %v2504_v45 = vld [vmem:[#allocation3 + $0x360] sm:$0xff]  ;;  %v5332_v50 = vpack.c.bf16 %v2521_v22, %v2505_v52  ;;  %v5364_v34 = vpack.c.bf16 %v2523_v3, %v2507_v28  ;;  %v2634_v52 = vld [vmem:[#allocation3 + $0x770] sm:$0xff] }
 0x285   :  { %v5334_v25 = vpack.c.bf16 %v2520_v54, %v2504_v45  ;;  %v2648_v55 = vld [vmem:[#allocation3 + $0x7e0] sm:$0xff]  ;;  %v2650_v22 = vld [vmem:[#allocation3 + $0x7f0] sm:$0xff] }
 0x286   :  { %v5382_v3 = vpack.c.bf16 %v2650_v22, %v2634_v52  ;;  %v3528_v45 = vld [vmem:[#allocation5 + $0x180] sm:$0xff] }
 0x287   :  { %5283 = vmatpush1.bf16.msra.mxu0 %v5282_v48  ;;  %5315 = vmatpush1.bf16.msra.mxu1 %v5314_v39  ;;  %v2553_v48 = vld [vmem:[#allocation3 + $0x4e8] sm:$0xff]  ;;  %v2539_v39 = vld [vmem:[#allocation3 + $0x478] sm:$0xff]  ;;  %v3520_v22 = vld [vmem:[#allocation5 + $0x140] sm:$0xff] }
 0x288   :  { %5285 = vmatprep.subr.bf16.mxu0 %v5284_v53  ;;  %5317 = vmatprep.subr.bf16.mxu1 %v5316_v20  ;;  %v2536_v53 = vld [vmem:[#allocation3 + $0x460] sm:$0xff]  ;;  %v5336_v8 = vpack.c.bf16 %v2553_v48, %v2537_v17  ;;  %v5368_v19 = vpack.c.bf16 %v2555_v10, %v2539_v39  ;;  %v3513_v48 = vld [vmem:[#allocation5 + $0x108] sm:$0xff] }
 0x289   :  { %v2552_v20 = vld [vmem:[#allocation3 + $0x4e0] sm:$0xff] }
 0x28a   :  { %v5338_v44 = vpack.c.bf16 %v2552_v20, %v2536_v53  ;;  %v3512_v17 = vld [vmem:[#allocation5 + $0x100] sm:$0xff]  ;;  %v3530_v53 = vld [vmem:[#allocation5 + $0x190] sm:$0xff] }
 0x28b   :  { %5287 = vmatpush1.bf16.msra.mxu0 %v5286_v2  ;;  %5319 = vmatpush1.bf16.msra.mxu1 %v5318_v33  ;;  %v2571_v2 = vld [vmem:[#allocation3 + $0x578] sm:$0xff]  ;;  %v5418_v10 = vpack.c.bf16 %v3513_v48, %v3512_v17  ;;  %v3522_v48 = vld [vmem:[#allocation5 + $0x150] sm:$0xff] }
 0x28c   :  { %5321 = vmatprep.subr.bf16.mxu0 %v5320_v61  ;;  %5353 = vmatprep.subr.bf16.mxu1 %v5352_v47  ;;  %v2587_v33 = vld [vmem:[#allocation3 + $0x5f8] sm:$0xff]  ;;  %v2568_v61 = vld [vmem:[#allocation3 + $0x560] sm:$0xff] }
 0x28d   :  { %v2584_v47 = vld [vmem:[#allocation3 + $0x5e0] sm:$0xff]  ;;  %v5372_v11 = vpack.c.bf16 %v2587_v33, %v2571_v2  ;;  %v5422_v33 = vpack.c.bf16 %v3515_v26, %v3514_v18  ;;  %v3493_v18 = vld [vmem:[#allocation5 + $0x68] sm:$0xff] }
 0x28e   :  { %3085 = vmatmul.mubr.f32.vlgmr.msra.gmra.mrb[12].mxu0 %v8222_v1  ;;  %3156 = vmatmul.mubr.f32.vlgmr.msra.gmra.mrb[12].mxu1 %v8222_v1  ;;  %v5342_v38 = vpack.c.bf16 %v2584_v47, %v2568_v61  ;;  %v3532_v61 = vld [vmem:[#allocation5 + $0x1a0] sm:$0xff] }
 0x28f   :  { %5323 = vmatpush1.bf16.msra.mxu0 %v5322_v29  ;;  %5355 = vmatpush1.bf16.msra.mxu1 %v5354_v59  ;;  %v2603_v29 = vld [vmem:[#allocation3 + $0x678] sm:$0xff]  ;;  %v3524_v26 = vld [vmem:[#allocation5 + $0x160] sm:$0xff] }
 0x290   :  { %5325 = vmatprep.subr.bf16.mxu0 %v5324_v16  ;;  %5357 = vmatprep.subr.bf16.mxu1 %v5356_v57  ;;  %v2619_v59 = vld [vmem:[#allocation3 + $0x6f8] sm:$0xff]  ;;  %v2600_v16 = vld [vmem:[#allocation3 + $0x660] sm:$0xff] }
 0x291   :  { %3226 = vmatprep.mubr.f32.mxu0 %v5763_v4  ;;  %3297 = vmatprep.mubr.f32.mxu1 %v5763_v4  ;;  %v5366_v4 = vpack.c.bf16 %v2522_v62, %v2506_v9  ;;  %v2616_v57 = vld [vmem:[#allocation3 + $0x6e0] sm:$0xff]  ;;  %v5376_v42 = vpack.c.bf16 %v2619_v59, %v2603_v29  ;;  %v3481_v9 = vld [vmem:[#allocation5 + $0x8] sm:$0xff]  ;;  %v3502_v59 = vld [vmem:[#allocation5 + $0xb0] sm:$0xff] }
 0x292   :  { %v5346_v27 = vpack.c.bf16 %v2616_v57, %v2600_v16  ;;  %v3535_v57 = vld [vmem:[#allocation5 + $0x1b8] sm:$0xff] }
 0x293   :  { %5327 = vmatpush1.bf16.msra.mxu0 %v5326_v60  ;;  %5359 = vmatpush1.bf16.msra.mxu1 %v5358_v23  ;;  %v2635_v60 = vld [vmem:[#allocation3 + $0x778] sm:$0xff] }
 0x294   :  { %5329 = vmatprep.subr.bf16.mxu0 %v5328_v43  ;;  %5361 = vmatprep.subr.bf16.mxu1 %v5360_v56  ;;  %v2651_v23 = vld [vmem:[#allocation3 + $0x7f8] sm:$0xff]  ;;  %v2632_v43 = vld [vmem:[#allocation3 + $0x760] sm:$0xff]  ;;  %v5348_v56 = vpack.c.bf16 %v2649_v6, %v2633_v46 }
 0x295   :  { %v5380_v0 = vpack.c.bf16 %v2651_v23, %v2635_v60  ;;  %v5350_v28 = vpack.c.bf16 %v2648_v55, %v2632_v43  ;;  %v3519_v46 = vld [vmem:[#allocation5 + $0x138] sm:$0xff]  ;;  %v3504_v23 = vld [vmem:[#allocation5 + $0xc0] sm:$0xff]  ;;  %v3489_v55 = vld [vmem:[#allocation5 + $0x48] sm:$0xff] }
 0x296   :  { %v5430_v60 = vpack.c.bf16 %v3519_v46, %v3518_v51 }
 0x297   :  { %5331 = vmatpush1.bf16.msra.mxu0 %v5330_v58  ;;  %5363 = vmatpush1.bf16.msra.mxu1 %v5362_v31  ;;  %v3496_v58 = vld [vmem:[#allocation5 + $0x80] sm:$0xff]  ;;  %v3497_v31 = vld [vmem:[#allocation5 + $0x88] sm:$0xff] }
 0x298   :  { %5333 = vmatprep.subr.bf16.mxu0 %v5332_v50  ;;  %5365 = vmatprep.subr.bf16.mxu1 %v5364_v34  ;;  %v5384_v54 = vpack.c.bf16 %v3497_v31, %v3496_v58  ;;  %v3529_v50 = vld [vmem:[#allocation5 + $0x188] sm:$0xff]  ;;  %v3480_v34 = vld [vmem:[#allocation5] sm:$0xff]  ;;  %v3506_v31 = vld [vmem:[#allocation5 + $0xd0] sm:$0xff] }
 0x299   :  { %v5416_v62 = vpack.c.bf16 %v3529_v50, %v3528_v45  ;;  %v5386_v39 = vpack.c.bf16 %v3481_v9, %v3480_v34  ;;  %v3507_v45 = vld [vmem:[#allocation5 + $0xd8] sm:$0xff]  ;;  %v3490_v9 = vld [vmem:[#allocation5 + $0x50] sm:$0xff] }
 0x29a   :  { %v5404_v50 = vpack.c.bf16 %v3507_v45, %v3506_v31  ;;  %v3539_v34 = vld [vmem:[#allocation5 + $0x1d8] sm:$0xff] }
 0x29b   :  { %5335 = vmatpush1.bf16.msra.mxu0 %v5334_v25  ;;  %5367 = vmatpush1.bf16.msra.mxu1 %v5366_v4  ;;  %v3498_v25 = vld [vmem:[#allocation5 + $0x90] sm:$0xff]  ;;  %v3499_v4 = vld [vmem:[#allocation5 + $0x98] sm:$0xff] }
 0x29c   :  { %5337 = vmatprep.subr.bf16.mxu0 %v5336_v8  ;;  %5369 = vmatprep.subr.bf16.mxu1 %v5368_v19  ;;  %v5388_v20 = vpack.c.bf16 %v3499_v4, %v3498_v25  ;;  %v3531_v8 = vld [vmem:[#allocation5 + $0x198] sm:$0xff]  ;;  %v3482_v19 = vld [vmem:[#allocation5 + $0x10] sm:$0xff]  ;;  %v3508_v4 = vld [vmem:[#allocation5 + $0xe0] sm:$0xff] }
 0x29d   :  { %v5420_v21 = vpack.c.bf16 %v3531_v8, %v3530_v53  ;;  %v5390_v2 = vpack.c.bf16 %v3483_v5, %v3482_v19  ;;  %v3509_v53 = vld [vmem:[#allocation5 + $0xe8] sm:$0xff] }
 0x29e   :  { %v5408_v8 = vpack.c.bf16 %v3509_v53, %v3508_v4  ;;  %v3541_v19 = vld [vmem:[#allocation5 + $0x1e8] sm:$0xff] }
 0x29f   :  { %5339 = vmatpush1.bf16.msra.mxu0 %v5338_v44  ;;  %5371 = vmatpush1.bf16.msra.mxu1 %v5370_v63  ;;  %v3500_v44 = vld [vmem:[#allocation5 + $0xa0] sm:$0xff]  ;;  %v3501_v63 = vld [vmem:[#allocation5 + $0xa8] sm:$0xff] }
 0x2a0   :  { %5341 = vmatprep.subr.bf16.mxu0 %v5340_v15  ;;  %5373 = vmatprep.subr.bf16.mxu1 %v5372_v11  ;;  %v5392_v47 = vpack.c.bf16 %v3501_v63, %v3500_v44  ;;  %v3533_v15 = vld [vmem:[#allocation5 + $0x1a8] sm:$0xff]  ;;  %v3484_v11 = vld [vmem:[#allocation5 + $0x20] sm:$0xff]  ;;  %v3510_v63 = vld [vmem:[#allocation5 + $0xf0] sm:$0xff] }
 0x2a1   :  { %v5424_v41 = vpack.c.bf16 %v3533_v15, %v3532_v61  ;;  %v5394_v29 = vpack.c.bf16 %v3485_v37, %v3484_v11  ;;  %v3511_v61 = vld [vmem:[#allocation5 + $0xf8] sm:$0xff]  ;;  %v3494_v37 = vld [vmem:[#allocation5 + $0x70] sm:$0xff] }
 0x2a2   :  { %v5412_v15 = vpack.c.bf16 %v3511_v61, %v3510_v63  ;;  %v3543_v11 = vld [vmem:[#allocation5 + $0x1f8] sm:$0xff] }
 0x2a3   :  { %5343 = vmatpush1.bf16.msra.mxu0 %v5342_v38  ;;  %5375 = vmatpush1.bf16.msra.mxu1 %v5374_v14  ;;  %v3503_v38 = vld [vmem:[#allocation5 + $0xb8] sm:$0xff]  ;;  %v3534_v14 = vld [vmem:[#allocation5 + $0x1b0] sm:$0xff] }
 0x2a4   :  { %5345 = vmatprep.subr.bf16.mxu0 %v5344_v35  ;;  %5377 = vmatprep.subr.bf16.mxu1 %v5376_v42  ;;  %v5396_v16 = vpack.c.bf16 %v3503_v38, %v3502_v59  ;;  %v3486_v35 = vld [vmem:[#allocation5 + $0x30] sm:$0xff]  ;;  %v3487_v42 = vld [vmem:[#allocation5 + $0x38] sm:$0xff]  ;;  %v5428_v32 = vpack.c.bf16 %v3535_v57, %v3534_v14  ;;  %v3560_v38 = vld [vmem:[#allocation5 + $0x280] sm:$0xff] }
 0x2a5   :  { %v5398_v6 = vpack.c.bf16 %v3487_v42, %v3486_v35  ;;  %v3561_v14 = vld [vmem:[#allocation5 + $0x288] sm:$0xff] }
 0x2a6   :  { %v5448_v57 = vpack.c.bf16 %v3561_v14, %v3560_v38  ;;  %v3593_v35 = vld [vmem:[#allocation5 + $0x388] sm:$0xff] }
 0x2a7   :  { %5347 = vmatpush1.bf16.msra.mxu0 %v5346_v27  ;;  %5379 = vmatpush1.bf16.msra.mxu1 %v5378_v12  ;;  %v3505_v27 = vld [vmem:[#allocation5 + $0xc8] sm:$0xff]  ;;  %v3536_v12 = vld [vmem:[#allocation5 + $0x1c0] sm:$0xff] }
 0x2a8   :  { %5349 = vmatprep.subr.bf16.mxu0 %v5348_v56  ;;  %5381 = vmatprep.subr.bf16.mxu1 %v5380_v0  ;;  %v5400_v43 = vpack.c.bf16 %v3505_v27, %v3504_v23  ;;  %v3537_v56 = vld [vmem:[#allocation5 + $0x1c8] sm:$0xff]  ;;  %v3488_v0 = vld [vmem:[#allocation5 + $0x40] sm:$0xff] }
 0x2a9   :  { %v5432_v52 = vpack.c.bf16 %v3537_v56, %v3536_v12 }
 0x2ab   :  { %5351 = vmatpush1.bf16.msra.mxu0 %v5350_v28  ;;  %5383 = vmatpush1.bf16.msra.mxu1 %v5382_v3  ;;  %v3521_v28 = vld [vmem:[#allocation5 + $0x148] sm:$0xff]  ;;  %v5402_v3 = vpack.c.bf16 %v3489_v55, %v3488_v0 }
 0x2ac   :  { %5385 = vmatprep.subr.bf16.mxu0 %v5384_v54  ;;  %5417 = vmatprep.subr.bf16.mxu1 %v5416_v62  ;;  %v5434_v58 = vpack.c.bf16 %v3521_v28, %v3520_v22  ;;  %v3538_v54 = vld [vmem:[#allocation5 + $0x1d0] sm:$0xff]  ;;  %v3491_v62 = vld [vmem:[#allocation5 + $0x58] sm:$0xff] }
 0x2ad   :  { %v5436_v17 = vpack.c.bf16 %v3539_v34, %v3538_v54 }
 0x2ae   :  { %3227 = vmatmul.mubr.f32.vlgmr.msra.gmra.mrb[14].mxu0 %v8222_v1  ;;  %3298 = vmatmul.mubr.f32.vlgmr.msra.gmra.mrb[14].mxu1 %v8222_v1  ;;  %v5426_v1 = vpack.c.bf16 %v3517_v13, %v3516_v40 }
 0x2af   :  { %5387 = vmatpush3.bf16.msra.mxu0 %v5386_v39  ;;  %5419 = vmatpush3.bf16.msra.mxu1 %v5418_v10  ;;  %v3523_v39 = vld [vmem:[#allocation5 + $0x158] sm:$0xff]  ;;  %v5406_v10 = vpack.c.bf16 %v3491_v62, %v3490_v9 }
 0x2b0   :  { %5389 = vmatprep.subr.bf16.mxu0 %v5388_v20  ;;  %5421 = vmatprep.subr.bf16.mxu1 %v5420_v21  ;;  %v5438_v25 = vpack.c.bf16 %v3523_v39, %v3522_v48  ;;  %v3540_v20 = vld [vmem:[#allocation5 + $0x1e0] sm:$0xff] }
 0x2b1   :  { %v5440_v5 = vpack.c.bf16 %v3541_v19, %v3540_v20  ;;  %v3492_v21 = vld [vmem:[#allocation5 + $0x60] sm:$0xff] }
 0x2b3   :  { %5391 = vmatpush3.bf16.msra.mxu0 %v5390_v2  ;;  %5423 = vmatpush3.bf16.msra.mxu1 %v5422_v33  ;;  %v5410_v2 = vpack.c.bf16 %v3493_v18, %v3492_v21  ;;  %v3525_v33 = vld [vmem:[#allocation5 + $0x168] sm:$0xff] }
 0x2b4   :  { %5393 = vmatprep.subr.bf16.mxu0 %v5392_v47  ;;  %5425 = vmatprep.subr.bf16.mxu1 %v5424_v41  ;;  %v5442_v44 = vpack.c.bf16 %v3525_v33, %v3524_v26  ;;  %v3542_v47 = vld [vmem:[#allocation5 + $0x1f0] sm:$0xff]  ;;  %v3495_v41 = vld [vmem:[#allocation5 + $0x78] sm:$0xff] }
 0x2b5   :  { %v5444_v40 = vpack.c.bf16 %v3543_v11, %v3542_v47  ;;  %v5414_v13 = vpack.c.bf16 %v3495_v41, %v3494_v37  ;;  %v8277_v37 = vld [vmem:[#allocation5 + $0x200] sm:$0xff] }
 0x2b7   :  { %5395 = vmatpush3.bf16.msra.mxu0 %v5394_v29  ;;  %5427 = vmatpush3.bf16.msra.mxu1 %v5426_v1  ;;  %v3526_v29 = vld [vmem:[#allocation5 + $0x170] sm:$0xff]  ;;  %v3527_v1 = vld [vmem:[#allocation5 + $0x178] sm:$0xff] }
 0x2b8   :  { %5397 = vmatprep.subr.bf16.mxu0 %v5396_v16  ;;  %5429 = vmatprep.subr.bf16.mxu1 %v5428_v32  ;;  %v5446_v59 = vpack.c.bf16 %v3527_v1, %v3526_v29  ;;  %v3592_v16 = vld [vmem:[#allocation5 + $0x380] sm:$0xff]  ;;  %v2656_v32 = vlaneseq  ;;  %v8285_v29 = vld [vmem:[#allocation5 + $0x308] sm:$0xff] }
 0x2b9   :  { %v5480_v42 = vpack.c.bf16 %v3593_v35, %v3592_v16 }
 0x2ba   :  { %v8238_v51 = vshrl.u32 %v2656_v32, 7 }
 0x2bb   :  { %5399 = vmatpush3.bf16.msra.mxu0 %v5398_v6  ;;  %5431 = vmatpush3.bf16.msra.mxu1 %v5430_v60  ;;  %v2652_v60 = vld [vmem:[%s8557_s4] sm:$0xff] }
 0x2bc   :  { %5401 = vmatprep.subr.bf16.mxu0 %v5400_v43  ;;  %5433 = vmatprep.subr.bf16.mxu1 %v5432_v52  ;;  %v2658_v46 = vsub.s32 0, %v8238_v51  ;;  %v2666_v6 = vsub.s32 2, %v8238_v51  ;;  %v2662_v23 = vsub.s32 1, %v8238_v51  ;;  %v2670_v27 = vsub.s32 3, %v8238_v51 }
 0x2bd   :  { %v2674_v33 = vsub.s32 4, %v8238_v51  ;;  %v2678_v63 = vsub.s32 5, %v8238_v51  ;;  %v2686_v61 = vsub.s32 7, %v8238_v51 }
 0x2be   :  { %v2659_v12 = vrot.slane %v2652_v60, %v2658_v46  ;;  %v2667_v43 = vrot.slane %v2652_v60, %v2666_v6  ;;  %v2663_v56 = vrot.slane %v2652_v60, %v2662_v23  ;;  %v2671_v0 = vrot.slane %v2652_v60, %v2670_v27 }
 0x2bf   :  { %5403 = vmatpush3.bf16.msra.mxu0 %v5402_v3  ;;  %5435 = vmatpush3.bf16.msra.mxu1 %v5434_v58  ;;  %v2675_v47 = vrot.slane %v2652_v60, %v2674_v33  ;;  %v2679_v11 = vrot.slane %v2652_v60, %v2678_v63  ;;  %v2687_v41 = vrot.slane %v2652_v60, %v2686_v61 }
 0x2c0   :  { %5405 = vmatprep.subr.bf16.mxu0 %v5404_v50  ;;  %5437 = vmatprep.subr.bf16.mxu1 %v5436_v17 }
 0x2c3   :  { %5407 = vmatpush3.bf16.msra.mxu0 %v5406_v10  ;;  %5439 = vmatpush3.bf16.msra.mxu1 %v5438_v25 }
 0x2c4   :  { %5409 = vmatprep.subr.bf16.mxu0 %v5408_v8  ;;  %5441 = vmatprep.subr.bf16.mxu1 %v5440_v5 }
 0x2c7   :  { %5411 = vmatpush3.bf16.msra.mxu0 %v5410_v2  ;;  %5443 = vmatpush3.bf16.msra.mxu1 %v5442_v44  ;;  %v2682_v44 = vsub.s32 6, %v8238_v51  ;;  %v8485_v51 = vld [vmem:[#allocation5 + $0x608] sm:$0xff] }
 0x2c8   :  { %5413 = vmatprep.subr.bf16.mxu0 %v5412_v15  ;;  %5445 = vmatprep.subr.bf16.mxu1 %v5444_v40  ;;  %v8281_v40 = vld [vmem:[#allocation5 + $0x208] sm:$0xff] }
 0x2c9   :  { %v2683_v15 = vrot.slane %v2652_v60, %v2682_v44 }
 0x2cb   :  { %5415 = vmatpush3.bf16.msra.mxu0 %v5414_v13  ;;  %5447 = vmatpush3.bf16.msra.mxu1 %v5446_v59  ;;  %v8283_v13 = vld [vmem:[#allocation5 + $0x300] sm:$0xff] }
 0x2cc   :  { %5449 = vmatprep.subr.bf16.mxu0 %v5448_v57  ;;  %5481 = vmatprep.subr.bf16.mxu1 %v5480_v42 }
 0x321   :  { %v2802_v55 = vpop.f32.mrb[8].mxu0  ;;  %v2873_v52 = vpop.f32.mrb[8].mxu1 }
 0x322   :  { %v8255_v22 = vadd.f32 %v2802_v55, %v2659_v12  ;;  %v8257_v28 = vadd.f32 %v2873_v52, %v2667_v43  ;;  %v2804_v3 = vpop.f32.mrb[9].mxu0  ;;  %v2875_v58 = vpop.f32.mrb[9].mxu1 }
 0x323   :  { %v8259_v31 = vadd.f32 %v2804_v3, %v2663_v56  ;;  %v8261_v45 = vadd.f32 %v2875_v58, %v2671_v0  ;;  %v5450_v56 = vpack.c.bf16 %v8281_v40, %v8277_v37  ;;  %v5482_v0 = vpack.c.bf16 %v8285_v29, %v8283_v13  ;;  %v8711_v37 = vld [vmem:[#allocation20_spill] sm:$0xff] }
 0x324   :  { %v3304_v54 = vand.u32 2147483647, %v8255_v22  ;;  %v3306_v50 = vand.u32 2147483647, %v8257_v28  ;;  %vm3368_vm7 = vcmp.ge.f32.partialorder %v8255_v22, 0.0  ;;  %vm3370_vm8 = vcmp.ge.f32.partialorder %v8257_v28, 0.0 }
 0x325   :  { %v3305_v34 = vand.u32 2147483647, %v8259_v31  ;;  %v3307_v9 = vand.u32 2147483647, %v8261_v45  ;;  %vm3369_vm9 = vcmp.ge.f32.partialorder %v8259_v31, 0.0  ;;  %vm3371_vm10 = vcmp.ge.f32.partialorder %v8261_v45, 0.0 }
 0x326   :  { %v3320_v62 = vsub.f32 0.0, %v3304_v54  ;;  %v3322_v17 = vsub.f32 0.0, %v3306_v50  ;;  %v3579_v29 = vld [vmem:[#allocation5 + $0x318] sm:$0xff] }
 0x327   :  { %v3321_v48 = vsub.f32 0.0, %v3305_v34  ;;  %v3323_v39 = vsub.f32 0.0, %v3307_v9  ;;  %v3562_v34 = vld [vmem:[#allocation5 + $0x290] sm:$0xff]  ;;  %v3563_v9 = vld [vmem:[#allocation5 + $0x298] sm:$0xff] }
 0x328   :  { %v3336_v10 = vmul.f32 1.442695, %v3320_v62  ;;  %v3340_v25 = vmul.f32 1.442695, %v3322_v17 }
 0x329   :  { %v3338_v4 = vmul.f32 1.442695, %v3321_v48  ;;  %v3342_v53 = vmul.f32 1.442695, %v3323_v39 }
 0x32a   :  { %5646 = vpow2.f32 %v3336_v10 }
 0x32b   :  { %5648 = vpow2.f32 %v3340_v25 }
 0x32c   :  { %5650 = vpow2.f32 %v3338_v4  ;;  %v3594_v4 = vld [vmem:[#allocation5 + $0x390] sm:$0xff] }
 0x32d   :  { %5652 = vpow2.f32 %v3342_v53  ;;  %v3595_v53 = vld [vmem:[#allocation5 + $0x398] sm:$0xff] }
 0x32e   :  { %v5484_v13 = vpack.c.bf16 %v3595_v53, %v3594_v4  ;;  %v3583_v4 = vld [vmem:[#allocation5 + $0x338] sm:$0xff]  ;;  %v3568_v53 = vld [vmem:[#allocation5 + $0x2c0] sm:$0xff] }
 0x334   :  { %v5647_v20 = vpop.eup %5646 }
 0x335   :  { %v5649_v8 = vpop.eup %5648  ;;  %v3384_v19 = vadd.f32 1.0, %v5647_v20 }
 0x336   :  { %v5651_v5 = vpop.eup %5650  ;;  %v3386_v21 = vadd.f32 1.0, %v5649_v8 }
 0x337   :  { %v5653_v18 = vpop.eup %5652  ;;  %5654 = vrcp.f32 %v3384_v19  ;;  %v3385_v26 = vadd.f32 1.0, %v5651_v5  ;;  %v5452_v19 = vpack.c.bf16 %v3563_v9, %v3562_v34  ;;  %v3566_v34 = vld [vmem:[#allocation5 + $0x2b0] sm:$0xff]  ;;  %v3567_v9 = vld [vmem:[#allocation5 + $0x2b8] sm:$0xff] }
 0x338   :  { %5656 = vrcp.f32 %v3386_v21  ;;  %v3387_v2 = vadd.f32 1.0, %v5653_v18 }
 0x339   :  { %5658 = vrcp.f32 %v3385_v26 }
 0x33a   :  { %5660 = vrcp.f32 %v3387_v2  ;;  %v8710_v2 = vld [vmem:[#allocation11_spill] sm:$0xff] }
 0x341   :  { %v5655_v1 = vpop.eup %5654  ;;  %v2944_v59 = vpop.f32.mrb[10].mxu0 }
 0x342   :  { %v3015_v38 = vpop.f32.mrb[10].mxu1  ;;  %v5657_v14 = vpop.eup %5656  ;;  %v3432_v16 = vmul.f32 %v5655_v1, %v5647_v20  ;;  %v8287_v57 = vadd.f32 %v2944_v59, %v2675_v47  ;;  %v8708_v20 = vld [vmem:[#allocation9_spill] sm:$0xff]  ;;  %v3546_v47 = vld [vmem:[#allocation5 + $0x210] sm:$0xff]  ;;  %v3565_v59 = vld [vmem:[#allocation5 + $0x2a8] sm:$0xff] }
 0x343   :  { %v8289_v35 = vadd.f32 %v3015_v38, %v2683_v15  ;;  %v2946_v42 = vpop.f32.mrb[11].mxu0  ;;  %v3017_v32 = vpop.f32.mrb[11].mxu1  ;;  %v3434_v43 = vmul.f32 %v5657_v14, %v5649_v8  ;;  %v3547_v15 = vld [vmem:[#allocation5 + $0x218] sm:$0xff] }
 0x344   :  { %v5659_v12 = vpop.eup %5658  ;;  %v8291_v60 = vadd.f32 %v2946_v42, %v2679_v11  ;;  %v3308_v3 = vand.u32 2147483647, %v8287_v57  ;;  %v8299_v58 = vadd.f32 %v3017_v32, %v2687_v41  ;;  %v3448_v62 = vsel %vm3368_vm7, %v5655_v1, %v3432_v16  ;;  %v3578_v11 = vld [vmem:[#allocation5 + $0x310] sm:$0xff]  ;;  %v3564_v1 = vld [vmem:[#allocation5 + $0x2a0] sm:$0xff]  ;;  %v3597_v16 = vld [vmem:[#allocation5 + $0x3a8] sm:$0xff] }
 0x345   :  { %v5661_v55 = vpop.eup %5660  ;;  %v3433_v52 = vmul.f32 %v5659_v12, %v5651_v5  ;;  %v3310_v50 = vand.u32 2147483647, %v8289_v35  ;;  %v3450_v22 = vsel %vm3370_vm8, %v5657_v14, %v3434_v43  ;;  %v8709_v5 = vld [vmem:[#allocation10_spill] sm:$0xff]  ;;  %v3596_v14 = vld [vmem:[#allocation5 + $0x3a0] sm:$0xff]  ;;  %v5454_v32 = vpack.c.bf16 %v3547_v15, %v3546_v47 }
 0x346   :  { %v3435_v54 = vmul.f32 %v5661_v55, %v5653_v18  ;;  %v3324_v48 = vsub.f32 0.0, %v3308_v3  ;;  %v3309_v25 = vand.u32 2147483647, %v8291_v60  ;;  %v3311_v31 = vand.u32 2147483647, %v8299_v58  ;;  %v3580_v3 = vld [vmem:[#allocation5 + $0x320] sm:$0xff] }
 0x347   :  { %v3449_v17 = vsel %vm3369_vm9, %v5659_v12, %v3433_v52  ;;  %v3326_v10 = vsub.f32 0.0, %v3310_v50  ;;  %v3464_v21 = vmul.f32 %v3448_v62, %v8709_v5  ;;  %v3466_v41 = vmul.f32 %v3450_v22, %v8711_v37  ;;  %v3549_v52 = vld [vmem:[#allocation5 + $0x228] sm:$0xff]  ;;  %v3598_v62 = vld [vmem:[#allocation5 + $0x3b0] sm:$0xff]  ;;  %v3584_v47 = vld [vmem:[#allocation5 + $0x340] sm:$0xff] }
 0x348   :  { %v3451_v39 = vsel %vm3371_vm10, %v5661_v55, %v3435_v54  ;;  %v3344_v28 = vmul.f32 1.442695, %v3324_v48  ;;  %v3465_v8 = vmul.f32 %v3449_v17, %v8708_v20  ;;  %v3325_v26 = vsub.f32 0.0, %v3309_v25  ;;  %v3548_v55 = vld [vmem:[#allocation5 + $0x220] sm:$0xff]  ;;  %v3581_v50 = vld [vmem:[#allocation5 + $0x328] sm:$0xff]  ;;  %v3599_v17 = vld [vmem:[#allocation5 + $0x3b8] sm:$0xff] }
 0x349   :  { %v3348_v18 = vmul.f32 1.442695, %v3326_v10  ;;  %v3467_v45 = vmul.f32 %v3451_v39, %v8710_v2  ;;  %v3327_v40 = vsub.f32 0.0, %v3311_v31  ;;  %v5486_v12 = vpack.c.bf16 %v3579_v29, %v3578_v11  ;;  %v3550_v22 = vld [vmem:[#allocation5 + $0x230] sm:$0xff]  ;;  %v3551_v39 = vld [vmem:[#allocation5 + $0x238] sm:$0xff]  ;;  %v3600_v31 = vld [vmem:[#allocation5 + $0x3c0] sm:$0xff] }
 0x34a   :  { %5662 = vpow2.f32 %v3344_v28  ;;  %3807 = vmatprep.mubr.f32.mxu0 %v3465_v8  ;;  %v3346_v38 = vmul.f32 1.442695, %v3325_v26  ;;  %v5456_v43 = vpack.c.bf16 %v3565_v59, %v3564_v1  ;;  %v5488_v54 = vpack.c.bf16 %v3597_v16, %v3596_v14  ;;  %v3582_v10 = vld [vmem:[#allocation5 + $0x330] sm:$0xff]  ;;  %v3569_v28 = vld [vmem:[#allocation5 + $0x2c8] sm:$0xff]  ;;  %v3552_v2 = vld [vmem:[#allocation5 + $0x240] sm:$0xff] }
 0x34b   :  { %5664 = vpow2.f32 %v3348_v18  ;;  %3877 = vmatprep.mubr.f32.mxu1 %v3467_v45  ;;  %3808 = vmatmul.mubr.f32.vlgmr.msra.gmra.mrb[16].mxu0 %v3464_v21  ;;  %v3350_v42 = vmul.f32 1.442695, %v3327_v40  ;;  %v5458_v48 = vpack.c.bf16 %v3549_v52, %v3548_v55  ;;  %v5492_v25 = vpack.c.bf16 %v3599_v17, %v3598_v62  ;;  %v3601_v20 = vld [vmem:[#allocation5 + $0x3c8] sm:$0xff]  ;;  %v3571_v40 = vld [vmem:[#allocation5 + $0x2d8] sm:$0xff]  ;;  %v3602_v29 = vld [vmem:[#allocation5 + $0x3d0] sm:$0xff] }
 0x34c   :  { %3878 = vmatmul.mubr.f32.vlgmr.msra.gmra.mrb[16].mxu1 %v3466_v41  ;;  %5451 = vmatpush3.bf16.msra.mxu0 %v5450_v56  ;;  %5666 = vpow2.f32 %v3346_v38  ;;  %v5490_v56 = vpack.c.bf16 %v3581_v50, %v3580_v3  ;;  %v5494_v18 = vpack.c.bf16 %v3583_v4, %v3582_v10  ;;  %v5464_v26 = vpack.c.bf16 %v3569_v28, %v3568_v53  ;;  %v3553_v45 = vld [vmem:[#allocation5 + $0x248] sm:$0xff]  ;;  %v3570_v41 = vld [vmem:[#allocation5 + $0x2d0] sm:$0xff]  ;;  %v3603_v1 = vld [vmem:[#allocation5 + $0x3d8] sm:$0xff] }
 0x34d   :  { %5483 = vmatpush3.bf16.msra.mxu1 %v5482_v0  ;;  %5453 = vmatprep.subr.bf16.mxu0 %v5452_v19  ;;  %5668 = vpow2.f32 %v3350_v42  ;;  %v5460_v0 = vpack.c.bf16 %v3567_v9, %v3566_v34  ;;  %v5462_v19 = vpack.c.bf16 %v3551_v39, %v3550_v22  ;;  %v5496_v11 = vpack.c.bf16 %v3601_v20, %v3600_v31  ;;  %v3585_v37 = vld [vmem:[#allocation5 + $0x348] sm:$0xff]  ;;  %v3554_v16 = vld [vmem:[#allocation5 + $0x250] sm:$0xff]  ;;  %v3555_v42 = vld [vmem:[#allocation5 + $0x258] sm:$0xff] }
 0x34e   :  { %5485 = vmatprep.subr.bf16.mxu1 %v5484_v13  ;;  %v5466_v14 = vpack.c.bf16 %v3553_v45, %v3552_v2  ;;  %v5468_v55 = vpack.c.bf16 %v3571_v40, %v3570_v41  ;;  %v3587_v52 = vld [vmem:[#allocation5 + $0x358] sm:$0xff]  ;;  %v3572_v3 = vld [vmem:[#allocation5 + $0x2e0] sm:$0xff]  ;;  %v5500_v50 = vpack.c.bf16 %v3603_v1, %v3602_v29  ;;  %v8326_v34 = vld [vmem:[%s8557_s4 + $0x8] sm:$0xff]  ;;  %v5470_v39 = vpack.c.bf16 %v3555_v42, %v3554_v16 }
 0x34f   :  { %v3604_v9 = vld [vmem:[#allocation5 + $0x3e0] sm:$0xff]  ;;  %v3605_v62 = vld [vmem:[#allocation5 + $0x3e8] sm:$0xff]  ;;  %v8332_v22 = vld [vmem:[#allocation5 + $0x2f0] sm:$0xff]  ;;  %vm3372_vm11 = vcmp.ge.f32.partialorder %v8287_v57, 0.0  ;;  %vm3374_vm12 = vcmp.ge.f32.partialorder %v8289_v35, 0.0  ;;  %vm3373_vm13 = vcmp.ge.f32.partialorder %v8291_v60, 0.0 }
 0x350   :  { %5455 = vmatpush3.bf16.msra.mxu0 %v5454_v32  ;;  %v3586_v32 = vld [vmem:[#allocation5 + $0x350] sm:$0xff]  ;;  %v3556_v17 = vld [vmem:[#allocation5 + $0x260] sm:$0xff]  ;;  %v3575_v10 = vld [vmem:[#allocation5 + $0x2f8] sm:$0xff]  ;;  %vm3375_vm14 = vcmp.ge.f32.partialorder %v8299_v58, 0.0 }
 0x351   :  { %5487 = vmatpush3.bf16.msra.mxu1 %v5486_v12  ;;  %5457 = vmatprep.subr.bf16.mxu0 %v5456_v43  ;;  %v5498_v43 = vpack.c.bf16 %v3585_v37, %v3584_v47  ;;  %v8336_v4 = vld [vmem:[#allocation5 + $0x3f8] sm:$0xff]  ;;  %v5502_v53 = vpack.c.bf16 %v3587_v52, %v3586_v32  ;;  %v8338_v31 = vld [vmem:[#allocation5 + $0x270] sm:$0xff]  ;;  %v8352_v45 = vld [vmem:[#allocation5 + $0x480] sm:$0xff]  ;;  %v5476_v40 = vpack.c.bf16 %v3575_v10, %v8332_v22 }
 0x352   :  { %5489 = vmatprep.subr.bf16.mxu1 %v5488_v54  ;;  %v3573_v54 = vld [vmem:[#allocation5 + $0x2e8] sm:$0xff]  ;;  %v8340_v20 = vld [vmem:[#allocation5 + $0x278] sm:$0xff]  ;;  %v8371_v1 = vld [vmem:[#allocation5 + $0x400] sm:$0xff] }
 0x353   :  { %v5472_v28 = vpack.c.bf16 %v3573_v54, %v3572_v3  ;;  %v8350_v2 = vld [vmem:[#allocation5 + $0x378] sm:$0xff]  ;;  %v8354_v47 = vld [vmem:[#allocation5 + $0x488] sm:$0xff]  ;;  %v5478_v16 = vpack.c.bf16 %v8340_v20, %v8338_v31  ;;  %v3626_v57 = vld [vmem:[#allocation5 + $0x490] sm:$0xff] }
 0x354   :  { %v8311_v8 = vpop.eup %5662  ;;  %5459 = vmatpush3.bf16.msra.mxu0 %v5458_v48  ;;  %v3557_v48 = vld [vmem:[#allocation5 + $0x268] sm:$0xff]  ;;  %v5512_v32 = vpack.c.bf16 %v8354_v47, %v8352_v45 }
 0x355   :  { %v8313_v5 = vpop.eup %5664  ;;  %v3388_v21 = vadd.f32 1.0, %v8311_v8  ;;  %5491 = vmatpush3.bf16.msra.mxu1 %v5490_v56  ;;  %5461 = vmatprep.subr.bf16.mxu0 %v5460_v0  ;;  %v8328_v56 = vld [vmem:[#allocation5 + $0x360] sm:$0xff]  ;;  %v8330_v0 = vld [vmem:[#allocation5 + $0x368] sm:$0xff] }
 0x356   :  { %v3390_v15 = vadd.f32 1.0, %v8313_v5  ;;  %5493 = vmatprep.subr.bf16.mxu1 %v5492_v25  ;;  %v8317_v13 = vpop.eup %5666  ;;  %v8334_v25 = vld [vmem:[#allocation5 + $0x3f0] sm:$0xff]  ;;  %v8364_v37 = vld [vmem:[#allocation5 + $0x588] sm:$0xff]  ;;  %v5506_v41 = vpack.c.bf16 %v8330_v0, %v8328_v56 }
 0x357   :  { %5670 = vrcp.f32 %v3388_v21  ;;  %v8319_v59 = vpop.eup %5668  ;;  %v3389_v38 = vadd.f32 1.0, %v8317_v13  ;;  %v2691_v21 = vrot.slane %v8326_v34, %v2658_v46  ;;  %v8362_v46 = vld [vmem:[#allocation5 + $0x580] sm:$0xff]  ;;  %v5508_v29 = vpack.c.bf16 %v8336_v4, %v8334_v25  ;;  %v3627_v4 = vld [vmem:[#allocation5 + $0x498] sm:$0xff] }
 0x358   :  { %5672 = vrcp.f32 %v3390_v15  ;;  %5463 = vmatpush3.bf16.msra.mxu0 %v5462_v19  ;;  %v3391_v12 = vadd.f32 1.0, %v8319_v59  ;;  %v8342_v19 = vld [vmem:[#allocation5 + $0x370] sm:$0xff]  ;;  %v2695_v15 = vrot.slane %v8326_v34, %v2662_v23  ;;  %v8373_v23 = vld [vmem:[#allocation5 + $0x408] sm:$0xff]  ;;  %v5516_v47 = vpack.c.bf16 %v3627_v4, %v3626_v57  ;;  %v3663_v4 = vld [vmem:[#allocation5 + $0x5b8] sm:$0xff] }
 0x359   :  { %5495 = vmatpush3.bf16.msra.mxu1 %v5494_v18  ;;  %5465 = vmatprep.subr.bf16.mxu0 %v5464_v26  ;;  %5674 = vrcp.f32 %v3389_v38  ;;  %v2699_v18 = vrot.slane %v8326_v34, %v2666_v6  ;;  %v5504_v26 = vpack.c.bf16 %v3605_v62, %v3604_v9  ;;  %v5474_v6 = vpack.c.bf16 %v3557_v48, %v3556_v17  ;;  %v3662_v57 = vld [vmem:[#allocation5 + $0x5b0] sm:$0xff] }
 0x35a   :  { %5497 = vmatprep.subr.bf16.mxu1 %v5496_v11  ;;  %5676 = vrcp.f32 %v3391_v12  ;;  %v2703_v11 = vrot.slane %v8326_v34, %v2670_v27  ;;  %v5510_v42 = vpack.c.bf16 %v8350_v2, %v8342_v19  ;;  %v8381_v12 = vld [vmem:[#allocation5 + $0x500] sm:$0xff]  ;;  %v5544_v62 = vpack.c.bf16 %v8364_v37, %v8362_v46  ;;  %v8713_v37 = vld [vmem:[#allocation12_spill] sm:$0xff] }
 0x35b   :  { %v5514_v0 = vpack.c.bf16 %v8373_v23, %v8371_v1  ;;  %v8714_v1 = vld [vmem:[#allocation13_spill] sm:$0xff] }
 0x35c   :  { %5467 = vmatpush3.bf16.msra.mxu0 %v5466_v14 }
 0x35d   :  { %5499 = vmatpush3.bf16.msra.mxu1 %v5498_v43  ;;  %5469 = vmatprep.subr.bf16.mxu0 %v5468_v55  ;;  %v8383_v43 = vld [vmem:[#allocation5 + $0x508] sm:$0xff] }
 0x35e   :  { %5501 = vmatprep.subr.bf16.mxu1 %v5500_v50  ;;  %v5546_v10 = vpack.c.bf16 %v8383_v43, %v8381_v12  ;;  %v3629_v12 = vld [vmem:[#allocation5 + $0x4a8] sm:$0xff] }
 0x360   :  { %5471 = vmatpush3.bf16.msra.mxu0 %v5470_v39 }
 0x361   :  { %v5671_v38 = vpop.eup %5670  ;;  %5503 = vmatpush3.bf16.msra.mxu1 %v5502_v53  ;;  %v3086_v27 = vpop.f32.mrb[12].mxu0  ;;  %5473 = vmatprep.subr.bf16.mxu0 %v5472_v28 }
 0x362   :  { %v3157_v14 = vpop.f32.mrb[12].mxu1  ;;  %v5673_v55 = vpop.eup %5672  ;;  %v3436_v52 = vmul.f32 %v5671_v38, %v8311_v8  ;;  %v8386_v3 = vadd.f32 %v3086_v27, %v2691_v21  ;;  %5505 = vmatprep.subr.bf16.mxu1 %v5504_v26 }
 0x363   :  { %v8388_v54 = vadd.f32 %v3157_v14, %v2699_v18  ;;  %v3088_v50 = vpop.f32.mrb[13].mxu0  ;;  %v3159_v9 = vpop.f32.mrb[13].mxu1  ;;  %v3438_v17 = vmul.f32 %v5673_v55, %v8313_v5  ;;  %v3658_v18 = vld [vmem:[#allocation5 + $0x590] sm:$0xff]  ;;  %v3643_v14 = vld [vmem:[#allocation5 + $0x518] sm:$0xff] }
 0x364   :  { %v8393_v48 = vadd.f32 %v3088_v50, %v2695_v15  ;;  %v8395_v56 = vadd.f32 %v3159_v9, %v2703_v11  ;;  %v5675_v8 = vpop.eup %5674  ;;  %v3312_v22 = vand.u32 2147483647, %v8386_v3  ;;  %5475 = vmatpush3.bf16.msra.mxu0 %v5474_v6  ;;  %v3452_v53 = vsel %vm3372_vm11, %v5671_v38, %v3436_v52  ;;  %v8712_v11 = vld [vmem:[#allocation21_spill] sm:$0xff]  ;;  %v8715_v38 = vld [vmem:[#allocation24_spill] sm:$0xff] }
 0x365   :  { %v3314_v39 = vand.u32 2147483647, %v8388_v54  ;;  %v5677_v25 = vpop.eup %5676  ;;  %v3437_v5 = vmul.f32 %v5675_v8, %v8317_v13  ;;  %5507 = vmatpush3.bf16.msra.mxu1 %v5506_v41  ;;  %5477 = vmatprep.subr.bf16.mxu0 %v5476_v40  ;;  %v3454_v19 = vsel %vm3374_vm12, %v5673_v55, %v3438_v17  ;;  %v3659_v13 = vld [vmem:[#allocation5 + $0x598] sm:$0xff]  ;;  %v3610_v41 = vld [vmem:[#allocation5 + $0x410] sm:$0xff]  ;;  %v3468_v23 = vmul.f32 %v3452_v53, %v8714_v1  ;;  %v3660_v55 = vld [vmem:[#allocation5 + $0x5a0] sm:$0xff] }
 0x366   :  { %v3439_v28 = vmul.f32 %v5677_v25, %v8319_v59  ;;  %v3328_v31 = vsub.f32 0.0, %v3312_v22  ;;  %5509 = vmatprep.subr.bf16.mxu1 %v5508_v29  ;;  %v3313_v35 = vand.u32 2147483647, %v8393_v48  ;;  %v3315_v60 = vand.u32 2147483647, %v8395_v56  ;;  %v3611_v40 = vld [vmem:[#allocation5 + $0x418] sm:$0xff] }
 0x367   :  { %v3330_v20 = vsub.f32 0.0, %v3314_v39  ;;  %v3453_v21 = vsel %vm3373_vm13, %v5675_v8, %v3437_v5  ;;  %v3642_v29 = vld [vmem:[#allocation5 + $0x510] sm:$0xff]  ;;  %v3470_v58 = vmul.f32 %v3454_v19, %v8715_v38  ;;  %v5548_v27 = vpack.c.bf16 %v3659_v13, %v3658_v18  ;;  %v3612_v9 = vld [vmem:[#allocation5 + $0x420] sm:$0xff]  ;;  %v3645_v39 = vld [vmem:[#allocation5 + $0x528] sm:$0xff] }
 0x368   :  { %v3455_v26 = vsel %vm3375_vm14, %v5677_v25, %v3439_v28  ;;  %v3352_v2 = vmul.f32 1.442695, %v3328_v31  ;;  %5479 = vmatpush3.bf16.msra.mxu0 %v5478_v16  ;;  %v3329_v15 = vsub.f32 0.0, %v3313_v35  ;;  %v3331_v59 = vsub.f32 0.0, %v3315_v60  ;;  %v3628_v16 = vld [vmem:[#allocation5 + $0x4a0] sm:$0xff]  ;;  %v3630_v25 = vld [vmem:[#allocation5 + $0x4b0] sm:$0xff] }
 0x369   :  { %v3356_v45 = vmul.f32 1.442695, %v3330_v20  ;;  %5511 = vmatpush3.bf16.msra.mxu1 %v5510_v42  ;;  %v3469_v46 = vmul.f32 %v3453_v21, %v8712_v11  ;;  %v3471_v6 = vmul.f32 %v3455_v26, %v8713_v37  ;;  %5513 = vmatprep.subr.bf16.mxu0 %v5512_v32  ;;  %v3661_v32 = vld [vmem:[#allocation5 + $0x5a8] sm:$0xff]  ;;  %v5518_v52 = vpack.c.bf16 %v3611_v40, %v3610_v41  ;;  %v3644_v22 = vld [vmem:[#allocation5 + $0x520] sm:$0xff]  ;;  %v3631_v5 = vld [vmem:[#allocation5 + $0x4b8] sm:$0xff] }
 0x36a   :  { %5678 = vpow2.f32 %v3352_v2  ;;  %5545 = vmatprep.subr.bf16.mxu1 %v5544_v62  ;;  %v3354_v42 = vmul.f32 1.442695, %v3329_v15  ;;  %v3358_v43 = vmul.f32 1.442695, %v3331_v59  ;;  %v5550_v50 = vpack.c.bf16 %v3643_v14, %v3642_v29  ;;  %v3613_v62 = vld [vmem:[#allocation5 + $0x428] sm:$0xff]  ;;  %v3615_v28 = vld [vmem:[#allocation5 + $0x438] sm:$0xff] }
 0x36b   :  { %5680 = vpow2.f32 %v3356_v45  ;;  %3947 = vmatprep.mubr.f32.mxu0 %v3469_v46  ;;  %4017 = vmatprep.mubr.f32.mxu1 %v3471_v6  ;;  %v5520_v17 = vpack.c.bf16 %v3629_v12, %v3628_v16  ;;  %v5552_v8 = vpack.c.bf16 %v3661_v32, %v3660_v55  ;;  %v5522_v53 = vpack.c.bf16 %v3613_v62, %v3612_v9  ;;  %v3646_v19 = vld [vmem:[#allocation5 + $0x530] sm:$0xff]  ;;  %v3647_v21 = vld [vmem:[#allocation5 + $0x538] sm:$0xff]  ;;  %v3632_v35 = vld [vmem:[#allocation5 + $0x4c0] sm:$0xff] }
 0x36c   :  { %3948 = vmatmul.mubr.f32.vlgmr.msra.gmra.mrb[18].mxu0 %v3468_v23  ;;  %4018 = vmatmul.mubr.f32.vlgmr.msra.gmra.mrb[18].mxu1 %v3470_v58  ;;  %5682 = vpow2.f32 %v3354_v42  ;;  %v5524_v31 = vpack.c.bf16 %v3631_v5, %v3630_v25  ;;  %v5556_v20 = vpack.c.bf16 %v3663_v4, %v3662_v57  ;;  %v3633_v60 = vld [vmem:[#allocation5 + $0x4c8] sm:$0xff]  ;;  %v3664_v18 = vld [vmem:[#allocation5 + $0x5c0] sm:$0xff]  ;;  %v5558_v15 = vpack.c.bf16 %v3647_v21, %v3646_v19  ;;  %v3634_v29 = vld [vmem:[#allocation5 + $0x4d0] sm:$0xff] }
 0x36d   :  { %5515 = vmatpush3.bf16.msra.mxu0 %v5514_v0  ;;  %5547 = vmatpush3.bf16.msra.mxu1 %v5546_v10  ;;  %5684 = vpow2.f32 %v3358_v43  ;;  %v5554_v0 = vpack.c.bf16 %v3645_v39, %v3644_v22  ;;  %v3614_v10 = vld [vmem:[#allocation5 + $0x430] sm:$0xff]  ;;  %v3665_v13 = vld [vmem:[#allocation5 + $0x5c8] sm:$0xff]  ;;  %v3616_v59 = vld [vmem:[#allocation5 + $0x440] sm:$0xff]  ;;  %v5528_v37 = vpack.c.bf16 %v3633_v60, %v3632_v35  ;;  %vm3376_vm15 = vcmp.ge.f32.partialorder %v8386_v3, 0.0 }
 0x36e   :  { %5517 = vmatprep.subr.bf16.mxu0 %v5516_v47  ;;  %5549 = vmatprep.subr.bf16.mxu1 %v5548_v27  ;;  %v5526_v47 = vpack.c.bf16 %v3615_v28, %v3614_v10  ;;  %v3617_v11 = vld [vmem:[#allocation5 + $0x448] sm:$0xff]  ;;  %v5560_v6 = vpack.c.bf16 %v3665_v13, %v3664_v18  ;;  %v3648_v41 = vld [vmem:[#allocation5 + $0x540] sm:$0xff]  ;;  %v3635_v23 = vld [vmem:[#allocation5 + $0x4d8] sm:$0xff]  ;;  %v2707_v13 = vrot.slane %v8326_v34, %v2674_v33  ;;  %vm3378_vm0 = vcmp.ge.f32.partialorder %v8388_v54, 0.0 }
 0x36f   :  { %v3649_v40 = vld [vmem:[#allocation5 + $0x548] sm:$0xff]  ;;  %v3666_v38 = vld [vmem:[#allocation5 + $0x5d0] sm:$0xff]  ;;  %v3667_v58 = vld [vmem:[#allocation5 + $0x5d8] sm:$0xff]  ;;  %v5530_v32 = vpack.c.bf16 %v3617_v11, %v3616_v59  ;;  %vm3377_vm1 = vcmp.ge.f32.partialorder %v8393_v48, 0.0  ;;  %vm3379_vm2 = vcmp.ge.f32.partialorder %v8395_v56, 0.0 }
 0x370   :  { %v3618_v16 = vld [vmem:[#allocation5 + $0x450] sm:$0xff]  ;;  %v3619_v12 = vld [vmem:[#allocation5 + $0x458] sm:$0xff]  ;;  %v3637_v9 = vld [vmem:[#allocation5 + $0x4e8] sm:$0xff] }
 0x371   :  { %5519 = vmatpush3.bf16.msra.mxu0 %v5518_v52  ;;  %5551 = vmatpush3.bf16.msra.mxu1 %v5550_v50  ;;  %v3650_v42 = vld [vmem:[#allocation5 + $0x550] sm:$0xff]  ;;  %v3651_v43 = vld [vmem:[#allocation5 + $0x558] sm:$0xff]  ;;  %v5562_v52 = vpack.c.bf16 %v3649_v40, %v3648_v41  ;;  %v3636_v50 = vld [vmem:[#allocation5 + $0x4e0] sm:$0xff] }
 0x372   :  { %5521 = vmatprep.subr.bf16.mxu0 %v5520_v17  ;;  %5553 = vmatprep.subr.bf16.mxu1 %v5552_v8  ;;  %v3668_v62 = vld [vmem:[#allocation5 + $0x5e0] sm:$0xff]  ;;  %v5532_v17 = vpack.c.bf16 %v3635_v23, %v3634_v29  ;;  %v5564_v8 = vpack.c.bf16 %v3667_v58, %v3666_v38  ;;  %v3669_v22 = vld [vmem:[#allocation5 + $0x5e8] sm:$0xff]  ;;  %v8437_v4 = vld [vmem:[#allocation5 + $0x4f0] sm:$0xff]  ;;  %v5566_v19 = vpack.c.bf16 %v3651_v43, %v3650_v42 }
 0x373   :  { %v8429_v39 = vld [vmem:[#allocation5 + $0x460] sm:$0xff]  ;;  %v8431_v25 = vld [vmem:[#allocation5 + $0x468] sm:$0xff]  ;;  %v8443_v10 = vld [vmem:[#allocation5 + $0x5f8] sm:$0xff]  ;;  %v5536_v21 = vpack.c.bf16 %v3637_v9, %v3636_v50 }
 0x374   :  { %v8417_v26 = vpop.eup %5678  ;;  %v8433_v5 = vld [vmem:[#allocation5 + $0x560] sm:$0xff]  ;;  %v8435_v57 = vld [vmem:[#allocation5 + $0x568] sm:$0xff]  ;;  %v8445_v28 = vld [vmem:[#allocation5 + $0x470] sm:$0xff]  ;;  %v5538_v33 = vpack.c.bf16 %v8431_v25, %v8429_v39 }
 0x375   :  { %v8419_v2 = vpop.eup %5680  ;;  %v3392_v45 = vadd.f32 1.0, %v8417_v26  ;;  %5523 = vmatpush3.bf16.msra.mxu0 %v5522_v53  ;;  %5555 = vmatpush3.bf16.msra.mxu1 %v5554_v0  ;;  %v8439_v53 = vld [vmem:[#allocation5 + $0x4f8] sm:$0xff]  ;;  %v8441_v0 = vld [vmem:[#allocation5 + $0x5f0] sm:$0xff]  ;;  %v8453_v18 = vld [vmem:[#allocation5 + $0x680] sm:$0xff] }
 0x376   :  { %v3394_v46 = vadd.f32 1.0, %v8419_v2  ;;  %5525 = vmatprep.subr.bf16.mxu0 %v5524_v31  ;;  %5557 = vmatprep.subr.bf16.mxu1 %v5556_v20  ;;  %v8423_v1 = vpop.eup %5682  ;;  %v8447_v31 = vld [vmem:[#allocation5 + $0x478] sm:$0xff]  ;;  %v5534_v20 = vpack.c.bf16 %v3619_v12, %v3618_v16  ;;  %v8449_v35 = vld [vmem:[#allocation5 + $0x570] sm:$0xff]  ;;  %v8463_v59 = vld [vmem:[#allocation5 + $0x780] sm:$0xff]  ;;  %v5572_v41 = vpack.c.bf16 %v8443_v10, %v8441_v0 }
 0x377   :  { %5686 = vrcp.f32 %v3392_v45  ;;  %v8425_v27 = vpop.eup %5684  ;;  %v3393_v14 = vadd.f32 1.0, %v8423_v1  ;;  %v8451_v60 = vld [vmem:[#allocation5 + $0x578] sm:$0xff]  ;;  %v2715_v45 = vrot.slane %v8326_v34, %v2682_v44  ;;  %v8465_v11 = vld [vmem:[#allocation5 + $0x788] sm:$0xff]  ;;  %v5570_v44 = vpack.c.bf16 %v8435_v57, %v8433_v5  ;;  %v3690_v5 = vld [vmem:[#allocation5 + $0x690] sm:$0xff] }
 0x378   :  { %5688 = vrcp.f32 %v3394_v46  ;;  %v3395_v55 = vadd.f32 1.0, %v8425_v27  ;;  %v2711_v46 = vrot.slane %v8326_v34, %v2678_v63  ;;  %v5542_v40 = vpack.c.bf16 %v8447_v31, %v8445_v28  ;;  %v8483_v63 = vld [vmem:[#allocation5 + $0x600] sm:$0xff]  ;;  %v8495_v16 = vld [vmem:[#allocation5 + $0x708] sm:$0xff]  ;;  %v3691_v3 = vld [vmem:[#allocation5 + $0x698] sm:$0xff] }
 0x379   :  { %5527 = vmatpush3.bf16.msra.mxu0 %v5526_v47  ;;  %5559 = vmatpush3.bf16.msra.mxu1 %v5558_v15  ;;  %5690 = vrcp.f32 %v3393_v14  ;;  %v5568_v47 = vpack.c.bf16 %v3669_v22, %v3668_v62  ;;  %v8461_v15 = vld [vmem:[#allocation5 + $0x688] sm:$0xff]  ;;  %v5574_v23 = vpack.c.bf16 %v8451_v60, %v8449_v35  ;;  %v5608_v58 = vpack.c.bf16 %v8465_v11, %v8463_v59  ;;  %v8493_v14 = vld [vmem:[#allocation5 + $0x700] sm:$0xff]  ;;  %v3723_v31 = vld [vmem:[#allocation5 + $0x798] sm:$0xff] }
 0x37a   :  { %5529 = vmatprep.subr.bf16.mxu0 %v5528_v37  ;;  %5561 = vmatprep.subr.bf16.mxu1 %v5560_v6  ;;  %5692 = vrcp.f32 %v3395_v55  ;;  %v2719_v37 = vrot.slane %v8326_v34, %v2686_v61  ;;  %v5540_v6 = vpack.c.bf16 %v8439_v53, %v8437_v4  ;;  %v5576_v38 = vpack.c.bf16 %v8461_v15, %v8453_v18  ;;  %v8716_v18 = vld [vmem:[#allocation25_spill] sm:$0xff]  ;;  %v3674_v15 = vld [vmem:[#allocation5 + $0x610] sm:$0xff]  ;;  %v3675_v59 = vld [vmem:[#allocation5 + $0x618] sm:$0xff] }
 0x37b   :  { %v5610_v39 = vpack.c.bf16 %v8495_v16, %v8493_v14  ;;  %v5580_v35 = vpack.c.bf16 %v3691_v3, %v3690_v5  ;;  %v3706_v11 = vld [vmem:[#allocation5 + $0x710] sm:$0xff]  ;;  %v3708_v14 = vld [vmem:[#allocation5 + $0x720] sm:$0xff]  ;;  %v3709_v16 = vld [vmem:[#allocation5 + $0x728] sm:$0xff] }
 0x37c   :  { %v3696_v5 = vld [vmem:[#allocation5 + $0x6c0] sm:$0xff]  ;;  %v3697_v3 = vld [vmem:[#allocation5 + $0x6c8] sm:$0xff] }
 0x37d   :  { %5531 = vmatpush3.bf16.msra.mxu0 %v5530_v32  ;;  %5563 = vmatpush3.bf16.msra.mxu1 %v5562_v52 }
 0x37e   :  { %5533 = vmatprep.subr.bf16.mxu0 %v5532_v17  ;;  %5565 = vmatprep.subr.bf16.mxu1 %v5564_v8  ;;  %v5578_v17 = vpack.c.bf16 %v8485_v51, %v8483_v63  ;;  %v3724_v51 = vld [vmem:[#allocation5 + $0x7a0] sm:$0xff] }
 0x381   :  { %v5687_v61 = vpop.eup %5686  ;;  %5535 = vmatpush3.bf16.msra.mxu0 %v5534_v20  ;;  %5567 = vmatpush3.bf16.msra.mxu1 %v5566_v19  ;;  %v3228_v34 = vpop.f32.mrb[14].mxu0 }
 0x382   :  { %v3299_v29 = vpop.f32.mrb[14].mxu1  ;;  %v5689_v12 = vpop.eup %5688  ;;  %v3440_v42 = vmul.f32 %v5687_v61, %v8417_v26  ;;  %v8498_v43 = vadd.f32 %v3228_v34, %v2707_v13  ;;  %5537 = vmatprep.subr.bf16.mxu0 %v5536_v21  ;;  %5569 = vmatprep.subr.bf16.mxu1 %v5568_v47 }
 0x383   :  { %v8500_v55 = vadd.f32 %v3299_v29, %v2715_v45  ;;  %v3230_v32 = vpop.f32.mrb[15].mxu0  ;;  %v3301_v52 = vpop.f32.mrb[15].mxu1  ;;  %v3442_v50 = vmul.f32 %v5689_v12, %v8419_v2  ;;  %v8717_v45 = vld [vmem:[#allocation15_spill] sm:$0xff]  ;;  %v3676_v29 = vld [vmem:[#allocation5 + $0x620] sm:$0xff] }
 0x384   :  { %v8503_v9 = vadd.f32 %v3230_v32, %v2711_v46  ;;  %v8505_v62 = vadd.f32 %v3301_v52, %v2719_v37  ;;  %v5691_v8 = vpop.eup %5690  ;;  %v3316_v26 = vand.u32 2147483647, %v8498_v43  ;;  %v3456_v57 = vsel %vm3376_vm15, %v5687_v61, %v3440_v42  ;;  %v8718_v46 = vld [vmem:[#allocation14_spill] sm:$0xff]  ;;  %v3695_v42 = vld [vmem:[#allocation5 + $0x6b8] sm:$0xff]  ;;  %v3726_v32 = vld [vmem:[#allocation5 + $0x7b0] sm:$0xff] }
 0x385   :  { %v3318_v22 = vand.u32 2147483647, %v8500_v55  ;;  %v5693_v25 = vpop.eup %5692  ;;  %v3441_v2 = vmul.f32 %v5691_v8, %v8423_v1  ;;  %5539 = vmatpush3.bf16.msra.mxu0 %v5538_v33  ;;  %5571 = vmatpush3.bf16.msra.mxu1 %v5570_v44  ;;  %v3458_v10 = vsel %vm3378_vm0, %v5689_v12, %v3442_v50  ;;  %v3722_v1 = vld [vmem:[#allocation5 + $0x790] sm:$0xff]  ;;  %v3472_v37 = vmul.f32 %v3456_v57, %v8718_v46  ;;  %v3707_v44 = vld [vmem:[#allocation5 + $0x718] sm:$0xff]  ;;  %v3725_v61 = vld [vmem:[#allocation5 + $0x7a8] sm:$0xff] }
 0x386   :  { %v3443_v4 = vmul.f32 %v5693_v25, %v8425_v27  ;;  %v3332_v53 = vsub.f32 0.0, %v3316_v26  ;;  %5541 = vmatprep.subr.bf16.mxu0 %v5540_v6  ;;  %5573 = vmatprep.subr.bf16.mxu1 %v5572_v41  ;;  %v3317_v54 = vand.u32 2147483647, %v8503_v9  ;;  %v3319_v48 = vand.u32 2147483647, %v8505_v62  ;;  %v3692_v6 = vld [vmem:[#allocation5 + $0x6a0] sm:$0xff] }
 0x387   :  { %v3334_v0 = vsub.f32 0.0, %v3318_v22  ;;  %v3457_v28 = vsel %vm3377_vm1, %v5691_v8, %v3441_v2  ;;  %v3474_v33 = vmul.f32 %v3458_v10, %v7967_v7  ;;  %v5612_v56 = vpack.c.bf16 %v3723_v31, %v3722_v1  ;;  %v3693_v41 = vld [vmem:[#allocation5 + $0x6a8] sm:$0xff]  ;;  %v3694_v12 = vld [vmem:[#allocation5 + $0x6b0] sm:$0xff]  ;;  %v3727_v52 = vld [vmem:[#allocation5 + $0x7b8] sm:$0xff] }
 0x388   :  { %v3459_v20 = vsel %vm3379_vm2, %v5693_v25, %v3443_v4  ;;  %v3360_v19 = vmul.f32 1.442695, %v3332_v53  ;;  %v3333_v60 = vsub.f32 0.0, %v3317_v54  ;;  %v3335_v27 = vsub.f32 0.0, %v3319_v48  ;;  %v3678_v8 = vld [vmem:[#allocation5 + $0x630] sm:$0xff]  ;;  %v3679_v26 = vld [vmem:[#allocation5 + $0x638] sm:$0xff] }
 0x389   :  { %v3364_v21 = vmul.f32 1.442695, %v3334_v0  ;;  %5543 = vmatpush3.bf16.msra.mxu0 %v5542_v40  ;;  %5575 = vmatpush3.bf16.msra.mxu1 %v5574_v23  ;;  %v3473_v13 = vmul.f32 %v3457_v28, %v8716_v18  ;;  %v3475_v47 = vmul.f32 %v3459_v20, %v8717_v45  ;;  %v5582_v7 = vpack.c.bf16 %v3675_v59, %v3674_v15  ;;  %v3677_v23 = vld [vmem:[#allocation5 + $0x628] sm:$0xff]  ;;  %v3710_v25 = vld [vmem:[#allocation5 + $0x730] sm:$0xff]  ;;  %v3711_v2 = vld [vmem:[#allocation5 + $0x738] sm:$0xff] }
 0x38a   :  { %5694 = vpow2.f32 %v3360_v19  ;;  %5577 = vmatprep.subr.bf16.mxu0 %v5576_v38  ;;  %5609 = vmatprep.subr.bf16.mxu1 %v5608_v58  ;;  %v3362_v40 = vmul.f32 1.442695, %v3333_v60  ;;  %v3366_v63 = vmul.f32 1.442695, %v3335_v27  ;;  %v5614_v34 = vpack.c.bf16 %v3707_v44, %v3706_v11  ;;  %v3728_v57 = vld [vmem:[#allocation5 + $0x7c0] sm:$0xff]  ;;  %v3729_v4 = vld [vmem:[#allocation5 + $0x7c8] sm:$0xff] }
 0x38b   :  { %5696 = vpow2.f32 %v3364_v21  ;;  %4087 = vmatprep.mubr.f32.mxu0 %v3473_v13  ;;  %4157 = vmatprep.mubr.f32.mxu1 %v3475_v47  ;;  %v5584_v38 = vpack.c.bf16 %v3693_v41, %v3692_v6  ;;  %v5616_v58 = vpack.c.bf16 %v3725_v61, %v3724_v51  ;;  %v5586_v50 = vpack.c.bf16 %v3677_v23, %v3676_v29  ;;  %v3680_v48 = vld [vmem:[#allocation5 + $0x640] sm:$0xff]  ;;  %v3681_v1 = vld [vmem:[#allocation5 + $0x648] sm:$0xff]  ;;  %v3698_v60 = vld [vmem:[#allocation5 + $0x6d0] sm:$0xff] }
 0x38c   :  { %4088 = vmatmul.mubr.f32.vlgmr.msra.gmra.mrb[20].mxu0 %v3472_v37  ;;  %4158 = vmatmul.mubr.f32.vlgmr.msra.gmra.mrb[20].mxu1 %v3474_v33  ;;  %5698 = vpow2.f32 %v3362_v40  ;;  %v5588_v22 = vpack.c.bf16 %v3695_v42, %v3694_v12  ;;  %v5590_v28 = vpack.c.bf16 %v3679_v26, %v3678_v8  ;;  %v5622_v54 = vpack.c.bf16 %v3711_v2, %v3710_v25  ;;  %v3712_v21 = vld [vmem:[#allocation5 + $0x740] sm:$0xff]  ;;  %v3699_v18 = vld [vmem:[#allocation5 + $0x6d8] sm:$0xff]  ;;  %v3730_v13 = vld [vmem:[#allocation5 + $0x7d0] sm:$0xff] }
 0x38d   :  { %5579 = vmatpush3.bf16.msra.mxu0 %v5578_v17  ;;  %5611 = vmatpush3.bf16.msra.mxu1 %v5610_v39  ;;  %5700 = vpow2.f32 %v3366_v63  ;;  %v5618_v17 = vpack.c.bf16 %v3709_v16, %v3708_v14  ;;  %v5620_v39 = vpack.c.bf16 %v3727_v52, %v3726_v32  ;;  %v5592_v20 = vpack.c.bf16 %v3697_v3, %v3696_v5  ;;  %v3731_v45 = vld [vmem:[#allocation5 + $0x7d8] sm:$0xff]  ;;  %v3682_v37 = vld [vmem:[#allocation5 + $0x650] sm:$0xff]  ;;  %v3700_v40 = vld [vmem:[#allocation5 + $0x6e0] sm:$0xff] }
 0x38e   :  { %5581 = vmatprep.subr.bf16.mxu0 %v5580_v35  ;;  %5613 = vmatprep.subr.bf16.mxu1 %v5612_v56  ;;  %v5624_v19 = vpack.c.bf16 %v3729_v4, %v3728_v57  ;;  %v3713_v35 = vld [vmem:[#allocation5 + $0x748] sm:$0xff]  ;;  %v5594_v11 = vpack.c.bf16 %v3681_v1, %v3680_v48  ;;  %v3683_v33 = vld [vmem:[#allocation5 + $0x658] sm:$0xff]  ;;  %v5596_v56 = vpack.c.bf16 %v3699_v18, %v3698_v60  ;;  %v3714_v6 = vld [vmem:[#allocation5 + $0x750] sm:$0xff]  ;;  %vm3380_vm3 = vcmp.ge.f32.partialorder %v8498_v43, 0.0 }
 0x38f   :  { %v5626_v46 = vpack.c.bf16 %v3713_v35, %v3712_v21  ;;  %v5628_v44 = vpack.c.bf16 %v3731_v45, %v3730_v13  ;;  %v3715_v41 = vld [vmem:[#allocation5 + $0x758] sm:$0xff]  ;;  %v3701_v63 = vld [vmem:[#allocation5 + $0x6e8] sm:$0xff]  ;;  %v3732_v51 = vld [vmem:[#allocation5 + $0x7e0] sm:$0xff]  ;;  %vm3382_vm4 = vcmp.ge.f32.partialorder %v8500_v55, 0.0  ;;  %vm3381_vm5 = vcmp.ge.f32.partialorder %v8503_v9, 0.0 }
 0x390   :  { %v3733_v61 = vld [vmem:[#allocation5 + $0x7e8] sm:$0xff]  ;;  %v3684_v29 = vld [vmem:[#allocation5 + $0x660] sm:$0xff]  ;;  %v3702_v12 = vld [vmem:[#allocation5 + $0x6f0] sm:$0xff]  ;;  %vm3383_vm6 = vcmp.ge.f32.partialorder %v8505_v62, 0.0 }
 0x391   :  { %5583 = vmatpush3.bf16.msra.mxu0 %v5582_v7  ;;  %5615 = vmatpush3.bf16.msra.mxu1 %v5614_v34  ;;  %v5598_v7 = vpack.c.bf16 %v3683_v33, %v3682_v37  ;;  %v5630_v34 = vpack.c.bf16 %v3715_v41, %v3714_v6  ;;  %v3685_v23 = vld [vmem:[#allocation5 + $0x668] sm:$0xff]  ;;  %v3716_v14 = vld [vmem:[#allocation5 + $0x760] sm:$0xff]  ;;  %v3703_v42 = vld [vmem:[#allocation5 + $0x6f8] sm:$0xff] }
 0x392   :  { %5585 = vmatprep.subr.bf16.mxu0 %v5584_v38  ;;  %5617 = vmatprep.subr.bf16.mxu1 %v5616_v58  ;;  %v5600_v38 = vpack.c.bf16 %v3701_v63, %v3700_v40  ;;  %v5632_v58 = vpack.c.bf16 %v3733_v61, %v3732_v51  ;;  %v3717_v16 = vld [vmem:[#allocation5 + $0x768] sm:$0xff]  ;;  %v3734_v32 = vld [vmem:[#allocation5 + $0x7f0] sm:$0xff]  ;;  %v3735_v52 = vld [vmem:[#allocation5 + $0x7f8] sm:$0xff] }
 0x393   :  { %v5634_v8 = vpack.c.bf16 %v3717_v16, %v3716_v14  ;;  %v3686_v26 = vld [vmem:[#allocation5 + $0x670] sm:$0xff]  ;;  %v5636_v25 = vpack.c.bf16 %v3735_v52, %v3734_v32  ;;  %v3687_v2 = vld [vmem:[#allocation5 + $0x678] sm:$0xff]  ;;  %v4311_v62 = vld [vmem:[%s8559_s6] ss:$0 sm:$0xff] }
 0x394   :  { %v8527_v53 = vpop.eup %5694  ;;  %v3718_v5 = vld [vmem:[#allocation5 + $0x770] sm:$0xff]  ;;  %v3719_v3 = vld [vmem:[#allocation5 + $0x778] sm:$0xff]  ;;  %v5606_v48 = vpack.c.bf16 %v3687_v2, %v3686_v26 }
 0x395   :  { %v8529_v0 = vpop.eup %5696  ;;  %v3396_v10 = vadd.f32 1.0, %v8527_v53  ;;  %5587 = vmatpush3.bf16.msra.mxu0 %v5586_v50  ;;  %5619 = vmatpush3.bf16.msra.mxu1 %v5618_v17  ;;  %v5602_v17 = vpack.c.bf16 %v3685_v23, %v3684_v29  ;;  %v5638_v1 = vpack.c.bf16 %v3719_v3, %v3718_v5 }
 0x396   :  { %v3398_v31 = vadd.f32 1.0, %v8529_v0  ;;  %5589 = vmatprep.subr.bf16.mxu0 %v5588_v22  ;;  %5621 = vmatprep.subr.bf16.mxu1 %v5620_v39  ;;  %v5699_v27 = vpop.eup %5698  ;;  %v5604_v39 = vpack.c.bf16 %v3703_v42, %v3702_v12 }
 0x397   :  { %5702 = vrcp.f32 %v3396_v10  ;;  %v8533_v47 = vpop.eup %5700  ;;  %v3397_v15 = vadd.f32 1.0, %v5699_v27 }
 0x398   :  { %5704 = vrcp.f32 %v3398_v31  ;;  %v3399_v59 = vadd.f32 1.0, %v8533_v47 }
 0x399   :  { %5591 = vmatpush3.bf16.msra.mxu0 %v5590_v28  ;;  %5623 = vmatpush3.bf16.msra.mxu1 %v5622_v54  ;;  %5706 = vrcp.f32 %v3397_v15 }
 0x39a   :  { %5593 = vmatprep.subr.bf16.mxu0 %v5592_v20  ;;  %5625 = vmatprep.subr.bf16.mxu1 %v5624_v19  ;;  %5708 = vrcp.f32 %v3399_v59 }
 0x39d   :  { %5595 = vmatpush3.bf16.msra.mxu0 %v5594_v11  ;;  %5627 = vmatpush3.bf16.msra.mxu1 %v5626_v46 }
 0x39e   :  { %5597 = vmatprep.subr.bf16.mxu0 %v5596_v56  ;;  %5629 = vmatprep.subr.bf16.mxu1 %v5628_v44 }
 0x3a1   :  { %v5703_v50 = vpop.eup %5702  ;;  %5599 = vmatpush3.bf16.msra.mxu0 %v5598_v7  ;;  %5631 = vmatpush3.bf16.msra.mxu1 %v5630_v34 }
 0x3a2   :  { %v5705_v22 = vpop.eup %5704  ;;  %5601 = vmatprep.subr.bf16.mxu0 %v5600_v38  ;;  %5633 = vmatprep.subr.bf16.mxu1 %v5632_v58  ;;  %v3444_v57 = vmul.f32 %v5703_v50, %v8527_v53 }
 0x3a3   :  { %v3446_v4 = vmul.f32 %v5705_v22, %v8529_v0  ;;  %v5707_v10 = vpop.eup %5706 }
 0x3a4   :  { %v5709_v28 = vpop.eup %5708  ;;  %v3445_v54 = vmul.f32 %v5707_v10, %v5699_v27  ;;  %v3460_v53 = vsel %vm3380_vm3, %v5703_v50, %v3444_v57 }
 0x3a5   :  { %5603 = vmatpush3.bf16.msra.mxu0 %v5602_v17  ;;  %5635 = vmatpush3.bf16.msra.mxu1 %v5634_v8  ;;  %v3447_v31 = vmul.f32 %v5709_v28, %v8533_v47  ;;  %v3462_v20 = vsel %vm3382_vm4, %v5705_v22, %v3446_v4  ;;  %v3476_v55 = vmul.f32 %v3460_v53, %v8141_v36 }
 0x3a6   :  { %5605 = vmatprep.subr.bf16.mxu0 %v5604_v39  ;;  %5637 = vmatprep.subr.bf16.mxu1 %v5636_v25  ;;  %v3461_v0 = vsel %vm3381_vm5, %v5707_v10, %v3445_v54  ;;  %v3478_v9 = vmul.f32 %v3462_v20, %v8214_v30 }
 0x3a7   :  { %v3463_v19 = vsel %vm3383_vm6, %v5709_v28, %v3447_v31  ;;  %v3477_v21 = vmul.f32 %v3461_v0, %v8064_v24 }
 0x3a8   :  { %v3479_v43 = vmul.f32 %v3463_v19, %v8199_v49 }
 0x3a9   :  { %5607 = vmatpush3.bf16.msra.mxu0 %v5606_v48  ;;  %5639 = vmatpush3.bf16.msra.mxu1 %v5638_v1 }
 0x3aa   :  { %4227 = vmatprep.mubr.f32.mxu0 %v3477_v21  ;;  %4297 = vmatprep.mubr.f32.mxu1 %v3479_v43 }
 0x3ac   :  { %4228 = vmatmul.mubr.f32.vlgmr.msra.gmra.mrb[22].mxu0 %v3476_v55  ;;  %4298 = vmatmul.mubr.f32.vlgmr.msra.gmra.mrb[22].mxu1 %v3478_v9 }
 0x41e   :  { %v4624_v35 = vpop.f32.mrb[16].mxu0 }
 0x41f   :  { %v4659_v60 = vpop.f32.mrb[16].mxu1  ;;  %v4625_v27 = vpop.f32.mrb[17].mxu0 }
 0x420   :  { %v4626_v24 = vadd.f32 %v4625_v27, %v4624_v35  ;;  %v4660_v18 = vpop.f32.mrb[17].mxu1 }
 0x421   :  { %v4661_v13 = vadd.f32 %v4660_v18, %v4659_v60 }
 0x422   :  { %v3810_v45 = vadd.f32 %v4626_v24, %v4311_v62 }
 0x424   :  { %v3880_v49 = vadd.f32 %v4661_v13, %v3810_v45 }
 0x43f   :  { %v4694_v47 = vpop.f32.mrb[18].mxu0  ;;  %v4729_v36 = vpop.f32.mrb[18].mxu1 }
 0x440   :  { %v4695_v15 = vpop.f32.mrb[19].mxu0  ;;  %v4730_v30 = vpop.f32.mrb[19].mxu1 }
 0x441   :  { %v4696_v59 = vadd.f32 %v4695_v15, %v4694_v47  ;;  %v4731_v11 = vadd.f32 %v4730_v30, %v4729_v36 }
 0x443   :  { %v3950_v46 = vadd.f32 %v4696_v59, %v3880_v49 }
 0x445   :  { %v4020_v37 = vadd.f32 %v4731_v11, %v3950_v46 }
 0x45f   :  { %v4764_v33 = vpop.f32.mrb[20].mxu0  ;;  %v4799_v56 = vpop.f32.mrb[20].mxu1 }
 0x460   :  { %v4765_v44 = vpop.f32.mrb[21].mxu0  ;;  %v4800_v6 = vpop.f32.mrb[21].mxu1 }
 0x461   :  { %v4766_v41 = vadd.f32 %v4765_v44, %v4764_v33  ;;  %v4801_v40 = vadd.f32 %v4800_v6, %v4799_v56 }
 0x463   :  { %v4090_v63 = vadd.f32 %v4766_v41, %v4020_v37 }
 0x465   :  { %v4160_v51 = vadd.f32 %v4801_v40, %v4090_v63 }
 0x47f   :  { %v4834_v61 = vpop.f32.mrb[22].mxu0  ;;  %v4869_v7 = vpop.f32.mrb[22].mxu1 }
 0x480   :  { %v4835_v34 = vpop.f32.mrb[23].mxu0  ;;  %v4870_v29 = vpop.f32.mrb[23].mxu1 }
 0x481   :  { %v4836_v23 = vadd.f32 %v4835_v34, %v4834_v61  ;;  %v4871_v38 = vadd.f32 %v4870_v29, %v4869_v7 }
 0x483   :  { %v4230_v58 = vadd.f32 %v4836_v23, %v4160_v51 }
 0x485   :  { %v4300_v14 = vadd.f32 %v4871_v38, %v4230_v58 }
 0x487   :  { %4303 = vst [vmem:[%s8560_s7] sm:$0xff] %v4300_v14 }
 0x488   :  { %4308 = vsyncpa [#allocation4], 1 }
 0x489   :  { %4309 = vsyncpa [#allocation6], 1 }

</bundles_post_ra>
